<compile_context>
chip_gen: v5e
topology: v5e:2x2
jax: 0.10.0
libtpu: 0.0.40
codegen_flags: <defaults>
</compile_context>

<pallas_src>
import functools

import jax
import jax.numpy as jnp
from jax.experimental import pallas as pl
from jax.experimental.pallas import tpu as pltpu

BN_EPS = 1e-5
LANE = 128


def _round_up(v, m):
    return (v + m - 1) // m * m


def _device_kind():
    try:
        return jax.devices()[0].device_kind.lower()
    except Exception:
        return ""


def _pick_tco(cout_pad):
    # v5e MXU is 128-wide: 256-wide output tiles gain nothing there and double
    # the weight/output VMEM per step.  Prefer 256 on v6e / v7x.
    if cout_pad % 256 == 0 and "v5" not in _device_kind():
        return 256
    return 128


def _vmem_limit_bytes():
    try:
        cap = int(pltpu.get_tpu_info().vmem_capacity_bytes)
    except Exception:
        cap = 64 * 1024 * 1024
    # ~3/4 of physical, clamped: ~96 MiB on v5e/v6e (128 MiB), ~48 MiB on v7x.
    return int(min(96 * 1024 * 1024, max(32 * 1024 * 1024, cap * 3 // 4)))


def _compiler_params(semantics):
    return pltpu.CompilerParams(
        dimension_semantics=semantics,
        vmem_limit_bytes=_vmem_limit_bytes())


# ----------------------------- Pallas kernels ------------------------------ #

def _conv3x3_kernel(*refs, n_phase, stride, ho, wo, cin, tco):
    """3x3 conv (any stride) from pre-split stride-phases of the padded input.

    refs = (phase_refs..., w_ref, y_ref, stats_ref)
      phase_refs[p] : (Hp, Wp, cin)  bf16  phase (py, px) of the padded input
      w_ref         : (9, cin, tco)  bf16  tap-major weights
      y_ref         : (ho, wo, tco)  bf16  pre-BN conv output
      stats_ref     : (2, tco)       f32   per-channel [sum, sum_sq] partials
    """
    phase_refs = refs[:n_phase]
    w_ref, y_ref, st_ref = refs[n_phase:]

    acc = jnp.zeros((ho * wo, tco), jnp.float32)
    for ky in range(3):
        for kx in range(3):
            ph = phase_refs[(ky % stride) * stride + (kx % stride)]
            dy, dx = ky // stride, kx // stride
            tap = ph[dy:dy + ho, dx:dx + wo, :]            # (ho, wo, cin) bf16
            acc = acc + jnp.dot(tap.reshape(ho * wo, cin),
                                w_ref[ky * 3 + kx],
                                preferred_element_type=jnp.float32)

    y_ref[...] = acc.reshape(ho, wo, tco).astype(y_ref.dtype)
    st_ref[0:1, :] = jnp.sum(acc, axis=0, keepdims=True)
    st_ref[1:2, :] = jnp.sum(acc * acc, axis=0, keepdims=True)


def _bn_relu_conv3x3_kernel(x_ref, sc_ref, sh_ref, w_ref, y_ref, st_ref,
                            pad_ref, *, ho, wo, cin, tco):
    """Fused: BN(prev, folded scale/shift) + ReLU + zero-pad + 3x3 s=1 conv.

    x_ref  : (ho, wo, cin)     bf16  raw (pre-BN) output of the previous conv
    sc/sh  : (1, cin)          f32   folded BN scale / shift of previous layer
    w_ref  : (9, cin, tco)     bf16
    y_ref  : (ho, wo, tco)     bf16  pre-BN conv output
    st_ref : (2, tco)          f32   per-channel [sum, sum_sq] partials
    pad_ref: (ho+2, wo+4, cin) bf16  VMEM scratch; activation lives at
                                     rows [1, ho], cols [2, wo+2) so that every
                                     store is 32-bit aligned in the packed dim.
    """
    # Recomputed every output-channel block: an O(ho*wo*cin) elementwise
    # prologue is negligible next to 9 MXU matmuls and keeps both grid axes
    # embarrassingly parallel.
    sc = sc_ref[...].reshape(1, 1, cin)
    sh = sh_ref[...].reshape(1, 1, cin)
    act = jnp.maximum(x_ref[...].astype(jnp.float32) * sc + sh, 0.0)
    act = act.astype(jnp.bfloat16)                          # cast once, not per tap

    # Zero only the border (rows 0 / ho+1, columns [0,2) / [wo+2, wo+4)).
    zrow = jnp.zeros((1, wo + 4, cin), jnp.bfloat16)
    zcol = jnp.zeros((ho + 2, 2, cin), jnp.bfloat16)
    pad_ref[0:1, :, :] = zrow
    pad_ref[ho + 1:ho + 2, :, :] = zrow
    pad_ref[:, 0:2, :] = zcol
    pad_ref[:, wo + 2:wo + 4, :] = zcol
    pad_ref[1:ho + 1, 2:wo + 2, :] = act

    acc = jnp.zeros((ho * wo, tco), jnp.float32)
    for ky in range(3):
        for kx in range(3):
            # padded-frame column b maps to scratch column b+1
            tap = pad_ref[ky:ky + ho, kx + 1:kx + 1 + wo, :]   # (ho, wo, cin) bf16
            acc = acc + jnp.dot(tap.reshape(ho * wo, cin),
                                w_ref[ky * 3 + kx],
                                preferred_element_type=jnp.float32)

    y_ref[...] = acc.reshape(ho, wo, tco).astype(y_ref.dtype)
    st_ref[0:1, :] = jnp.sum(acc, axis=0, keepdims=True)
    st_ref[1:2, :] = jnp.sum(acc * acc, axis=0, keepdims=True)


def _bn_apply_kernel(y_ref, sc_ref, sh_ref, o_ref, *, tco):
    """Final BN (no ReLU: b_bn is the final_bn of BasicTransform)."""
    sc = sc_ref[...].reshape(1, 1, tco)
    sh = sh_ref[...].reshape(1, 1, tco)
    o_ref[...] = y_ref[...].astype(jnp.float32) * sc + sh


# ------------------------------ Pallas wrappers ----------------------------- #

def _make_phases(x_nhwc, stride):
    """Zero-pad spatially by 1 and split into stride*stride phases so the conv
    kernel only needs contiguous (un-strided) static slices."""
    xp = jnp.pad(x_nhwc, ((0, 0), (1, 1), (1, 1), (0, 0)))
    return [xp[:, py::stride, px::stride, :]
            for py in range(stride) for px in range(stride)]


def conv3x3_stats(x_bf16, w, stride):
    """3x3 conv (pad=1) + per-channel batch-stat partials.  x: (N,H,W,Cin) bf16."""
    n, h, wdt, cin = x_bf16.shape
    cout = w.shape[-1]
    tco = _pick_tco(cout)
    ho = (h - 1) // stride + 1
    wo = (wdt - 1) // stride + 1
    phases = _make_phases(x_bf16, stride)

    in_specs = []
    for ph in phases:
        _, hp, wp, _ = ph.shape
        in_specs.append(
            pl.BlockSpec((None, hp, wp, cin), lambda i, j: (i, 0, 0, 0)))
    in_specs.append(pl.BlockSpec((9, cin, tco), lambda i, j: (0, 0, j)))

    kernel = functools.partial(_conv3x3_kernel, n_phase=len(phases),
                               stride=stride, ho=ho, wo=wo, cin=cin, tco=tco)
    flops = 2 * n * ho * wo * 9 * cin * cout
    bytes_accessed = (sum(p.size for p in phases) * 2 + w.size * 2
                      + n * ho * wo * cout * 2 + n * 2 * cout * 4)
    return pl.pallas_call(
        kernel,
        out_shape=(jax.ShapeDtypeStruct((n, ho, wo, cout), jnp.bfloat16),
                   jax.ShapeDtypeStruct((n, 2, cout), jnp.float32)),
        grid=(n, cout // tco),
        in_specs=in_specs,
        out_specs=(pl.BlockSpec((None, ho, wo, tco), lambda i, j: (i, 0, 0, j)),
                   pl.BlockSpec((None, 2, tco), lambda i, j: (i, 0, j))),
        compiler_params=_compiler_params(("parallel", "parallel")),
        cost_estimate=pl.CostEstimate(flops=flops, transcendentals=0,
                                      bytes_accessed=bytes_accessed),
    )(*phases, w)


def bn_relu_conv3x3_stats(y_prev, scale, shift, w):
    """Fused BN(prev)+ReLU+3x3(stride 1, pad 1) conv + batch-stat partials."""
    n, ho, wo, cin = y_prev.shape
    cout = w.shape[-1]
    tco = _pick_tco(cout)

    kernel = functools.partial(_bn_relu_conv3x3_kernel,
                               ho=ho, wo=wo, cin=cin, tco=tco)
    flops = 2 * n * ho * wo * 9 * cin * cout
    bytes_accessed = (y_prev.size * 2 + w.size * 2
                      + n * ho * wo * cout * 2 + n * 2 * cout * 4)
    return pl.pallas_call(
        kernel,
        out_shape=(jax.ShapeDtypeStruct((n, ho, wo, cout), jnp.bfloat16),
                   jax.ShapeDtypeStruct((n, 2, cout), jnp.float32)),
        grid=(n, cout // tco),
        in_specs=[
            pl.BlockSpec((None, ho, wo, cin), lambda i, j: (i, 0, 0, 0)),
            pl.BlockSpec((1, cin), lambda i, j: (0, 0)),
            pl.BlockSpec((1, cin), lambda i, j: (0, 0)),
            pl.BlockSpec((9, cin, tco), lambda i, j: (0, 0, j)),
        ],
        out_specs=(pl.BlockSpec((None, ho, wo, tco), lambda i, j: (i, 0, 0, j)),
                   pl.BlockSpec((None, 2, tco), lambda i, j: (i, 0, j))),
        scratch_shapes=[pltpu.VMEM((ho + 2, wo + 4, cin), jnp.bfloat16)],
        compiler_params=_compiler_params(("parallel", "parallel")),
        cost_estimate=pl.CostEstimate(flops=flops, transcendentals=0,
                                      bytes_accessed=bytes_accessed),
    )(y_prev, scale, shift, w)


def bn_apply(y, scale, shift):
    """Lane-dense elementwise y*scale + shift (final BN, no ReLU)."""
    n, ho, wo, c = y.shape
    tco = _pick_tco(c)
    return pl.pallas_call(
        functools.partial(_bn_apply_kernel, tco=tco),
        out_shape=jax.ShapeDtypeStruct((n, ho, wo, c), jnp.float32),
        grid=(n, c // tco),
        in_specs=[
            pl.BlockSpec((None, ho, wo, tco), lambda i, j: (i, 0, 0, j)),
            pl.BlockSpec((1, tco), lambda i, j: (0, j)),
            pl.BlockSpec((1, tco), lambda i, j: (0, j)),
        ],
        out_specs=pl.BlockSpec((None, ho, wo, tco), lambda i, j: (i, 0, 0, j)),
        compiler_params=_compiler_params(("parallel", "parallel")),
    )(y, scale, shift)


# ------------------------------- JAX glue ----------------------------------- #

def _bn_fold(stats, gamma, beta, count, eps=BN_EPS):
    """Combine per-(image, channel-block) partials into folded scale/shift."""
    tot = jnp.sum(stats.astype(jnp.float32), axis=0)          # (2, C)
    mean = tot[0] / count
    var = jnp.maximum(tot[1] / count - mean * mean, 0.0)       # biased (train mode)
    scale = gamma * jax.lax.rsqrt(var + eps)
    shift = beta - mean * scale
    return scale.reshape(1, -1), shift.reshape(1, -1)


def basic_transform(x_nchw, params, stride):
    """3x3(stride) + BN + ReLU, 3x3 + BN (final_bn). Training-mode BN stats."""
    n, cin, _, _ = x_nchw.shape
    cin_pad = params["a_w"].shape[1]
    w_out = params["w_out"]

    # NCHW -> NHWC, channel-pad to lane width, bf16 for the MXU.
    x = jnp.transpose(x_nchw, (0, 2, 3, 1)).astype(jnp.float32)
    x = jnp.pad(x, ((0, 0), (0, 0), (0, 0), (0, cin_pad - cin)))
    x = x.astype(jnp.bfloat16)

    # a: 3x3 stride conv -> pre-BN activations (bf16) + stat partials (pass 1)
    y_a, st_a = conv3x3_stats(x, params["a_w"], stride)
    _, ho, wo, _ = y_a.shape
    scale_a, shift_a = _bn_fold(st_a, params["a_g"], params["a_b"], n * ho * wo)

    # a_bn + a_relu fused into b's conv prologue; b: 3x3 s=1 conv + partials
    y_b, st_b = bn_relu_conv3x3_stats(y_a, scale_a, shift_a, params["b_w"])
    scale_b, shift_b = _bn_fold(st_b, params["b_g"], params["b_b"], n * ho * wo)

    # b_bn (final_bn, no ReLU)
    out = bn_apply(y_b, scale_b, shift_b)

    # TODO(synk): running_mean/running_var (cfg.BN.MOM) buffer updates are not
    # implemented; this reproduces the training-mode forward pass only.
    out = out[..., :w_out]
    return jnp.transpose(out, (0, 3, 1, 2))                   # NHWC -> NCHW


# ---------------------------- parameter init -------------------------------- #

def init_params(key, w_in, w_out):
    cin_pad = _round_up(w_in, LANE)
    cout_pad = _round_up(w_out, LANE)
    ka, kb = jax.random.split(key)

    def conv_w(k, cin, cout, cin_p, cout_p):
        fan_in = cin * 9
        wgt = jax.random.normal(k, (3, 3, cin, cout), jnp.float32)
        wgt = wgt * (2.0 / fan_in) ** 0.5                      # MSRA init (pycls)
        wgt = jnp.pad(wgt, ((0, 0), (0, 0), (0, cin_p - cin), (0, cout_p - cout)))
        return wgt.reshape(9, cin_p, cout_p).astype(jnp.bfloat16)

    return {
        "w_out": w_out,
        "a_w": conv_w(ka, w_in, w_out, cin_pad, cout_pad),
        "a_g": jnp.ones((cout_pad,), jnp.float32),
        "a_b": jnp.zeros((cout_pad,), jnp.float32),
        "b_w": conv_w(kb, w_out, w_out, cout_pad, cout_pad),
        "b_g": jnp.ones((cout_pad,), jnp.float32),
        "b_b": jnp.zeros((cout_pad,), jnp.float32),
    }


# ----------------------------------- main ----------------------------------- #

if __name__ == "__main__":
    W_IN, W_OUT, STRIDE = 4, 16, 2

    key = jax.random.PRNGKey(0)
    kx, kp = jax.random.split(key)
    x = jax.random.normal(kx, (2, W_IN, 16, 16), jnp.float32)   # NCHW, like PyTorch
    params = init_params(kp, W_IN, W_OUT)

    fwd = jax.jit(lambda xx: basic_transform(xx, params, STRIDE))
    out = jax.block_until_ready(fwd(x))

    assert out.shape == (2, W_OUT, 8, 8), out.shape
    assert bool(jnp.all(jnp.isfinite(out)))
    print("KERNEL_OK")
</pallas_src>

<mosaic_0001>
module attributes {stable_mosaic.version = 11 : i64} {
  func.func @_conv3x3_kernel(%arg0: i32, %arg1: i32, %arg2: memref<1x9x9x128xbf16, #tpu.memory_space<vmem>>, %arg3: memref<1x9x9x128xbf16, #tpu.memory_space<vmem>>, %arg4: memref<1x9x9x128xbf16, #tpu.memory_space<vmem>>, %arg5: memref<1x9x9x128xbf16, #tpu.memory_space<vmem>>, %arg6: memref<9x128x128xbf16, #tpu.memory_space<vmem>>, %arg7: memref<1x8x8x128xbf16, #tpu.memory_space<vmem>>, %arg8: memref<1x2x128xf32, #tpu.memory_space<vmem>>) attributes {dimension_semantics = [#tpu.dimension_semantics<parallel>, #tpu.dimension_semantics<parallel>], iteration_bounds = array<i64: 2, 1>, scalar_prefetch = 0 : i64, scratch_operands = 0 : i64, tpu.core_type = #tpu.core_type<tc>, window_params = [{transform_indices = @transform_0, window_bounds = array<i64: 1, 9, 9, 128>}, {transform_indices = @transform_1, window_bounds = array<i64: 1, 9, 9, 128>}, {transform_indices = @transform_2, window_bounds = array<i64: 1, 9, 9, 128>}, {transform_indices = @transform_3, window_bounds = array<i64: 1, 9, 9, 128>}, {transform_indices = @transform_4, window_bounds = array<i64: 9, 128, 128>}, {transform_indices = @transform_5, window_bounds = array<i64: 1, 8, 8, 128>}, {transform_indices = @transform_6, window_bounds = array<i64: 1, 2, 128>}]} {
    %cst = arith.constant 0.000000e+00 : f32
    %0 = vector.broadcast %cst : f32 to vector<64x128xf32>
    %c0 = arith.constant 0 : index
    %c0_0 = arith.constant 0 : index
    %c0_1 = arith.constant 0 : index
    %c0_2 = arith.constant 0 : index
    %1 = vector.load %arg2[%c0, %c0_0, %c0_1, %c0_2] : memref<1x9x9x128xbf16, #tpu.memory_space<vmem>>, vector<1x8x8x128xbf16>
    %2 = vector.shape_cast %1 : vector<1x8x8x128xbf16> to vector<8x8x128xbf16>
    %3 = vector.shape_cast %2 : vector<8x8x128xbf16> to vector<64x128xbf16>
    %c0_3 = arith.constant 0 : index
    %c0_4 = arith.constant 0 : index
    %c0_5 = arith.constant 0 : index
    %4 = vector.load %arg6[%c0_3, %c0_4, %c0_5] : memref<9x128x128xbf16, #tpu.memory_space<vmem>>, vector<1x128x128xbf16>
    %5 = vector.shape_cast %4 : vector<1x128x128xbf16> to vector<128x128xbf16>
    %cst_6 = arith.constant dense<0.000000e+00> : vector<64x128xf32>
    %6 = tpu.matmul %3, %5, %cst_6 {dimension_numbers = #tpu.dot_dimension_numbers<[1], [0], [0], [1], [0, 0, 1, 1], [], []>} : vector<64x128xbf16>, vector<128x128xbf16>, vector<64x128xf32> -> vector<64x128xf32>
    %7 = arith.addf %0, %6 : vector<64x128xf32>
    %c0_7 = arith.constant 0 : index
    %c0_8 = arith.constant 0 : index
    %c0_9 = arith.constant 0 : index
    %c0_10 = arith.constant 0 : index
    %8 = vector.load %arg3[%c0_7, %c0_8, %c0_9, %c0_10] : memref<1x9x9x128xbf16, #tpu.memory_space<vmem>>, vector<1x8x8x128xbf16>
    %9 = vector.shape_cast %8 : vector<1x8x8x128xbf16> to vector<8x8x128xbf16>
    %10 = vector.shape_cast %9 : vector<8x8x128xbf16> to vector<64x128xbf16>
    %c1 = arith.constant 1 : index
    %c0_11 = arith.constant 0 : index
    %c0_12 = arith.constant 0 : index
    %11 = vector.load %arg6[%c1, %c0_11, %c0_12] : memref<9x128x128xbf16, #tpu.memory_space<vmem>>, vector<1x128x128xbf16>
    %12 = vector.shape_cast %11 : vector<1x128x128xbf16> to vector<128x128xbf16>
    %cst_13 = arith.constant dense<0.000000e+00> : vector<64x128xf32>
    %13 = tpu.matmul %10, %12, %cst_13 {dimension_numbers = #tpu.dot_dimension_numbers<[1], [0], [0], [1], [0, 0, 1, 1], [], []>} : vector<64x128xbf16>, vector<128x128xbf16>, vector<64x128xf32> -> vector<64x128xf32>
    %14 = arith.addf %7, %13 : vector<64x128xf32>
    %c0_14 = arith.constant 0 : index
    %c0_15 = arith.constant 0 : index
    %c1_16 = arith.constant 1 : index
    %c0_17 = arith.constant 0 : index
    %15 = vector.load %arg2[%c0_14, %c0_15, %c1_16, %c0_17] : memref<1x9x9x128xbf16, #tpu.memory_space<vmem>>, vector<1x8x8x128xbf16>
    %16 = vector.shape_cast %15 : vector<1x8x8x128xbf16> to vector<8x8x128xbf16>
    %17 = vector.shape_cast %16 : vector<8x8x128xbf16> to vector<64x128xbf16>
    %c2 = arith.constant 2 : index
    %c0_18 = arith.constant 0 : index
    %c0_19 = arith.constant 0 : index
    %18 = vector.load %arg6[%c2, %c0_18, %c0_19] : memref<9x128x128xbf16, #tpu.memory_space<vmem>>, vector<1x128x128xbf16>
    %19 = vector.shape_cast %18 : vector<1x128x128xbf16> to vector<128x128xbf16>
    %cst_20 = arith.constant dense<0.000000e+00> : vector<64x128xf32>
    %20 = tpu.matmul %17, %19, %cst_20 {dimension_numbers = #tpu.dot_dimension_numbers<[1], [0], [0], [1], [0, 0, 1, 1], [], []>} : vector<64x128xbf16>, vector<128x128xbf16>, vector<64x128xf32> -> vector<64x128xf32>
    %21 = arith.addf %14, %20 : vector<64x128xf32>
    %c0_21 = arith.constant 0 : index
    %c0_22 = arith.constant 0 : index
    %c0_23 = arith.constant 0 : index
    %c0_24 = arith.constant 0 : index
    %22 = vector.load %arg4[%c0_21, %c0_22, %c0_23, %c0_24] : memref<1x9x9x128xbf16, #tpu.memory_space<vmem>>, vector<1x8x8x128xbf16>
    %23 = vector.shape_cast %22 : vector<1x8x8x128xbf16> to vector<8x8x128xbf16>
    %24 = vector.shape_cast %23 : vector<8x8x128xbf16> to vector<64x128xbf16>
    %c3 = arith.constant 3 : index
    %c0_25 = arith.constant 0 : index
    %c0_26 = arith.constant 0 : index
    %25 = vector.load %arg6[%c3, %c0_25, %c0_26] : memref<9x128x128xbf16, #tpu.memory_space<vmem>>, vector<1x128x128xbf16>
    %26 = vector.shape_cast %25 : vector<1x128x128xbf16> to vector<128x128xbf16>
    %cst_27 = arith.constant dense<0.000000e+00> : vector<64x128xf32>
    %27 = tpu.matmul %24, %26, %cst_27 {dimension_numbers = #tpu.dot_dimension_numbers<[1], [0], [0], [1], [0, 0, 1, 1], [], []>} : vector<64x128xbf16>, vector<128x128xbf16>, vector<64x128xf32> -> vector<64x128xf32>
    %28 = arith.addf %21, %27 : vector<64x128xf32>
    %c0_28 = arith.constant 0 : index
    %c0_29 = arith.constant 0 : index
    %c0_30 = arith.constant 0 : index
    %c0_31 = arith.constant 0 : index
    %29 = vector.load %arg5[%c0_28, %c0_29, %c0_30, %c0_31] : memref<1x9x9x128xbf16, #tpu.memory_space<vmem>>, vector<1x8x8x128xbf16>
    %30 = vector.shape_cast %29 : vector<1x8x8x128xbf16> to vector<8x8x128xbf16>
    %31 = vector.shape_cast %30 : vector<8x8x128xbf16> to vector<64x128xbf16>
    %c4 = arith.constant 4 : index
    %c0_32 = arith.constant 0 : index
    %c0_33 = arith.constant 0 : index
    %32 = vector.load %arg6[%c4, %c0_32, %c0_33] : memref<9x128x128xbf16, #tpu.memory_space<vmem>>, vector<1x128x128xbf16>
    %33 = vector.shape_cast %32 : vector<1x128x128xbf16> to vector<128x128xbf16>
    %cst_34 = arith.constant dense<0.000000e+00> : vector<64x128xf32>
    %34 = tpu.matmul %31, %33, %cst_34 {dimension_numbers = #tpu.dot_dimension_numbers<[1], [0], [0], [1], [0, 0, 1, 1], [], []>} : vector<64x128xbf16>, vector<128x128xbf16>, vector<64x128xf32> -> vector<64x128xf32>
    %35 = arith.addf %28, %34 : vector<64x128xf32>
    %c0_35 = arith.constant 0 : index
    %c0_36 = arith.constant 0 : index
    %c1_37 = arith.constant 1 : index
    %c0_38 = arith.constant 0 : index
    %36 = vector.load %arg4[%c0_35, %c0_36, %c1_37, %c0_38] : memref<1x9x9x128xbf16, #tpu.memory_space<vmem>>, vector<1x8x8x128xbf16>
    %37 = vector.shape_cast %36 : vector<1x8x8x128xbf16> to vector<8x8x128xbf16>
    %38 = vector.shape_cast %37 : vector<8x8x128xbf16> to vector<64x128xbf16>
    %c5 = arith.constant 5 : index
    %c0_39 = arith.constant 0 : index
    %c0_40 = arith.constant 0 : index
    %39 = vector.load %arg6[%c5, %c0_39, %c0_40] : memref<9x128x128xbf16, #tpu.memory_space<vmem>>, vector<1x128x128xbf16>
    %40 = vector.shape_cast %39 : vector<1x128x128xbf16> to vector<128x128xbf16>
    %cst_41 = arith.constant dense<0.000000e+00> : vector<64x128xf32>
    %41 = tpu.matmul %38, %40, %cst_41 {dimension_numbers = #tpu.dot_dimension_numbers<[1], [0], [0], [1], [0, 0, 1, 1], [], []>} : vector<64x128xbf16>, vector<128x128xbf16>, vector<64x128xf32> -> vector<64x128xf32>
    %42 = arith.addf %35, %41 : vector<64x128xf32>
    %c0_42 = arith.constant 0 : index
    %c1_43 = arith.constant 1 : index
    %c0_44 = arith.constant 0 : index
    %c0_45 = arith.constant 0 : index
    %43 = vector.load %arg2[%c0_42, %c1_43, %c0_44, %c0_45] : memref<1x9x9x128xbf16, #tpu.memory_space<vmem>>, vector<1x8x8x128xbf16>
    %44 = vector.shape_cast %43 : vector<1x8x8x128xbf16> to vector<8x8x128xbf16>
    %45 = vector.shape_cast %44 : vector<8x8x128xbf16> to vector<64x128xbf16>
    %c6 = arith.constant 6 : index
    %c0_46 = arith.constant 0 : index
    %c0_47 = arith.constant 0 : index
    %46 = vector.load %arg6[%c6, %c0_46, %c0_47] : memref<9x128x128xbf16, #tpu.memory_space<vmem>>, vector<1x128x128xbf16>
    %47 = vector.shape_cast %46 : vector<1x128x128xbf16> to vector<128x128xbf16>
    %cst_48 = arith.constant dense<0.000000e+00> : vector<64x128xf32>
    %48 = tpu.matmul %45, %47, %cst_48 {dimension_numbers = #tpu.dot_dimension_numbers<[1], [0], [0], [1], [0, 0, 1, 1], [], []>} : vector<64x128xbf16>, vector<128x128xbf16>, vector<64x128xf32> -> vector<64x128xf32>
    %49 = arith.addf %42, %48 : vector<64x128xf32>
    %c0_49 = arith.constant 0 : index
    %c1_50 = arith.constant 1 : index
    %c0_51 = arith.constant 0 : index
    %c0_52 = arith.constant 0 : index
    %50 = vector.load %arg3[%c0_49, %c1_50, %c0_51, %c0_52] : memref<1x9x9x128xbf16, #tpu.memory_space<vmem>>, vector<1x8x8x128xbf16>
    %51 = vector.shape_cast %50 : vector<1x8x8x128xbf16> to vector<8x8x128xbf16>
    %52 = vector.shape_cast %51 : vector<8x8x128xbf16> to vector<64x128xbf16>
    %c7 = arith.constant 7 : index
    %c0_53 = arith.constant 0 : index
    %c0_54 = arith.constant 0 : index
    %53 = vector.load %arg6[%c7, %c0_53, %c0_54] : memref<9x128x128xbf16, #tpu.memory_space<vmem>>, vector<1x128x128xbf16>
    %54 = vector.shape_cast %53 : vector<1x128x128xbf16> to vector<128x128xbf16>
    %cst_55 = arith.constant dense<0.000000e+00> : vector<64x128xf32>
    %55 = tpu.matmul %52, %54, %cst_55 {dimension_numbers = #tpu.dot_dimension_numbers<[1], [0], [0], [1], [0, 0, 1, 1], [], []>} : vector<64x128xbf16>, vector<128x128xbf16>, vector<64x128xf32> -> vector<64x128xf32>
    %56 = arith.addf %49, %55 : vector<64x128xf32>
    %c0_56 = arith.constant 0 : index
    %c1_57 = arith.constant 1 : index
    %c1_58 = arith.constant 1 : index
    %c0_59 = arith.constant 0 : index
    %57 = vector.load %arg2[%c0_56, %c1_57, %c1_58, %c0_59] : memref<1x9x9x128xbf16, #tpu.memory_space<vmem>>, vector<1x8x8x128xbf16>
    %58 = vector.shape_cast %57 : vector<1x8x8x128xbf16> to vector<8x8x128xbf16>
    %59 = vector.shape_cast %58 : vector<8x8x128xbf16> to vector<64x128xbf16>
    %c8 = arith.constant 8 : index
    %c0_60 = arith.constant 0 : index
    %c0_61 = arith.constant 0 : index
    %60 = vector.load %arg6[%c8, %c0_60, %c0_61] : memref<9x128x128xbf16, #tpu.memory_space<vmem>>, vector<1x128x128xbf16>
    %61 = vector.shape_cast %60 : vector<1x128x128xbf16> to vector<128x128xbf16>
    %cst_62 = arith.constant dense<0.000000e+00> : vector<64x128xf32>
    %62 = tpu.matmul %59, %61, %cst_62 {dimension_numbers = #tpu.dot_dimension_numbers<[1], [0], [0], [1], [0, 0, 1, 1], [], []>} : vector<64x128xbf16>, vector<128x128xbf16>, vector<64x128xf32> -> vector<64x128xf32>
    %63 = arith.addf %56, %62 : vector<64x128xf32>
    %64 = vector.shape_cast %63 : vector<64x128xf32> to vector<8x8x128xf32>
    %65 = arith.truncf %64 : vector<8x8x128xf32> to vector<8x8x128xbf16>
    %c0_63 = arith.constant 0 : index
    %c0_64 = arith.constant 0 : index
    %c0_65 = arith.constant 0 : index
    %c0_66 = arith.constant 0 : index
    %66 = vector.load %arg7[%c0_63, %c0_64, %c0_65, %c0_66] : memref<1x8x8x128xbf16, #tpu.memory_space<vmem>>, vector<1x8x8x128xbf16>
    %67 = vector.shape_cast %66 : vector<1x8x8x128xbf16> to vector<8x8x128xbf16>
    %68 = vector.shape_cast %65 : vector<8x8x128xbf16> to vector<1x8x8x128xbf16>
    tpu.vector_store %arg7[%c0_63, %c0_64, %c0_65, %c0_66], %68 {strides = array<i32>} : memref<1x8x8x128xbf16, #tpu.memory_space<vmem>>, vector<1x8x8x128xbf16>,
    %cst_67 = arith.constant dense<0.000000e+00> : vector<128xf32>
    %69 = vector.multi_reduction <add>, %63, %cst_67 [0] : vector<64x128xf32> to vector<128xf32>
    %70 = vector.shape_cast %69 : vector<128xf32> to vector<1x128xf32>
    %c0_68 = arith.constant 0 : index
    %c0_69 = arith.constant 0 : index
    %c0_70 = arith.constant 0 : index
    %71 = vector.load %arg8[%c0_68, %c0_69, %c0_70] : memref<1x2x128xf32, #tpu.memory_space<vmem>>, vector<1x1x128xf32>
    %72 = vector.shape_cast %71 : vector<1x1x128xf32> to vector<1x128xf32>
    %73 = vector.shape_cast %70 : vector<1x128xf32> to vector<1x1x128xf32>
    tpu.vector_store %arg8[%c0_68, %c0_69, %c0_70], %73 {strides = array<i32>} : memref<1x2x128xf32, #tpu.memory_space<vmem>>, vector<1x1x128xf32>,
    %74 = arith.mulf %63, %63 : vector<64x128xf32>
    %cst_71 = arith.constant dense<0.000000e+00> : vector<128xf32>
    %75 = vector.multi_reduction <add>, %74, %cst_71 [0] : vector<64x128xf32> to vector<128xf32>
    %76 = vector.shape_cast %75 : vector<128xf32> to vector<1x128xf32>
    %c0_72 = arith.constant 0 : index
    %c1_73 = arith.constant 1 : index
    %c0_74 = arith.constant 0 : index
    %77 = vector.load %arg8[%c0_72, %c1_73, %c0_74] : memref<1x2x128xf32, #tpu.memory_space<vmem>>, vector<1x1x128xf32>
    %78 = vector.shape_cast %77 : vector<1x1x128xf32> to vector<1x128xf32>
    %79 = vector.shape_cast %76 : vector<1x128xf32> to vector<1x1x128xf32>
    tpu.vector_store %arg8[%c0_72, %c1_73, %c0_74], %79 {strides = array<i32>} : memref<1x2x128xf32, #tpu.memory_space<vmem>>, vector<1x1x128xf32>,
    return
  }
  func.func @transform_0(%arg0: i32, %arg1: i32) -> (i32, i32, i32, i32) {
    %c0_i32 = arith.constant 0 : i32
    %c0_i32_0 = arith.constant 0 : i32
    %c0_i32_1 = arith.constant 0 : i32
    %c0_i32_2 = arith.constant 0 : i32
    return %arg0, %c0_i32, %c0_i32_0, %c0_i32_1 : i32, i32, i32, i32
  }
  func.func @transform_1(%arg0: i32, %arg1: i32) -> (i32, i32, i32, i32) {
    %c0_i32 = arith.constant 0 : i32
    %c0_i32_0 = arith.constant 0 : i32
    %c0_i32_1 = arith.constant 0 : i32
    %c0_i32_2 = arith.constant 0 : i32
    return %arg0, %c0_i32, %c0_i32_0, %c0_i32_1 : i32, i32, i32, i32
  }
  func.func @transform_2(%arg0: i32, %arg1: i32) -> (i32, i32, i32, i32) {
    %c0_i32 = arith.constant 0 : i32
    %c0_i32_0 = arith.constant 0 : i32
    %c0_i32_1 = arith.constant 0 : i32
    %c0_i32_2 = arith.constant 0 : i32
    return %arg0, %c0_i32, %c0_i32_0, %c0_i32_1 : i32, i32, i32, i32
  }
  func.func @transform_3(%arg0: i32, %arg1: i32) -> (i32, i32, i32, i32) {
    %c0_i32 = arith.constant 0 : i32
    %c0_i32_0 = arith.constant 0 : i32
    %c0_i32_1 = arith.constant 0 : i32
    %c0_i32_2 = arith.constant 0 : i32
    return %arg0, %c0_i32, %c0_i32_0, %c0_i32_1 : i32, i32, i32, i32
  }
  func.func @transform_4(%arg0: i32, %arg1: i32) -> (i32, i32, i32) {
    %c0_i32 = arith.constant 0 : i32
    %c0_i32_0 = arith.constant 0 : i32
    %c0_i32_1 = arith.constant 0 : i32
    return %c0_i32, %c0_i32_0, %arg1 : i32, i32, i32
  }
  func.func @transform_5(%arg0: i32, %arg1: i32) -> (i32, i32, i32, i32) {
    %c0_i32 = arith.constant 0 : i32
    %c0_i32_0 = arith.constant 0 : i32
    %c0_i32_1 = arith.constant 0 : i32
    return %arg0, %c0_i32, %c0_i32_0, %arg1 : i32, i32, i32, i32
  }
  func.func @transform_6(%arg0: i32, %arg1: i32) -> (i32, i32, i32) {
    %c0_i32 = arith.constant 0 : i32
    %c0_i32_0 = arith.constant 0 : i32
    return %arg0, %c0_i32, %arg1 : i32, i32, i32
  }
}

module attributes {stable_mosaic.version = 11 : i64} {
  func.func @_bn_relu_conv3x3_kernel(%arg0: i32, %arg1: i32, %arg2: memref<1x8x8x128xbf16, #tpu.memory_space<vmem>>, %arg3: memref<1x128xf32, #tpu.memory_space<vmem>>, %arg4: memref<1x128xf32, #tpu.memory_space<vmem>>, %arg5: memref<9x128x128xbf16, #tpu.memory_space<vmem>>, %arg6: memref<1x8x8x128xbf16, #tpu.memory_space<vmem>>, %arg7: memref<1x2x128xf32, #tpu.memory_space<vmem>>, %arg8: memref<10x12x128xbf16, #tpu.memory_space<vmem>>) attributes {dimension_semantics = [#tpu.dimension_semantics<parallel>, #tpu.dimension_semantics<parallel>], iteration_bounds = array<i64: 2, 1>, scalar_prefetch = 0 : i64, scratch_operands = 1 : i64, tpu.core_type = #tpu.core_type<tc>, window_params = [{transform_indices = @transform_0, window_bounds = array<i64: 1, 8, 8, 128>}, {pipeline_mode = #tpu.pipeline_mode<synchronous>, transform_indices = @transform_1, window_bounds = array<i64: 1, 128>}, {pipeline_mode = #tpu.pipeline_mode<synchronous>, transform_indices = @transform_2, window_bounds = array<i64: 1, 128>}, {transform_indices = @transform_3, window_bounds = array<i64: 9, 128, 128>}, {transform_indices = @transform_4, window_bounds = array<i64: 1, 8, 8, 128>}, {transform_indices = @transform_5, window_bounds = array<i64: 1, 2, 128>}]} {
    %c0 = arith.constant 0 : index
    %c0_0 = arith.constant 0 : index
    %0 = vector.load %arg3[%c0, %c0_0] : memref<1x128xf32, #tpu.memory_space<vmem>>, vector<1x128xf32>
    %1 = vector.shape_cast %0 : vector<1x128xf32> to vector<1x1x128xf32>
    %c0_1 = arith.constant 0 : index
    %c0_2 = arith.constant 0 : index
    %2 = vector.load %arg4[%c0_1, %c0_2] : memref<1x128xf32, #tpu.memory_space<vmem>>, vector<1x128xf32>
    %3 = vector.shape_cast %2 : vector<1x128xf32> to vector<1x1x128xf32>
    %c0_3 = arith.constant 0 : index
    %c0_4 = arith.constant 0 : index
    %c0_5 = arith.constant 0 : index
    %c0_6 = arith.constant 0 : index
    %4 = vector.load %arg2[%c0_3, %c0_4, %c0_5, %c0_6] : memref<1x8x8x128xbf16, #tpu.memory_space<vmem>>, vector<1x8x8x128xbf16>
    %5 = vector.shape_cast %4 : vector<1x8x8x128xbf16> to vector<8x8x128xbf16>
    %6 = arith.extf %5 : vector<8x8x128xbf16> to vector<8x8x128xf32>
    %7 = vector.broadcast %1 : vector<1x1x128xf32> to vector<8x8x128xf32>
    %8 = arith.mulf %6, %7 : vector<8x8x128xf32>
    %9 = vector.broadcast %3 : vector<1x1x128xf32> to vector<8x8x128xf32>
    %10 = arith.addf %8, %9 : vector<8x8x128xf32>
    %cst = arith.constant 0.000000e+00 : f32
    %11 = vector.broadcast %cst : f32 to vector<8x8x128xf32>
    %12 = arith.maximumf %10, %11 : vector<8x8x128xf32>
    %13 = arith.truncf %12 : vector<8x8x128xf32> to vector<8x8x128xbf16>
    %cst_7 = arith.constant 0.000000e+00 : bf16
    %14 = vector.broadcast %cst_7 : bf16 to vector<1x12x128xbf16>
    %cst_8 = arith.constant 0.000000e+00 : bf16
    %15 = vector.broadcast %cst_8 : bf16 to vector<10x2x128xbf16>
    %c0_9 = arith.constant 0 : index
    %c0_10 = arith.constant 0 : index
    %c0_11 = arith.constant 0 : index
    %16 = vector.load %arg8[%c0_9, %c0_10, %c0_11] : memref<10x12x128xbf16, #tpu.memory_space<vmem>>, vector<1x12x128xbf16>
    tpu.vector_store %arg8[%c0_9, %c0_10, %c0_11], %14 {strides = array<i32>} : memref<10x12x128xbf16, #tpu.memory_space<vmem>>, vector<1x12x128xbf16>,
    %c9 = arith.constant 9 : index
    %c0_12 = arith.constant 0 : index
    %c0_13 = arith.constant 0 : index
    %17 = vector.load %arg8[%c9, %c0_12, %c0_13] : memref<10x12x128xbf16, #tpu.memory_space<vmem>>, vector<1x12x128xbf16>
    tpu.vector_store %arg8[%c9, %c0_12, %c0_13], %14 {strides = array<i32>} : memref<10x12x128xbf16, #tpu.memory_space<vmem>>, vector<1x12x128xbf16>,
    %c0_14 = arith.constant 0 : index
    %c0_15 = arith.constant 0 : index
    %c0_16 = arith.constant 0 : index
    %18 = vector.load %arg8[%c0_14, %c0_15, %c0_16] : memref<10x12x128xbf16, #tpu.memory_space<vmem>>, vector<10x2x128xbf16>
    tpu.vector_store %arg8[%c0_14, %c0_15, %c0_16], %15 {strides = array<i32>} : memref<10x12x128xbf16, #tpu.memory_space<vmem>>, vector<10x2x128xbf16>,
    %c0_17 = arith.constant 0 : index
    %c10 = arith.constant 10 : index
    %c0_18 = arith.constant 0 : index
    %19 = vector.load %arg8[%c0_17, %c10, %c0_18] : memref<10x12x128xbf16, #tpu.memory_space<vmem>>, vector<10x2x128xbf16>
    tpu.vector_store %arg8[%c0_17, %c10, %c0_18], %15 {strides = array<i32>} : memref<10x12x128xbf16, #tpu.memory_space<vmem>>, vector<10x2x128xbf16>,
    %c1 = arith.constant 1 : index
    %c2 = arith.constant 2 : index
    %c0_19 = arith.constant 0 : index
    %20 = vector.load %arg8[%c1, %c2, %c0_19] : memref<10x12x128xbf16, #tpu.memory_space<vmem>>, vector<8x8x128xbf16>
    tpu.vector_store %arg8[%c1, %c2, %c0_19], %13 {strides = array<i32>} : memref<10x12x128xbf16, #tpu.memory_space<vmem>>, vector<8x8x128xbf16>,
    %cst_20 = arith.constant 0.000000e+00 : f32
    %21 = vector.broadcast %cst_20 : f32 to vector<64x128xf32>
    %c0_21 = arith.constant 0 : index
    %c1_22 = arith.constant 1 : index
    %c0_23 = arith.constant 0 : index
    %22 = vector.load %arg8[%c0_21, %c1_22, %c0_23] : memref<10x12x128xbf16, #tpu.memory_space<vmem>>, vector<8x8x128xbf16>
    %23 = vector.shape_cast %22 : vector<8x8x128xbf16> to vector<64x128xbf16>
    %c0_24 = arith.constant 0 : index
    %c0_25 = arith.constant 0 : index
    %c0_26 = arith.constant 0 : index
    %24 = vector.load %arg5[%c0_24, %c0_25, %c0_26] : memref<9x128x128xbf16, #tpu.memory_space<vmem>>, vector<1x128x128xbf16>
    %25 = vector.shape_cast %24 : vector<1x128x128xbf16> to vector<128x128xbf16>
    %cst_27 = arith.constant dense<0.000000e+00> : vector<64x128xf32>
    %26 = tpu.matmul %23, %25, %cst_27 {dimension_numbers = #tpu.dot_dimension_numbers<[1], [0], [0], [1], [0, 0, 1, 1], [], []>} : vector<64x128xbf16>, vector<128x128xbf16>, vector<64x128xf32> -> vector<64x128xf32>
    %27 = arith.addf %21, %26 : vector<64x128xf32>
    %c0_28 = arith.constant 0 : index
    %c2_29 = arith.constant 2 : index
    %c0_30 = arith.constant 0 : index
    %28 = vector.load %arg8[%c0_28, %c2_29, %c0_30] : memref<10x12x128xbf16, #tpu.memory_space<vmem>>, vector<8x8x128xbf16>
    %29 = vector.shape_cast %28 : vector<8x8x128xbf16> to vector<64x128xbf16>
    %c1_31 = arith.constant 1 : index
    %c0_32 = arith.constant 0 : index
    %c0_33 = arith.constant 0 : index
    %30 = vector.load %arg5[%c1_31, %c0_32, %c0_33] : memref<9x128x128xbf16, #tpu.memory_space<vmem>>, vector<1x128x128xbf16>
    %31 = vector.shape_cast %30 : vector<1x128x128xbf16> to vector<128x128xbf16>
    %cst_34 = arith.constant dense<0.000000e+00> : vector<64x128xf32>
    %32 = tpu.matmul %29, %31, %cst_34 {dimension_numbers = #tpu.dot_dimension_numbers<[1], [0], [0], [1], [0, 0, 1, 1], [], []>} : vector<64x128xbf16>, vector<128x128xbf16>, vector<64x128xf32> -> vector<64x128xf32>
    %33 = arith.addf %27, %32 : vector<64x128xf32>
    %c0_35 = arith.constant 0 : index
    %c3 = arith.constant 3 : index
    %c0_36 = arith.constant 0 : index
    %34 = vector.load %arg8[%c0_35, %c3, %c0_36] : memref<10x12x128xbf16, #tpu.memory_space<vmem>>, vector<8x8x128xbf16>
    %35 = vector.shape_cast %34 : vector<8x8x128xbf16> to vector<64x128xbf16>
    %c2_37 = arith.constant 2 : index
    %c0_38 = arith.constant 0 : index
    %c0_39 = arith.constant 0 : index
    %36 = vector.load %arg5[%c2_37, %c0_38, %c0_39] : memref<9x128x128xbf16, #tpu.memory_space<vmem>>, vector<1x128x128xbf16>
    %37 = vector.shape_cast %36 : vector<1x128x128xbf16> to vector<128x128xbf16>
    %cst_40 = arith.constant dense<0.000000e+00> : vector<64x128xf32>
    %38 = tpu.matmul %35, %37, %cst_40 {dimension_numbers = #tpu.dot_dimension_numbers<[1], [0], [0], [1], [0, 0, 1, 1], [], []>} : vector<64x128xbf16>, vector<128x128xbf16>, vector<64x128xf32> -> vector<64x128xf32>
    %39 = arith.addf %33, %38 : vector<64x128xf32>
    %c1_41 = arith.constant 1 : index
    %c1_42 = arith.constant 1 : index
    %c0_43 = arith.constant 0 : index
    %40 = vector.load %arg8[%c1_41, %c1_42, %c0_43] : memref<10x12x128xbf16, #tpu.memory_space<vmem>>, vector<8x8x128xbf16>
    %41 = vector.shape_cast %40 : vector<8x8x128xbf16> to vector<64x128xbf16>
    %c3_44 = arith.constant 3 : index
    %c0_45 = arith.constant 0 : index
    %c0_46 = arith.constant 0 : index
    %42 = vector.load %arg5[%c3_44, %c0_45, %c0_46] : memref<9x128x128xbf16, #tpu.memory_space<vmem>>, vector<1x128x128xbf16>
    %43 = vector.shape_cast %42 : vector<1x128x128xbf16> to vector<128x128xbf16>
    %cst_47 = arith.constant dense<0.000000e+00> : vector<64x128xf32>
    %44 = tpu.matmul %41, %43, %cst_47 {dimension_numbers = #tpu.dot_dimension_numbers<[1], [0], [0], [1], [0, 0, 1, 1], [], []>} : vector<64x128xbf16>, vector<128x128xbf16>, vector<64x128xf32> -> vector<64x128xf32>
    %45 = arith.addf %39, %44 : vector<64x128xf32>
    %c1_48 = arith.constant 1 : index
    %c2_49 = arith.constant 2 : index
    %c0_50 = arith.constant 0 : index
    %46 = vector.load %arg8[%c1_48, %c2_49, %c0_50] : memref<10x12x128xbf16, #tpu.memory_space<vmem>>, vector<8x8x128xbf16>
    %47 = vector.shape_cast %46 : vector<8x8x128xbf16> to vector<64x128xbf16>
    %c4 = arith.constant 4 : index
    %c0_51 = arith.constant 0 : index
    %c0_52 = arith.constant 0 : index
    %48 = vector.load %arg5[%c4, %c0_51, %c0_52] : memref<9x128x128xbf16, #tpu.memory_space<vmem>>, vector<1x128x128xbf16>
    %49 = vector.shape_cast %48 : vector<1x128x128xbf16> to vector<128x128xbf16>
    %cst_53 = arith.constant dense<0.000000e+00> : vector<64x128xf32>
    %50 = tpu.matmul %47, %49, %cst_53 {dimension_numbers = #tpu.dot_dimension_numbers<[1], [0], [0], [1], [0, 0, 1, 1], [], []>} : vector<64x128xbf16>, vector<128x128xbf16>, vector<64x128xf32> -> vector<64x128xf32>
    %51 = arith.addf %45, %50 : vector<64x128xf32>
    %c1_54 = arith.constant 1 : index
    %c3_55 = arith.constant 3 : index
    %c0_56 = arith.constant 0 : index
    %52 = vector.load %arg8[%c1_54, %c3_55, %c0_56] : memref<10x12x128xbf16, #tpu.memory_space<vmem>>, vector<8x8x128xbf16>
    %53 = vector.shape_cast %52 : vector<8x8x128xbf16> to vector<64x128xbf16>
    %c5 = arith.constant 5 : index
    %c0_57 = arith.constant 0 : index
    %c0_58 = arith.constant 0 : index
    %54 = vector.load %arg5[%c5, %c0_57, %c0_58] : memref<9x128x128xbf16, #tpu.memory_space<vmem>>, vector<1x128x128xbf16>
    %55 = vector.shape_cast %54 : vector<1x128x128xbf16> to vector<128x128xbf16>
    %cst_59 = arith.constant dense<0.000000e+00> : vector<64x128xf32>
    %56 = tpu.matmul %53, %55, %cst_59 {dimension_numbers = #tpu.dot_dimension_numbers<[1], [0], [0], [1], [0, 0, 1, 1], [], []>} : vector<64x128xbf16>, vector<128x128xbf16>, vector<64x128xf32> -> vector<64x128xf32>
    %57 = arith.addf %51, %56 : vector<64x128xf32>
    %c2_60 = arith.constant 2 : index
    %c1_61 = arith.constant 1 : index
    %c0_62 = arith.constant 0 : index
    %58 = vector.load %arg8[%c2_60, %c1_61, %c0_62] : memref<10x12x128xbf16, #tpu.memory_space<vmem>>, vector<8x8x128xbf16>
    %59 = vector.shape_cast %58 : vector<8x8x128xbf16> to vector<64x128xbf16>
    %c6 = arith.constant 6 : index
    %c0_63 = arith.constant 0 : index
    %c0_64 = arith.constant 0 : index
    %60 = vector.load %arg5[%c6, %c0_63, %c0_64] : memref<9x128x128xbf16, #tpu.memory_space<vmem>>, vector<1x128x128xbf16>
    %61 = vector.shape_cast %60 : vector<1x128x128xbf16> to vector<128x128xbf16>
    %cst_65 = arith.constant dense<0.000000e+00> : vector<64x128xf32>
    %62 = tpu.matmul %59, %61, %cst_65 {dimension_numbers = #tpu.dot_dimension_numbers<[1], [0], [0], [1], [0, 0, 1, 1], [], []>} : vector<64x128xbf16>, vector<128x128xbf16>, vector<64x128xf32> -> vector<64x128xf32>
    %63 = arith.addf %57, %62 : vector<64x128xf32>
    %c2_66 = arith.constant 2 : index
    %c2_67 = arith.constant 2 : index
    %c0_68 = arith.constant 0 : index
    %64 = vector.load %arg8[%c2_66, %c2_67, %c0_68] : memref<10x12x128xbf16, #tpu.memory_space<vmem>>, vector<8x8x128xbf16>
    %65 = vector.shape_cast %64 : vector<8x8x128xbf16> to vector<64x128xbf16>
    %c7 = arith.constant 7 : index
    %c0_69 = arith.constant 0 : index
    %c0_70 = arith.constant 0 : index
    %66 = vector.load %arg5[%c7, %c0_69, %c0_70] : memref<9x128x128xbf16, #tpu.memory_space<vmem>>, vector<1x128x128xbf16>
    %67 = vector.shape_cast %66 : vector<1x128x128xbf16> to vector<128x128xbf16>
    %cst_71 = arith.constant dense<0.000000e+00> : vector<64x128xf32>
    %68 = tpu.matmul %65, %67, %cst_71 {dimension_numbers = #tpu.dot_dimension_numbers<[1], [0], [0], [1], [0, 0, 1, 1], [], []>} : vector<64x128xbf16>, vector<128x128xbf16>, vector<64x128xf32> -> vector<64x128xf32>
    %69 = arith.addf %63, %68 : vector<64x128xf32>
    %c2_72 = arith.constant 2 : index
    %c3_73 = arith.constant 3 : index
    %c0_74 = arith.constant 0 : index
    %70 = vector.load %arg8[%c2_72, %c3_73, %c0_74] : memref<10x12x128xbf16, #tpu.memory_space<vmem>>, vector<8x8x128xbf16>
    %71 = vector.shape_cast %70 : vector<8x8x128xbf16> to vector<64x128xbf16>
    %c8 = arith.constant 8 : index
    %c0_75 = arith.constant 0 : index
    %c0_76 = arith.constant 0 : index
    %72 = vector.load %arg5[%c8, %c0_75, %c0_76] : memref<9x128x128xbf16, #tpu.memory_space<vmem>>, vector<1x128x128xbf16>
    %73 = vector.shape_cast %72 : vector<1x128x128xbf16> to vector<128x128xbf16>
    %cst_77 = arith.constant dense<0.000000e+00> : vector<64x128xf32>
    %74 = tpu.matmul %71, %73, %cst_77 {dimension_numbers = #tpu.dot_dimension_numbers<[1], [0], [0], [1], [0, 0, 1, 1], [], []>} : vector<64x128xbf16>, vector<128x128xbf16>, vector<64x128xf32> -> vector<64x128xf32>
    %75 = arith.addf %69, %74 : vector<64x128xf32>
    %76 = vector.shape_cast %75 : vector<64x128xf32> to vector<8x8x128xf32>
    %77 = arith.truncf %76 : vector<8x8x128xf32> to vector<8x8x128xbf16>
    %c0_78 = arith.constant 0 : index
    %c0_79 = arith.constant 0 : index
    %c0_80 = arith.constant 0 : index
    %c0_81 = arith.constant 0 : index
    %78 = vector.load %arg6[%c0_78, %c0_79, %c0_80, %c0_81] : memref<1x8x8x128xbf16, #tpu.memory_space<vmem>>, vector<1x8x8x128xbf16>
    %79 = vector.shape_cast %78 : vector<1x8x8x128xbf16> to vector<8x8x128xbf16>
    %80 = vector.shape_cast %77 : vector<8x8x128xbf16> to vector<1x8x8x128xbf16>
    tpu.vector_store %arg6[%c0_78, %c0_79, %c0_80, %c0_81], %80 {strides = array<i32>} : memref<1x8x8x128xbf16, #tpu.memory_space<vmem>>, vector<1x8x8x128xbf16>,
    %cst_82 = arith.constant dense<0.000000e+00> : vector<128xf32>
    %81 = vector.multi_reduction <add>, %75, %cst_82 [0] : vector<64x128xf32> to vector<128xf32>
    %82 = vector.shape_cast %81 : vector<128xf32> to vector<1x128xf32>
    %c0_83 = arith.constant 0 : index
    %c0_84 = arith.constant 0 : index
    %c0_85 = arith.constant 0 : index
    %83 = vector.load %arg7[%c0_83, %c0_84, %c0_85] : memref<1x2x128xf32, #tpu.memory_space<vmem>>, vector<1x1x128xf32>
    %84 = vector.shape_cast %83 : vector<1x1x128xf32> to vector<1x128xf32>
    %85 = vector.shape_cast %82 : vector<1x128xf32> to vector<1x1x128xf32>
    tpu.vector_store %arg7[%c0_83, %c0_84, %c0_85], %85 {strides = array<i32>} : memref<1x2x128xf32, #tpu.memory_space<vmem>>, vector<1x1x128xf32>,
    %86 = arith.mulf %75, %75 : vector<64x128xf32>
    %cst_86 = arith.constant dense<0.000000e+00> : vector<128xf32>
    %87 = vector.multi_reduction <add>, %86, %cst_86 [0] : vector<64x128xf32> to vector<128xf32>
    %88 = vector.shape_cast %87 : vector<128xf32> to vector<1x128xf32>
    %c0_87 = arith.constant 0 : index
    %c1_88 = arith.constant 1 : index
    %c0_89 = arith.constant 0 : index
    %89 = vector.load %arg7[%c0_87, %c1_88, %c0_89] : memref<1x2x128xf32, #tpu.memory_space<vmem>>, vector<1x1x128xf32>
    %90 = vector.shape_cast %89 : vector<1x1x128xf32> to vector<1x128xf32>
    %91 = vector.shape_cast %88 : vector<1x128xf32> to vector<1x1x128xf32>
    tpu.vector_store %arg7[%c0_87, %c1_88, %c0_89], %91 {strides = array<i32>} : memref<1x2x128xf32, #tpu.memory_space<vmem>>, vector<1x1x128xf32>,
    return
  }
  func.func @transform_0(%arg0: i32, %arg1: i32) -> (i32, i32, i32, i32) {
    %c0_i32 = arith.constant 0 : i32
    %c0_i32_0 = arith.constant 0 : i32
    %c0_i32_1 = arith.constant 0 : i32
    %c0_i32_2 = arith.constant 0 : i32
    return %arg0, %c0_i32, %c0_i32_0, %c0_i32_1 : i32, i32, i32, i32
  }
  func.func @transform_1(%arg0: i32, %arg1: i32) -> (i32, i32) {
    %c0_i32 = arith.constant 0 : i32
    %c0_i32_0 = arith.constant 0 : i32
    %c0_i32_1 = arith.constant 0 : i32
    return %c0_i32, %c0_i32_0 : i32, i32
  }
  func.func @transform_2(%arg0: i32, %arg1: i32) -> (i32, i32) {
    %c0_i32 = arith.constant 0 : i32
    %c0_i32_0 = arith.constant 0 : i32
    %c0_i32_1 = arith.constant 0 : i32
    return %c0_i32, %c0_i32_0 : i32, i32
  }
  func.func @transform_3(%arg0: i32, %arg1: i32) -> (i32, i32, i32) {
    %c0_i32 = arith.constant 0 : i32
    %c0_i32_0 = arith.constant 0 : i32
    %c0_i32_1 = arith.constant 0 : i32
    return %c0_i32, %c0_i32_0, %arg1 : i32, i32, i32
  }
  func.func @transform_4(%arg0: i32, %arg1: i32) -> (i32, i32, i32, i32) {
    %c0_i32 = arith.constant 0 : i32
    %c0_i32_0 = arith.constant 0 : i32
    %c0_i32_1 = arith.constant 0 : i32
    return %arg0, %c0_i32, %c0_i32_0, %arg1 : i32, i32, i32, i32
  }
  func.func @transform_5(%arg0: i32, %arg1: i32) -> (i32, i32, i32) {
    %c0_i32 = arith.constant 0 : i32
    %c0_i32_0 = arith.constant 0 : i32
    return %arg0, %c0_i32, %arg1 : i32, i32, i32
  }
}

module attributes {stable_mosaic.version = 11 : i64} {
  func.func @_bn_apply_kernel(%arg0: i32, %arg1: i32, %arg2: memref<1x8x8x128xbf16, #tpu.memory_space<vmem>>, %arg3: memref<1x128xf32, #tpu.memory_space<vmem>>, %arg4: memref<1x128xf32, #tpu.memory_space<vmem>>, %arg5: memref<1x8x8x128xf32, #tpu.memory_space<vmem>>) attributes {dimension_semantics = [#tpu.dimension_semantics<parallel>, #tpu.dimension_semantics<parallel>], iteration_bounds = array<i64: 2, 1>, scalar_prefetch = 0 : i64, scratch_operands = 0 : i64, tpu.core_type = #tpu.core_type<tc>, window_params = [{transform_indices = @transform_0, window_bounds = array<i64: 1, 8, 8, 128>}, {transform_indices = @transform_1, window_bounds = array<i64: 1, 128>}, {transform_indices = @transform_2, window_bounds = array<i64: 1, 128>}, {transform_indices = @transform_3, window_bounds = array<i64: 1, 8, 8, 128>}]} {
    %c0 = arith.constant 0 : index
    %c0_0 = arith.constant 0 : index
    %0 = vector.load %arg3[%c0, %c0_0] : memref<1x128xf32, #tpu.memory_space<vmem>>, vector<1x128xf32>
    %1 = vector.shape_cast %0 : vector<1x128xf32> to vector<1x1x128xf32>
    %c0_1 = arith.constant 0 : index
    %c0_2 = arith.constant 0 : index
    %2 = vector.load %arg4[%c0_1, %c0_2] : memref<1x128xf32, #tpu.memory_space<vmem>>, vector<1x128xf32>
    %3 = vector.shape_cast %2 : vector<1x128xf32> to vector<1x1x128xf32>
    %c0_3 = arith.constant 0 : index
    %c0_4 = arith.constant 0 : index
    %c0_5 = arith.constant 0 : index
    %c0_6 = arith.constant 0 : index
    %4 = vector.load %arg2[%c0_3, %c0_4, %c0_5, %c0_6] : memref<1x8x8x128xbf16, #tpu.memory_space<vmem>>, vector<1x8x8x128xbf16>
    %5 = vector.shape_cast %4 : vector<1x8x8x128xbf16> to vector<8x8x128xbf16>
    %6 = arith.extf %5 : vector<8x8x128xbf16> to vector<8x8x128xf32>
    %7 = vector.broadcast %1 : vector<1x1x128xf32> to vector<8x8x128xf32>
    %8 = arith.mulf %6, %7 : vector<8x8x128xf32>
    %9 = vector.broadcast %3 : vector<1x1x128xf32> to vector<8x8x128xf32>
    %10 = arith.addf %8, %9 : vector<8x8x128xf32>
    %c0_7 = arith.constant 0 : index
    %c0_8 = arith.constant 0 : index
    %c0_9 = arith.constant 0 : index
    %c0_10 = arith.constant 0 : index
    %11 = vector.load %arg5[%c0_7, %c0_8, %c0_9, %c0_10] : memref<1x8x8x128xf32, #tpu.memory_space<vmem>>, vector<1x8x8x128xf32>
    %12 = vector.shape_cast %11 : vector<1x8x8x128xf32> to vector<8x8x128xf32>
    %13 = vector.shape_cast %10 : vector<8x8x128xf32> to vector<1x8x8x128xf32>
    tpu.vector_store %arg5[%c0_7, %c0_8, %c0_9, %c0_10], %13 {strides = array<i32>} : memref<1x8x8x128xf32, #tpu.memory_space<vmem>>, vector<1x8x8x128xf32>,
    return
  }
  func.func @transform_0(%arg0: i32, %arg1: i32) -> (i32, i32, i32, i32) {
    %c0_i32 = arith.constant 0 : i32
    %c0_i32_0 = arith.constant 0 : i32
    %c0_i32_1 = arith.constant 0 : i32
    return %arg0, %c0_i32, %c0_i32_0, %arg1 : i32, i32, i32, i32
  }
  func.func @transform_1(%arg0: i32, %arg1: i32) -> (i32, i32) {
    %c0_i32 = arith.constant 0 : i32
    %c0_i32_0 = arith.constant 0 : i32
    return %c0_i32, %arg1 : i32, i32
  }
  func.func @transform_2(%arg0: i32, %arg1: i32) -> (i32, i32) {
    %c0_i32 = arith.constant 0 : i32
    %c0_i32_0 = arith.constant 0 : i32
    return %c0_i32, %arg1 : i32, i32
  }
  func.func @transform_3(%arg0: i32, %arg1: i32) -> (i32, i32, i32, i32) {
    %c0_i32 = arith.constant 0 : i32
    %c0_i32_0 = arith.constant 0 : i32
    %c0_i32_1 = arith.constant 0 : i32
    return %arg0, %c0_i32, %c0_i32_0, %arg1 : i32, i32, i32, i32
  }
}

</mosaic_0001>

<bundles_post_ra>
// kernel: _lambda_.5
= control target key start
LH: loop header
LB: loop body
LE: loop exit
PB: predicated region body
PF: predicated region fallthrough
CT: control target
= control target key end

     0   :  { %s490_s12 = smov 0   ;;  %s492_s13 = smov 0   ;;  %s529_s0 = inlined_call_operand.vmem [shape: bf16[2,8,8,128], index: 0, kind: input, shape index: {}]   ;;  %s530_s1 = inlined_call_operand.vmem [shape: f32[1,128], index: 1, kind: input, shape index: {}]   ;;  %s531_s2 = inlined_call_operand.vmem [shape: f32[1,128], index: 2, kind: input, shape index: {}]   ;;  %s532_s3 = inlined_call_operand.vmem [shape: f32[2,8,8,128], index: 3, kind: output, shape index: {}]  }
   0x1   :  { %s494_s14 = smov 0  }
   0x2 LB: > { %s25_s15 = sadd.s32 1, %s464_s13  ;;  %p392_p0 = scmp.ge.s32.totalorder %s468_s14, 1  ;;  %s468_s14 = sphi %s494_s14, %s13_s14   ;;  %s464_s13 = sphi %s492_s13, %s534_s13   ;;  %s460_s12 = sphi %s490_s12, %s533_s12  }
   0x3   : > { %p27_p1 = scmp.ge.s32.totalorder %s25_s15, 2  ;;  %p172_p2 = scmp.lt.s32.totalorder %s468_s14, 3 }
   0x5   : > { %s536_s15 = smov (%p27_p1, %s25_s15), 0  ;;  %p173_p3 = pnand %p392_p0, %p172_p2 }
   0x6   : > { %p208_p4 = scmp.lt.s32.totalorder (!%p173_p3), %s460_s12, 1 }
   0x7   : > { %176 = sbr.rel (%p173_p3) target bundleno = 30 (0x1e), region = 32 }
   0xc   : > { %s538_s12 = smov (!%p208_p4, %s460_s12), 1  ;;  %v444_v0 = vld [vmem:[%s530_s1] ss:$0 sm:$0xff] }
   0xd   : > { %s399_s16 = sshll.u32 %s538_s12, 5  ;;  %s400_s22 = sshll.u32 %s538_s12, 6  ;;  %v445_v5 = vld [vmem:[%s531_s2] ss:$0 sm:$0xff] }
   0xe   : > { %s215_s19 = scalar_lea.vmem %s529_s0, %s399_s16  ;;  %s229_s27 = scalar_lea.vmem %s532_s3, %s400_s22 }
   0xf   : > { %v402_v1 = vld [vmem:[%s215_s19] sm:$0xff]   ;;  %v417_v2 = vld [vmem:[%s215_s19 + $0x8] sm:$0xff]   ;;  %v418_v3 = vld [vmem:[%s215_s19 + $0x10] sm:$0xff]  }
  0x10   : > { %v403_v4 = vunpack.c.l.bf16 %v402_v1  ;;  %v404_v6 = vunpack.c.h.bf16 %v402_v1  ;;  %v407_v7 = vunpack.c.l.bf16 %v417_v2  ;;  %v408_v8 = vunpack.c.h.bf16 %v417_v2  ;;  %v419_v9 = vld [vmem:[%s215_s19 + $0x18] sm:$0xff]  }
  0x11   : > { %v411_v10 = vunpack.c.l.bf16 %v418_v3  ;;  %v412_v11 = vunpack.c.h.bf16 %v418_v3  ;;  %v415_v12 = vunpack.c.l.bf16 %v419_v9  ;;  %v416_v13 = vunpack.c.h.bf16 %v419_v9 }
  0x12   : > { %v251_v14 = vmul.f32 %v444_v0, %v403_v4  ;;  %v252_v15 = vmul.f32 %v444_v0, %v404_v6  ;;  %v253_v16 = vmul.f32 %v444_v0, %v407_v7  ;;  %v254_v17 = vmul.f32 %v444_v0, %v408_v8 }
  0x13   : > { %v255_v18 = vmul.f32 %v444_v0, %v411_v10  ;;  %v256_v19 = vmul.f32 %v444_v0, %v412_v11  ;;  %v257_v23 = vmul.f32 %v444_v0, %v415_v12  ;;  %v258_v25 = vmul.f32 %v444_v0, %v416_v13 }
  0x14   : > { %v262_v20 = vadd.f32 %v445_v5, %v251_v14  ;;  %v263_v21 = vadd.f32 %v445_v5, %v252_v15  ;;  %v264_v22 = vadd.f32 %v445_v5, %v253_v16  ;;  %v265_v24 = vadd.f32 %v445_v5, %v254_v17 }
  0x15   : > { %v266_v26 = vadd.f32 %v445_v5, %v255_v18  ;;  %v267_v27 = vadd.f32 %v445_v5, %v256_v19  ;;  %v268_v28 = vadd.f32 %v445_v5, %v257_v23  ;;  %v269_v29 = vadd.f32 %v445_v5, %v258_v25 }
  0x16   : > { %270 = vst [vmem:[%s229_s27] sm:$0xff] %v262_v20 }
  0x17   : > { %271 = vst [vmem:[%s229_s27 + $0x8] sm:$0xff] %v263_v21 }
  0x18   : > { %272 = vst [vmem:[%s229_s27 + $0x10] sm:$0xff] %v264_v22 }
  0x19   : > { %273 = vst [vmem:[%s229_s27 + $0x18] sm:$0xff] %v265_v24 }
  0x1a   : > { %274 = vst [vmem:[%s229_s27 + $0x20] sm:$0xff] %v266_v26 }
  0x1b   : > { %275 = vst [vmem:[%s229_s27 + $0x28] sm:$0xff] %v267_v27 }
  0x1c   : > { %276 = vst [vmem:[%s229_s27 + $0x30] sm:$0xff] %v268_v28 }
  0x1d   : > { %277 = vst [vmem:[%s229_s27 + $0x38] sm:$0xff] %v269_v29 }
  0x1e PF: > { %s13_s14 = sadd.s32 1, %s468_s14   ;;  %s533_s12 = smov %s464_s13 }
  0x1f   : > { %p10_p5 = scmp.ge.s32.totalorder %s13_s14, 4   ;;  %s534_s13 = smov %s536_s15 }
  0x21   :  { %12 = sbr.rel (!%p10_p5) target bundleno = 2 (0x2), region = 68 }

// kernel: _lambda_.3
= control target key start
LH: loop header
LB: loop body
LE: loop exit
PB: predicated region body
PF: predicated region fallthrough
CT: control target
= control target key end

     0   :  { %s2899_s21 = smov 0   ;;  %s2901_s22 = smov 0   ;;  %s3369_s0 = inlined_call_operand.vmem [shape: bf16[2,9,9,128], index: 0, kind: input, shape index: {}]   ;;  %s3370_s1 = inlined_call_operand.vmem [shape: bf16[2,9,9,128], index: 1, kind: input, shape index: {}]   ;;  %s3371_s2 = inlined_call_operand.vmem [shape: bf16[2,9,9,128], index: 2, kind: input, shape index: {}]   ;;  %s3372_s3 = inlined_call_operand.vmem [shape: bf16[2,9,9,128], index: 3, kind: input, shape index: {}]   ;;  %s3373_s4 = inlined_call_operand.vmem [shape: bf16[9,128,128], index: 4, kind: input, shape index: {}]   ;;  %s3374_s5 = inlined_call_operand.vmem [shape: bf16[2,8,8,128], index: 5, kind: output, shape index: {0}]   ;;  %s3375_s6 = inlined_call_operand.vmem [shape: f32[2,2,128], index: 6, kind: output, shape index: {1}]  }
   0x1   :  { %s2903_s23 = smov 0  }
   0x2 LB: > { %s29_s24 = sadd.s32 1, %s2858_s22  ;;  %p2125_p0 = scmp.ge.s32.totalorder %s2862_s23, 1  ;;  %s2862_s23 = sphi %s2903_s23, %s17_s23   ;;  %s2858_s22 = sphi %s2901_s22, %s3379_s22   ;;  %s2854_s21 = sphi %s2899_s21, %s3378_s21  }
   0x3   : > { %p31_p1 = scmp.ge.s32.totalorder %s29_s24, 2  ;;  %p270_p2 = scmp.lt.s32.totalorder %s2862_s23, 3 }
   0x5   : > { %s3381_s24 = smov (%p31_p1, %s29_s24), 0  ;;  %p271_p3 = pnand %p2125_p0, %p270_p2 }
   0x6   : > { %p329_p4 = scmp.lt.s32.totalorder (!%p271_p3), %s2854_s21, 1 }
   0x7   : > { %274 = sbr.rel (%p271_p3) target bundleno = 347 (0x15b), region = 40 }
   0xc   : > { %v2703_v0 = vld [vmem:[%s3373_s4 + $0x78] sm:$0xff]  ;;  %v2702_v2 = vld [vmem:[%s3373_s4 + $0x70] sm:$0xff]  ;;  %s3383_s21 = smov (!%p329_p4, %s2854_s21), 1  ;;  %v2701_v6 = vld [vmem:[%s3373_s4 + $0x68] sm:$0xff]  ;;  %vm635_vm0 = vsmask.f32 3328 }
   0xd   : > { %v2711_v1 = vld [vmem:[%s3373_s4 + $0xb8] sm:$0xff]  ;;  %2799 = vmatpush.bf16.msra.mxu1 %v2703_v0  ;;  %489 = vmatpush.bf16.msra.mxu0 %v2703_v0  ;;  %v2710_v3 = vld [vmem:[%s3373_s4 + $0xb0] sm:$0xff]  ;;  %s2935_s11 = smul.u32 72, %s3383_s21  ;;  %v2709_v7 = vld [vmem:[%s3373_s4 + $0xa8] sm:$0xff]  ;;  %vm636_vm1 = vsmask.f32 7440 }
   0xe   : > { %831 = vmatpush.bf16.msra.mxu2 %v2711_v1  ;;  %v2723_v4 = vld [vmem:[%s3373_s4 + $0xf8] sm:$0xff]  ;;  %v2722_v5 = vld [vmem:[%s3373_s4 + $0xf0] sm:$0xff]  ;;  %v2721_v8 = vld [vmem:[%s3373_s4 + $0xe8] sm:$0xff]  ;;  %s2132_s30 = sshll.u32 %s3383_s21, 1 }
   0xf   : > { %965 = vmatpush.bf16.msra.mxu3 %v2723_v4  ;;  %s2947_s18 = scalar_lea.vmem %s3369_s0, %s2935_s11  ;;  %v2700_v10 = vld [vmem:[%s3373_s4 + $0x60] sm:$0xff]  ;;  %v2699_v23 = vld [vmem:[%s3373_s4 + $0x58] sm:$0xff]  ;;  %v2698_v31 = vld [vmem:[%s3373_s4 + $0x50] sm:$0xff]  ;;  %s2993_s27 = scalar_lea.vmem %s3370_s1, %s2935_s11 }
  0x10   : > { %v619_v9 = vld [vmem:[%s2947_s18] sm:$0xf]  ;;  %v621_v11 = vld [vmem:[%s2947_s18 + $0x8] sm:$0xf]  ;;  %v620_v16 = vld [vmem:[%s2947_s18 + $0x4] sm:$0x1]  ;;  %s3024_s17 = scalar_lea.vmem %s3371_s2, %s2935_s11  ;;  %s3136_s10 = scalar_lea.vmem %s3372_s3, %s2935_s11 }
  0x11   : > { %2800 = vmatpush.bf16.msra.mxu1 %v2702_v2  ;;  %490 = vmatpush.bf16.msra.mxu0 %v2702_v2  ;;  %v2708_v12 = vld [vmem:[%s3373_s4 + $0xa0] sm:$0xff]  ;;  %v639_v13 = vshrl.u32 %v619_v9, 16  ;;  %v642_v14 = vshll.u32 %v619_v9, 16  ;;  %v653_v15 = vshrl.u32 %v621_v11, 16  ;;  %v622_v17 = vld [vmem:[%s2947_s18 + $0xc] sm:$0x1]  ;;  %vm2985_vm2 = vmor %vm635_vm0, %vm636_vm1  ;;  %s367_s9 = scalar_lea.vmem %s3375_s6, %s2132_s30 }
  0x12   : > { %832 = vmatpush.bf16.msra.mxu2 %v2710_v3  ;;  %v656_v18 = vshll.u32 %v621_v11, 16  ;;  %v2720_v19 = vld [vmem:[%s3373_s4 + $0xe0] sm:$0xff]  ;;  %v2707_v25 = vld [vmem:[%s3373_s4 + $0x98] sm:$0xff]  ;;  %v648_v27 = vshll.u32 %v620_v16, 16  ;;  %v662_v28 = vshll.u32 %v622_v17, 16  ;;  %v2706_v34 = vld [vmem:[%s3373_s4 + $0x90] sm:$0xff] }
  0x13   : > { %966 = vmatpush.bf16.msra.mxu3 %v2722_v5  ;;  %v641_v20 = vrot.slane %v639_v13, 4  ;;  %v644_v21 = vrot.slane %v642_v14, 5  ;;  %v655_v22 = vrot.slane %v653_v15, 4  ;;  %v2719_v30 = vld [vmem:[%s3373_s4 + $0xd8] sm:$0xff]  ;;  %v623_v32 = vld [vmem:[%s2947_s18 + $0x10] sm:$0xf] }
  0x14   : > { %v658_v24 = vrot.slane %v656_v18, 5  ;;  %v625_v33 = vld [vmem:[%s2947_s18 + $0x18] sm:$0xf]  ;;  %v650_v36 = vrot.slane %v648_v27, 5  ;;  %v664_v38 = vrot.slane %v662_v28, 5  ;;  %v2718_v40 = vld [vmem:[%s3373_s4 + $0xd0] sm:$0xff] }
  0x15   : > { %2801 = vmatpush.bf16.msra.mxu1 %v2701_v6  ;;  %491 = vmatpush.bf16.msra.mxu0 %v2701_v6  ;;  %v645_v26 = vor.u32 %v644_v21, %v641_v20  ;;  %v667_v41 = vshrl.u32 %v623_v32, 16  ;;  %v670_v42 = vshll.u32 %v623_v32, 16  ;;  %v681_v43 = vshrl.u32 %v625_v33, 16  ;;  %v2697_v45 = vld [vmem:[%s3373_s4 + $0x48] sm:$0xff]  ;;  %v2696_v49 = vld [vmem:[%s3373_s4 + $0x40] sm:$0xff]  ;;  %v2691_v63 = vld [vmem:[%s3373_s4 + $0x38] sm:$0xff] }
  0x16   : > { %833 = vmatpush.bf16.msra.mxu2 %v2709_v7  ;;  %v659_v29 = vor.u32 %v658_v24, %v655_v22  ;;  %v684_v44 = vshll.u32 %v625_v33, 16  ;;  %v2705_v46 = vld [vmem:[%s3373_s4 + $0x88] sm:$0xff]  ;;  %v2159_v50 = vld [vmem:[%s2993_s27 + $0x20] sm:$0xf]  ;;  %v624_v53 = vld [vmem:[%s2947_s18 + $0x14] sm:$0x1] }
  0x17   : > { %967 = vmatpush.bf16.msra.mxu3 %v2721_v8  ;;  %v646_v35 = vrot.slane %v645_v26, 4  ;;  %v2694_v51 = vld [vmem:[%s2993_s27 + $0x24] sm:$0xf0]  ;;  %v669_v54 = vrot.slane %v667_v41, 4  ;;  %v672_v55 = vrot.slane %v670_v42, 5  ;;  %v683_v56 = vrot.slane %v681_v43, 4 }
  0x18   : > { %v660_v37 = vrot.slane %v659_v29, 4  ;;  %v2717_v52 = vld [vmem:[%s3373_s4 + $0xc8] sm:$0xff]  ;;  %v686_v57 = vrot.slane %v684_v44, 5  ;;  %v2151_v58 = vld [vmem:[%s2993_s27] sm:$0xf]  ;;  %v2160_v1 = vor.u32 %v2694_v51, %v2159_v50  ;;  %v2735_v2 = vld [vmem:[%s3373_s4 + $0x138] sm:$0xff] }
  0x19   : > { %2802 = vmatpush.bf16.msra.mxu1 %v2700_v10  ;;  %492 = vmatpush.bf16.msra.mxu0 %v2700_v10  ;;  %v651_v47 = vsel %vm2985_vm2, %v646_v35, %v650_v36  ;;  %v2692_v59 = vld [vmem:[%s2993_s27 + $0x4] sm:$0xf0]  ;;  %v626_v62 = vld [vmem:[%s2947_s18 + $0x1c] sm:$0x1]  ;;  %v2704_v0 = vld [vmem:[%s3373_s4 + $0x80] sm:$0xff]  ;;  %v676_v4 = vshll.u32 %v624_v53, 16  ;;  %v673_v6 = vor.u32 %v672_v55, %v669_v54 }
  0x1a   : > { %834 = vmatpush.bf16.msra.mxu2 %v2708_v12  ;;  %v665_v48 = vsel %vm2985_vm2, %v660_v37, %v664_v38  ;;  %v767_v60 = vunpack.c.l.b16 %v651_v47  ;;  %v2755_v3 = vld [vmem:[%s3373_s4 + $0x1b8] sm:$0xff]  ;;  %v2152_v5 = vor.u32 %v2692_v59, %v2151_v58  ;;  %v687_v7 = vor.u32 %v686_v57, %v683_v56  ;;  %v2716_v10 = vld [vmem:[%s3373_s4 + $0xc0] sm:$0xff]  ;;  %v2712_v12 = vld [vmem:[%s3024_s17 + $0x4] sm:$0xf0] }
  0x1b   : > { %968 = vmatpush.bf16.msra.mxu3 %v2720_v19  ;;  %v768_v61 = vunpack.c.l.b16 %v665_v48  ;;  %v690_v8 = vshll.u32 %v626_v62, 16  ;;  %v2311_v11 = vld [vmem:[%s3024_s17] sm:$0xf]  ;;  %v2690_v13 = vld [vmem:[%s3373_s4 + $0x30] sm:$0xff]  ;;  %v2767_v14 = vld [vmem:[%s3373_s4 + $0x1f8] sm:$0xff]  ;;  %v678_v16 = vrot.slane %v676_v4, 5 }
  0x1c   : > { %v2734_v15 = vld [vmem:[%s3373_s4 + $0x130] sm:$0xff]  ;;  %v2312_v18 = vor.u32 %v2712_v12, %v2311_v11  ;;  %v674_v19 = vrot.slane %v673_v6, 4  ;;  %v688_v20 = vrot.slane %v687_v7, 4  ;;  %v2689_v22 = vld [vmem:[%s3373_s4 + $0x28] sm:$0xff]  ;;  %v627_v24 = vld [vmem:[%s2947_s18 + $0x20] sm:$0xf] }
  0x1d   : > { %2803 = vmatpush.bf16.msra.mxu1 %v2699_v23  ;;  %493 = vmatpush.bf16.msra.mxu0 %v2699_v23  ;;  %v775_v9 = vpack.c.b16 %v768_v61, %v767_v60  ;;  %v2754_v17 = vld [vmem:[%s3373_s4 + $0x1b0] sm:$0xff]  ;;  %v692_v21 = vrot.slane %v690_v8, 5  ;;  %v2733_v26 = vld [vmem:[%s3373_s4 + $0x128] sm:$0xff]  ;;  %v2732_v36 = vld [vmem:[%s3373_s4 + $0x120] sm:$0xff] }
  0x1e   : > { %835 = vmatpush.bf16.msra.mxu2 %v2707_v25  ;;  %v2766_v23 = vld [vmem:[%s3373_s4 + $0x1f0] sm:$0xff]  ;;  %v629_v25 = vld [vmem:[%s2947_s18 + $0x28] sm:$0xf]  ;;  %v679_v28 = vsel %vm2985_vm2, %v674_v19, %v678_v16  ;;  %v2752_v37 = vld [vmem:[%s3373_s4 + $0x1a0] sm:$0xff] }
  0x1f   : > { %969 = vmatpush.bf16.msra.mxu3 %v2719_v30  ;;  %v2753_v27 = vld [vmem:[%s3373_s4 + $0x1a8] sm:$0xff]  ;;  %v693_v29 = vsel %vm2985_vm2, %v688_v20, %v692_v21  ;;  %v695_v30 = vshrl.u32 %v627_v24, 16  ;;  %v709_v32 = vshrl.u32 %v629_v25, 16  ;;  %v712_v33 = vshll.u32 %v629_v25, 16  ;;  %v2163_v38 = vld [vmem:[%s2993_s27 + $0x30] sm:$0xf] }
  0x20   : > { %v2765_v35 = vld [vmem:[%s3373_s4 + $0x1e8] sm:$0xff]  ;;  %v2155_v41 = vld [vmem:[%s2993_s27 + $0x10] sm:$0xf]  ;;  %v769_v42 = vunpack.c.l.b16 %v679_v28  ;;  %v770_v43 = vunpack.c.l.b16 %v693_v29  ;;  %v2693_v44 = vld [vmem:[%s2993_s27 + $0x14] sm:$0xf0] }
  0x21   : > { %2804 = vmatpush.bf16.msra.mxu1 %v2698_v31  ;;  %494 = vmatpush.bf16.msra.mxu0 %v2698_v31  ;;  %v698_v31 = vshll.u32 %v627_v24, 16  ;;  %v711_v47 = vrot.slane %v709_v32, 4  ;;  %v714_v48 = vrot.slane %v712_v33, 5  ;;  %v628_v50 = vld [vmem:[%s2947_s18 + $0x24] sm:$0x1]  ;;  %v2156_v54 = vor.u32 %v2693_v44, %v2155_v41  ;;  %v2686_v62 = vld [vmem:[%s3373_s4 + $0x10] sm:$0xff] }
  0x22   : > { %836 = vmatpush.bf16.msra.mxu2 %v2706_v34  ;;  %v2688_v34 = vld [vmem:[%s3373_s4 + $0x20] sm:$0xff]  ;;  %v630_v51 = vld [vmem:[%s2947_s18 + $0x2c] sm:$0x1]  ;;  %v776_v55 = vpack.c.b16 %v770_v43, %v769_v42  ;;  %v2315_v56 = vld [vmem:[%s3024_s17 + $0x10] sm:$0xf]  ;;  %v704_v59 = vshll.u32 %v628_v50, 16 }
  0x23   : > { %970 = vmatpush.bf16.msra.mxu3 %v2718_v40  ;;  %v2695_v40 = vld [vmem:[%s2993_s27 + $0x34] sm:$0xf0]  ;;  %v715_v60 = vor.u32 %v714_v48, %v711_v47  ;;  %v718_v61 = vshll.u32 %v630_v51, 16  ;;  %v2685_v6 = vld [vmem:[%s3373_s4 + $0x8] sm:$0xff]  ;;  %v2764_v8 = vld [vmem:[%s3373_s4 + $0x1e0] sm:$0xff] }
  0x24   : > { %v2164_v53 = vor.u32 %v2695_v40, %v2163_v38  ;;  %v2713_v57 = vld [vmem:[%s3024_s17 + $0x14] sm:$0xf0]  ;;  %v2729_v7 = vld [vmem:[%s3373_s4 + $0x108] sm:$0xff]  ;;  %v2750_v11 = vld [vmem:[%s3373_s4 + $0x190] sm:$0xff] }
  0x25   : > { %2805 = vmatpush.bf16.msra.mxu1 %v2697_v45  ;;  %495 = vmatpush.bf16.msra.mxu0 %v2697_v45  ;;  %v697_v45 = vrot.slane %v695_v30, 4  ;;  %v716_v4 = vrot.slane %v715_v60, 4  ;;  %v2743_v20 = vld [vmem:[%s3373_s4 + $0x178] sm:$0xff]  ;;  %v2728_v21 = vld [vmem:[%s3373_s4 + $0x100] sm:$0xff]  ;;  %v2680_v24 = vld [vmem:[%s2947_s18 + $0x4] sm:$0xf0] }
  0x26   : > { %837 = vmatpush.bf16.msra.mxu2 %v2705_v46  ;;  %v700_v46 = vrot.slane %v698_v31, 5  ;;  %v2375_v25 = vld [vmem:[%s3136_s10] sm:$0xf]  ;;  %v2742_v33 = vld [vmem:[%s3373_s4 + $0x170] sm:$0xff]  ;;  %v2714_v41 = vld [vmem:[%s3024_s17 + $0x24] sm:$0xf0] }
  0x27   : > { %971 = vmatpush.bf16.msra.mxu3 %v2717_v52  ;;  %v2731_v52 = vld [vmem:[%s3373_s4 + $0x118] sm:$0xff]  ;;  %v2319_v40 = vld [vmem:[%s3024_s17 + $0x20] sm:$0xf]  ;;  %v2774_v42 = vld [vmem:[%s3373_s4 + $0x230] sm:$0xff] }
  0x28   : > { %v701_v58 = vor.u32 %v700_v46, %v697_v45  ;;  %v2741_v47 = vld [vmem:[%s3373_s4 + $0x168] sm:$0xff] }
  0x29   : > { %2806 = vmatpush.bf16.msra.mxu1 %v2696_v49  ;;  %496 = vmatpush.bf16.msra.mxu0 %v2696_v49  ;;  %v2687_v49 = vld [vmem:[%s3373_s4 + $0x18] sm:$0xff]  ;;  %v2749_v48 = vld [vmem:[%s3373_s4 + $0x188] sm:$0xff] }
  0x2a   : > { %838 = vmatpush.bf16.msra.mxu2 %v2704_v0  ;;  %v2316_v0 = vor.u32 %v2713_v57, %v2315_v56  ;;  %v2773_v50 = vld [vmem:[%s3373_s4 + $0x228] sm:$0xff]  ;;  %v2762_v56 = vld [vmem:[%s3373_s4 + $0x1d0] sm:$0xff]  ;;  %v2740_v57 = vld [vmem:[%s3373_s4 + $0x160] sm:$0xff] }
  0x2b   : > { %972 = vmatpush.bf16.msra.mxu3 %v2716_v10  ;;  %v633_v10 = vld [vmem:[%s2947_s18 + $0x38] sm:$0xf] }
  0x2c   : > { %507 = vmatmul.bf16.vlgmr.msra.gmra.mxu1 %v2160_v1  ;;  %497 = vmatmul.bf16.vlgmr.msra.gmra.mxu0 %v2152_v5  ;;  %v2751_v1 = vld [vmem:[%s3373_s4 + $0x198] sm:$0xff]  ;;  %v720_v5 = vrot.slane %v718_v61, 5  ;;  %v740_v19 = vshll.u32 %v633_v10, 16 }
  0x2d   : > { %590 = vmatpush.bf16.msrb.mxu1 %v2691_v63  ;;  %1099 = vmatpush.bf16.msrb.mxu0 %v2735_v2  ;;  %v2730_v63 = vld [vmem:[%s3373_s4 + $0x110] sm:$0xff]  ;;  %v702_v2 = vrot.slane %v701_v58, 4  ;;  %v2772_v58 = vld [vmem:[%s3373_s4 + $0x220] sm:$0xff] }
  0x2e   : > { %1480 = vmatpush.bf16.msrb.mxu2 %v2755_v3  ;;  %973 = vmatmul.bf16.vlgmr.msra.gmra.mxu3 %v2312_v18  ;;  %v706_v3 = vrot.slane %v704_v59, 5  ;;  %v737_v18 = vshrl.u32 %v633_v10, 16  ;;  %v742_v32 = vrot.slane %v740_v19, 5  ;;  %v2761_v59 = vld [vmem:[%s3373_s4 + $0x1c8] sm:$0xff]  ;;  %v2715_v10 = vld [vmem:[%s3024_s17 + $0x34] sm:$0xf0] }
  0x2f   : > { %839 = vmatmul.bf16.vlgmr.msra.gmra.mxu2 %v775_v9  ;;  %1615 = vmatpush.bf16.msrb.mxu3 %v2767_v14  ;;  %v631_v9 = vld [vmem:[%s2947_s18 + $0x30] sm:$0xf]  ;;  %v2763_v14 = vld [vmem:[%s3373_s4 + $0x1d8] sm:$0xff]  ;;  %v2682_v19 = vld [vmem:[%s2947_s18 + $0x24] sm:$0xf0] }
  0x30   : > { %v707_v12 = vsel %vm2985_vm2, %v702_v2, %v706_v3  ;;  %v723_v16 = vshrl.u32 %v631_v9, 16  ;;  %v739_v31 = vrot.slane %v737_v18, 4  ;;  %v2725_v2 = vld [vmem:[%s3136_s10 + $0x14] sm:$0xf0]  ;;  %v2207_v18 = vld [vmem:[%s2947_s18 + $0x20] sm:$0xf] }
  0x31   : > { %591 = vmatpush.bf16.msrb.mxu1 %v2690_v13  ;;  %1100 = vmatpush.bf16.msrb.mxu0 %v2734_v15  ;;  %v721_v13 = vsel %vm2985_vm2, %v716_v4, %v720_v5  ;;  %v2684_v15 = vld [vmem:[%s3373_s4] sm:$0xff]  ;;  %v2738_v5 = vld [vmem:[%s3373_s4 + $0x150] sm:$0xff] }
  0x32   : > { %1481 = vmatpush.bf16.msrb.mxu2 %v2754_v17  ;;  %v726_v17 = vshll.u32 %v631_v9, 16  ;;  %v772_v28 = vunpack.c.l.b16 %v721_v13  ;;  %v725_v29 = vrot.slane %v723_v16, 4  ;;  %v743_v45 = vor.u32 %v742_v32, %v739_v31  ;;  %v2323_v9 = vld [vmem:[%s3024_s17 + $0x30] sm:$0xf]  ;;  %v2771_v13 = vld [vmem:[%s3373_s4 + $0x218] sm:$0xff] }
  0x33   : > { %1616 = vmatpush.bf16.msrb.mxu3 %v2766_v23  ;;  %v2775_v23 = vld [vmem:[%s3373_s4 + $0x238] sm:$0xff]  ;;  %v2770_v16 = vld [vmem:[%s3373_s4 + $0x210] sm:$0xff]  ;;  %v1136_v31 = vld [vmem:[%s3024_s17] sm:$0xf] }
  0x34   : > { %v728_v30 = vrot.slane %v726_v17, 5  ;;  %v2769_v17 = vld [vmem:[%s3373_s4 + $0x208] sm:$0xff] }
  0x35   : > { %592 = vmatpush.bf16.msrb.mxu1 %v2689_v22  ;;  %1101 = vmatpush.bf16.msrb.mxu0 %v2733_v26  ;;  %v2199_v22 = vld [vmem:[%s2947_s18] sm:$0xf]  ;;  %v2724_v26 = vld [vmem:[%s3136_s10 + $0x4] sm:$0xf0] }
  0x36   : > { %1482 = vmatpush.bf16.msrb.mxu2 %v2753_v27  ;;  %v771_v27 = vunpack.c.l.b16 %v707_v12  ;;  %v729_v43 = vor.u32 %v728_v30, %v725_v29  ;;  %v2737_v12 = vld [vmem:[%s3373_s4 + $0x148] sm:$0xff]  ;;  %v2768_v30 = vld [vmem:[%s3373_s4 + $0x200] sm:$0xff] }
  0x37   : > { %1617 = vmatpush.bf16.msrb.mxu3 %v2765_v35  ;;  %v634_v35 = vld [vmem:[%s2947_s18 + $0x3c] sm:$0x1]  ;;  %v1138_v32 = vld [vmem:[%s3024_s17 + $0x8] sm:$0xf] }
  0x38   : > { %v777_v38 = vpack.c.b16 %v772_v28, %v771_v27  ;;  %v746_v46 = vshll.u32 %v634_v35, 16  ;;  %v730_v51 = vrot.slane %v729_v43, 4  ;;  %v2567_v27 = vld [vmem:[%s2993_s27 + $0x8] sm:$0xf]  ;;  %v2756_v28 = vld [vmem:[%s2993_s27 + $0xc] sm:$0xf0] }
  0x39   : > { %593 = vmatpush.bf16.msrb.mxu1 %v2688_v34  ;;  %1102 = vmatpush.bf16.msrb.mxu0 %v2732_v36  ;;  %v632_v34 = vld [vmem:[%s2947_s18 + $0x34] sm:$0x1]  ;;  %v2200_v36 = vor.u32 %v2680_v24, %v2199_v22  ;;  %v2495_v22 = vld [vmem:[%s2947_s18 + $0x8] sm:$0xf]  ;;  %v2208_v24 = vor.u32 %v2682_v19, %v2207_v18  ;;  %v2568_v29 = vor.u32 %v2756_v28, %v2567_v27  ;;  %v1153_v35 = vshrl.u32 %v1136_v31, 16 }
  0x3a   : > { %1483 = vmatpush.bf16.msrb.mxu2 %v2752_v37  ;;  %v2376_v37 = vor.u32 %v2724_v26, %v2375_v25  ;;  %v732_v44 = vshll.u32 %v632_v34, 16  ;;  %v2615_v34 = vld [vmem:[%s2947_s18 + $0x10] sm:$0xf]  ;;  %v2617_v18 = vld [vmem:[%s2947_s18 + $0x18] sm:$0xf] }
  0x3b   : > { %1618 = vmatpush.bf16.msrb.mxu3 %v2764_v8  ;;  %v1686_v43 = vshll.u32 %v2615_v34, 16  ;;  %v2619_v19 = vld [vmem:[%s2947_s18 + $0x20] sm:$0xf]  ;;  %v1697_v28 = vshrl.u32 %v2617_v18, 16 }
  0x3c   : > { %512 = vmatmul.bf16.gmra.mxu1 %v2164_v53  ;;  %502 = vmatmul.bf16.gmra.mxu0 %v2156_v54  ;;  %v744_v53 = vrot.slane %v743_v45, 4  ;;  %v748_v54 = vrot.slane %v746_v46, 5  ;;  %v2683_v45 = vld [vmem:[%s2947_s18 + $0x34] sm:$0xf0]  ;;  %v2387_v46 = vld [vmem:[%s3136_s10 + $0x30] sm:$0xf] }
  0x3d   : > { %594 = vmatpush.bf16.msrb.mxu1 %v2687_v49  ;;  %1103 = vmatpush.bf16.msrb.mxu0 %v2731_v52  ;;  %v2320_v49 = vor.u32 %v2714_v41, %v2319_v40  ;;  %v734_v52 = vrot.slane %v732_v44, 5  ;;  %v2211_v44 = vld [vmem:[%s2947_s18 + $0x30] sm:$0xf] }
  0x3e   : > { %1484 = vmatpush.bf16.msrb.mxu2 %v2751_v1  ;;  %978 = vmatmul.bf16.gmra.mxu3 %v2316_v0  ;;  %v749_v61 = vsel %vm2985_vm2, %v744_v53, %v748_v54  ;;  %v2681_v0 = vld [vmem:[%s2947_s18 + $0x14] sm:$0xf0]  ;;  %v2379_v1 = vld [vmem:[%s3136_s10 + $0x10] sm:$0xf] }
  0x3f   : > { %844 = vmatmul.bf16.gmra.mxu2 %v776_v55  ;;  %1619 = vmatpush.bf16.msrb.mxu3 %v2763_v14  ;;  %v2748_v55 = vld [vmem:[%s3373_s4 + $0x180] sm:$0xff]  ;;  %v735_v60 = vsel %vm2985_vm2, %v730_v51, %v734_v52  ;;  %v774_v4 = vunpack.c.l.b16 %v749_v61  ;;  %v1155_v51 = vrot.slane %v1153_v35, 4  ;;  %v2616_v61 = vld [vmem:[%s2947_s18 + $0x14] sm:$0x1] }
  0x40   : > { %v773_v3 = vunpack.c.l.b16 %v735_v60  ;;  %v2760_v14 = vld [vmem:[%s3373_s4 + $0x1c0] sm:$0xff]  ;;  %v2614_v60 = vld [vmem:[%s2947_s18 + $0xc] sm:$0x1] }
  0x41   : > { %595 = vmatpush.bf16.msrb.mxu1 %v2686_v62  ;;  %1104 = vmatpush.bf16.msrb.mxu0 %v2730_v63  ;;  %v2739_v62 = vld [vmem:[%s3373_s4 + $0x158] sm:$0xff]  ;;  %v2203_v63 = vld [vmem:[%s2947_s18 + $0x10] sm:$0xf] }
  0x42   : > { %1485 = vmatpush.bf16.msrb.mxu2 %v2750_v11  ;;  %v778_v8 = vpack.c.b16 %v774_v4, %v773_v3  ;;  %v2324_v11 = vor.u32 %v2715_v10, %v2323_v9  ;;  %v1692_v10 = vshll.u32 %v2616_v61, 16 }
  0x43   : > { %1620 = vmatpush.bf16.msrb.mxu3 %v2762_v56 }
  0x45   : > { %596 = vmatpush.bf16.msrb.mxu1 %v2685_v6  ;;  %1105 = vmatpush.bf16.msrb.mxu0 %v2729_v7  ;;  %v2204_v6 = vor.u32 %v2681_v0, %v2203_v63  ;;  %v2380_v7 = vor.u32 %v2725_v2, %v2379_v1 }
  0x46   : > { %1486 = vmatpush.bf16.msrb.mxu2 %v2749_v48  ;;  %v2499_v48 = vld [vmem:[%s2947_s18 + $0x18] sm:$0xf] }
  0x47   : > { %1621 = vmatpush.bf16.msrb.mxu3 %v2761_v59  ;;  %v1688_v59 = vrot.slane %v1686_v43, 5  ;;  %v1699_v43 = vrot.slane %v1697_v28, 4 }
  0x49   : > { %597 = vmatpush.bf16.msrb.mxu1 %v2684_v15  ;;  %1106 = vmatpush.bf16.msrb.mxu0 %v2728_v21  ;;  %v2736_v15 = vld [vmem:[%s3373_s4 + $0x140] sm:$0xff]  ;;  %v2726_v21 = vld [vmem:[%s3136_s10 + $0x24] sm:$0xf0] }
  0x4a   : > { %1487 = vmatpush.bf16.msrb.mxu2 %v2748_v55  ;;  %v2745_v55 = vld [vmem:[%s2947_s18 + $0x1c] sm:$0xf0] }
  0x4b   : > { %1622 = vmatpush.bf16.msrb.mxu3 %v2760_v14  ;;  %v2500_v2 = vor.u32 %v2745_v55, %v2499_v48  ;;  %v1142_v14 = vld [vmem:[%s3024_s17 + $0x18] sm:$0xf] }
  0x4c   : > { %598 = vmatmul.bf16.vlgmr.msrb.gmra.mxu1 %v2200_v36  ;;  %1107 = vmatmul.bf16.vlgmr.msrb.gmra.mxu0 %v2376_v37  ;;  %v1156_v36 = vshll.u32 %v1136_v31, 16  ;;  %v1167_v37 = vshrl.u32 %v1138_v32, 16  ;;  %v1198_v27 = vshll.u32 %v1142_v14, 16  ;;  %v1714_v31 = vshll.u32 %v2619_v19, 16 }
  0x4d   : > { %1345 = vmatpush.bf16.msra.mxu1 %v2743_v20  ;;  %1861 = vmatpush.bf16.msra.mxu0 %v2775_v23  ;;  %v2383_v20 = vld [vmem:[%s3136_s10 + $0x20] sm:$0xf] }
  0x4e   : > { %983 = vmatmul.bf16.gmra.mxu3 %v2320_v49  ;;  %2807 = vmatpush.bf16.msra.mxu2 %v2775_v23  ;;  %v2744_v23 = vld [vmem:[%s2947_s18 + $0xc] sm:$0xf0]  ;;  %v2384_v25 = vor.u32 %v2726_v21, %v2383_v20  ;;  %v1137_v49 = vld [vmem:[%s3024_s17 + $0x4] sm:$0x1]  ;;  %v1158_v52 = vrot.slane %v1156_v36, 5  ;;  %v1169_v53 = vrot.slane %v1167_v37, 4 }
  0x4f   : > { %849 = vmatmul.bf16.gmra.mxu2 %v777_v38  ;;  %v2496_v26 = vor.u32 %v2744_v23, %v2495_v22  ;;  %v1170_v38 = vshll.u32 %v1138_v32, 16  ;;  %v1162_v63 = vshll.u32 %v1137_v49, 16  ;;  %v1694_v23 = vrot.slane %v1692_v10, 5  ;;  %v1141_v36 = vld [vmem:[%s3024_s17 + $0x14] sm:$0x1] }
  0x50   : > { %v1159_v3 = vor.u32 %v1158_v52, %v1155_v51  ;;  %v2618_v51 = vld [vmem:[%s2947_s18 + $0x1c] sm:$0x1]  ;;  %v2620_v52 = vld [vmem:[%s2947_s18 + $0x24] sm:$0x1] }
  0x51   : > { %1346 = vmatpush.bf16.msra.mxu1 %v2742_v33  ;;  %1862 = vmatpush.bf16.msra.mxu0 %v2774_v42  ;;  %v2613_v33 = vld [vmem:[%s2947_s18 + $0x8] sm:$0xf]  ;;  %v1172_v54 = vrot.slane %v1170_v38, 5 }
  0x52   : > { %2808 = vmatpush.bf16.msra.mxu2 %v2774_v42  ;;  %v1669_v40 = vshrl.u32 %v2613_v33, 16  ;;  %v1672_v41 = vshll.u32 %v2613_v33, 16  ;;  %v1683_v42 = vshrl.u32 %v2615_v34, 16 }
  0x53   : > { %v1173_v4 = vor.u32 %v1172_v54, %v1169_v53  ;;  %v2503_v53 = vld [vmem:[%s2947_s18 + $0x28] sm:$0xf]  ;;  %v2746_v54 = vld [vmem:[%s2947_s18 + $0x2c] sm:$0xf0] }
  0x54   : > { %v1671_v56 = vrot.slane %v1669_v40, 4 }
  0x55   : > { %1347 = vmatpush.bf16.msra.mxu1 %v2741_v47  ;;  %1863 = vmatpush.bf16.msra.mxu0 %v2773_v50  ;;  %v2727_v47 = vld [vmem:[%s3136_s10 + $0x34] sm:$0xf0] }
  0x56   : > { %2809 = vmatpush.bf16.msra.mxu2 %v2773_v50  ;;  %v1139_v50 = vld [vmem:[%s3024_s17 + $0xc] sm:$0x1]  ;;  %v2388_v1 = vor.u32 %v2727_v47, %v2387_v46  ;;  %v1716_v46 = vrot.slane %v1714_v31, 5 }
  0x57   : > { %v1176_v0 = vshll.u32 %v1139_v50, 16 }
  0x59   : > { %1348 = vmatpush.bf16.msra.mxu1 %v2740_v57  ;;  %1864 = vmatpush.bf16.msra.mxu0 %v2772_v58  ;;  %v1674_v57 = vrot.slane %v1672_v41, 5  ;;  %v1200_v41 = vrot.slane %v1198_v27, 5 }
  0x5a   : > { %2810 = vmatpush.bf16.msra.mxu2 %v2772_v58  ;;  %v1685_v58 = vrot.slane %v1683_v42, 4  ;;  %v1143_v42 = vld [vmem:[%s3024_s17 + $0x1c] sm:$0x1] }
  0x5c   : > { %603 = vmatmul.bf16.gmra.mxu1 %v2204_v6  ;;  %1112 = vmatmul.bf16.gmra.mxu0 %v2380_v7  ;;  %v2757_v6 = vld [vmem:[%s2993_s27 + $0x1c] sm:$0xf0]  ;;  %v1675_v7 = vor.u32 %v1674_v57, %v1671_v56  ;;  %v1689_v9 = vor.u32 %v1688_v59, %v1685_v58  ;;  %v1190_v56 = vshll.u32 %v1141_v36, 16  ;;  %v1204_v58 = vshll.u32 %v1143_v42, 16  ;;  %v1145_v42 = vld [vmem:[%s3024_s17 + $0x24] sm:$0x1] }
  0x5d   : > { %1349 = vmatpush.bf16.msra.mxu1 %v2739_v62  ;;  %1865 = vmatpush.bf16.msra.mxu0 %v2771_v13  ;;  %v2212_v62 = vor.u32 %v2683_v45, %v2211_v44 }
  0x5e   : > { %988 = vmatmul.bf16.gmra.mxu3 %v2324_v11  ;;  %2811 = vmatpush.bf16.msra.mxu2 %v2771_v13  ;;  %v1164_v11 = vrot.slane %v1162_v63, 5  ;;  %v1140_v13 = vld [vmem:[%s3024_s17 + $0x10] sm:$0xf]  ;;  %v1676_v20 = vrot.slane %v1675_v7, 4  ;;  %v1690_v22 = vrot.slane %v1689_v9, 4  ;;  %v1206_v7 = vrot.slane %v1204_v58, 5 }
  0x5f   : > { %854 = vmatmul.bf16.gmra.mxu2 %v778_v8  ;;  %v1678_v8 = vshll.u32 %v2614_v60, 16  ;;  %v1706_v60 = vshll.u32 %v2618_v51, 16  ;;  %v2507_v51 = vld [vmem:[%s2947_s18 + $0x38] sm:$0xf]  ;;  %v2626_v58 = vld [vmem:[%s2947_s18 + $0x3c] sm:$0x1] }
  0x60   : > { %v1695_v35 = vsel %vm2985_vm2, %v1690_v22, %v1694_v23 }
  0x61   : > { %1350 = vmatpush.bf16.msra.mxu1 %v2738_v5  ;;  %1866 = vmatpush.bf16.msra.mxu0 %v2770_v16  ;;  %v2571_v5 = vld [vmem:[%s2993_s27 + $0x18] sm:$0xf]  ;;  %v1680_v21 = vrot.slane %v1678_v8, 5  ;;  %v1798_v50 = vunpack.c.l.b16 %v1695_v35  ;;  %v1708_v9 = vrot.slane %v1706_v60, 5 }
  0x62   : > { %2812 = vmatpush.bf16.msra.mxu2 %v2770_v16  ;;  %v1174_v16 = vrot.slane %v1173_v4, 4 }
  0x63   : > { %v1681_v34 = vsel %vm2985_vm2, %v1676_v20, %v1680_v21  ;;  %v2625_v21 = vld [vmem:[%s2947_s18 + $0x38] sm:$0xf] }
  0x64   : > { %v1797_v49 = vunpack.c.l.b16 %v1681_v34  ;;  %v1756_v34 = vshll.u32 %v2625_v21, 16 }
  0x65   : > { %1351 = vmatpush.bf16.msra.mxu1 %v2737_v12  ;;  %1867 = vmatpush.bf16.msra.mxu0 %v2769_v17  ;;  %v1178_v12 = vrot.slane %v1176_v0, 5 }
  0x66   : > { %2813 = vmatpush.bf16.msra.mxu2 %v2769_v17  ;;  %v2572_v17 = vor.u32 %v2757_v6, %v2571_v5  ;;  %v1805_v0 = vpack.c.b16 %v1798_v50, %v1797_v49  ;;  %v1192_v5 = vrot.slane %v1190_v56, 5  ;;  %v2747_v56 = vld [vmem:[%s2947_s18 + $0x3c] sm:$0xf0] }
  0x67   : > { %v1179_v33 = vsel %vm2985_vm2, %v1174_v16, %v1178_v12  ;;  %v1144_v12 = vld [vmem:[%s3024_s17 + $0x20] sm:$0xf]  ;;  %v2623_v16 = vld [vmem:[%s2947_s18 + $0x30] sm:$0xf] }
  0x68   : > { %v1282_v48 = vunpack.c.l.b16 %v1179_v33  ;;  %v1212_v20 = vshll.u32 %v1144_v12, 16  ;;  %v1753_v33 = vshrl.u32 %v2625_v21, 16 }
  0x69   : > { %1352 = vmatpush.bf16.msra.mxu1 %v2736_v15  ;;  %1868 = vmatpush.bf16.msra.mxu0 %v2768_v30  ;;  %v1160_v15 = vrot.slane %v1159_v3, 4  ;;  %v2758_v3 = vld [vmem:[%s2993_s27 + $0x2c] sm:$0xf0] }
  0x6a   : > { %2814 = vmatpush.bf16.msra.mxu2 %v2768_v30  ;;  %v1711_v30 = vshrl.u32 %v2619_v19, 16  ;;  %v1209_v19 = vshrl.u32 %v1144_v12, 16  ;;  %v1214_v36 = vrot.slane %v1212_v20, 5 }
  0x6b   : > { %v1165_v32 = vsel %vm2985_vm2, %v1160_v15, %v1164_v11  ;;  %v2621_v15 = vld [vmem:[%s2947_s18 + $0x28] sm:$0xf] }
  0x6c   : > { %608 = vmatmul.bf16.gmra.mxu1 %v2208_v24  ;;  %1117 = vmatmul.bf16.gmra.mxu0 %v2384_v25  ;;  %v1181_v24 = vshrl.u32 %v1140_v13, 16  ;;  %v1184_v25 = vshll.u32 %v1140_v13, 16  ;;  %v1713_v45 = vrot.slane %v1711_v30, 4  ;;  %v1281_v47 = vunpack.c.l.b16 %v1165_v32 }
  0x6d   : > { %v1725_v27 = vshrl.u32 %v2621_v15, 16  ;;  %v1728_v28 = vshll.u32 %v2621_v15, 16  ;;  %v1742_v30 = vshll.u32 %v2623_v16, 16  ;;  %v1211_v35 = vrot.slane %v1209_v19, 4 }
  0x6e   : > { %1623 = vmatmul.bf16.vlgmr.msrb.gmra.mxu3 %v2568_v29  ;;  %v1700_v29 = vshll.u32 %v2617_v18, 16  ;;  %v1183_v37 = vrot.slane %v1181_v24, 4  ;;  %v1186_v38 = vrot.slane %v1184_v25, 5  ;;  %v1717_v61 = vor.u32 %v1716_v46, %v1713_v45  ;;  %v2622_v46 = vld [vmem:[%s2947_s18 + $0x2c] sm:$0x1] }
  0x6f   : > { %1488 = vmatmul.bf16.vlgmr.msrb.gmra.mxu2 %v2496_v26  ;;  %v1195_v26 = vshrl.u32 %v1142_v14, 16  ;;  %v1289_v63 = vpack.c.b16 %v1282_v48, %v1281_v47  ;;  %v1146_v14 = vld [vmem:[%s3024_s17 + $0x28] sm:$0xf]  ;;  %v1727_v47 = vrot.slane %v1725_v27, 4  ;;  %v1730_v48 = vrot.slane %v1728_v28, 5 }
  0x70   : > { %v1702_v44 = vrot.slane %v1700_v29, 5  ;;  %v1187_v55 = vor.u32 %v1186_v38, %v1183_v37  ;;  %v1718_v10 = vrot.slane %v1717_v61, 4  ;;  %v1223_v24 = vshrl.u32 %v1146_v14, 16  ;;  %v1150_v27 = vld [vmem:[%s3024_s17 + $0x38] sm:$0xf] }
  0x71   : > { %v1197_v40 = vrot.slane %v1195_v26, 4  ;;  %v1226_v25 = vshll.u32 %v1146_v14, 16  ;;  %v2627_v26 = vld [vmem:[%s2947_s18 + $0x40] sm:$0xf]  ;;  %v1739_v29 = vshrl.u32 %v2623_v16, 16  ;;  %v1744_v50 = vrot.slane %v1742_v30, 5 }
  0x72   : > { %v1703_v59 = vor.u32 %v1702_v44, %v1699_v43  ;;  %v1188_v4 = vrot.slane %v1187_v55, 4  ;;  %v1767_v37 = vshrl.u32 %v2627_v26, 16  ;;  %v1770_v38 = vshll.u32 %v2627_v26, 16  ;;  %v1147_v43 = vld [vmem:[%s3024_s17 + $0x2c] sm:$0x1] }
  0x73   : > { %v1201_v57 = vor.u32 %v1200_v41, %v1197_v40  ;;  %v1225_v44 = vrot.slane %v1223_v24, 4  ;;  %v1228_v45 = vrot.slane %v1226_v25, 5  ;;  %v1741_v49 = vrot.slane %v1739_v29, 4  ;;  %v1148_v24 = vld [vmem:[%s3024_s17 + $0x30] sm:$0xf] }
  0x74   : > { %v1704_v8 = vrot.slane %v1703_v59, 4  ;;  %v1769_v59 = vrot.slane %v1767_v37, 4  ;;  %v1772_v60 = vrot.slane %v1770_v38, 5  ;;  %v1218_v61 = vshll.u32 %v1145_v42, 16 }
  0x75   : > { %v1202_v6 = vrot.slane %v1201_v57, 4  ;;  %v1215_v57 = vor.u32 %v1214_v36, %v1211_v35  ;;  %v1251_v35 = vshrl.u32 %v1150_v27, 16  ;;  %v1254_v36 = vshll.u32 %v1150_v27, 16 }
  0x76   : > { %v1709_v22 = vsel %vm2985_vm2, %v1704_v8, %v1708_v9  ;;  %v2759_v8 = vld [vmem:[%s2993_s27 + $0x3c] sm:$0xf0]  ;;  %v1773_v12 = vor.u32 %v1772_v60, %v1769_v59  ;;  %v1220_v14 = vrot.slane %v1218_v61, 5 }
  0x77   : > { %v1207_v18 = vsel %vm2985_vm2, %v1202_v6, %v1206_v7  ;;  %v1799_v40 = vunpack.c.l.b16 %v1709_v22  ;;  %v2508_v6 = vor.u32 %v2747_v56, %v2507_v51  ;;  %v2579_v7 = vld [vmem:[%s2993_s27 + $0x38] sm:$0xf] }
  0x78   : > { %v1284_v32 = vunpack.c.l.b16 %v1207_v18  ;;  %v2580_v18 = vor.u32 %v2759_v8, %v2579_v7  ;;  %v1774_v25 = vrot.slane %v1773_v12, 4 }
  0x7c   : > { %613 = vmatmul.bf16.gmra.mxu1 %v2212_v62  ;;  %1122 = vmatmul.bf16.gmra.mxu0 %v2388_v1  ;;  %v1720_v62 = vshll.u32 %v2620_v52, 16  ;;  %v2504_v1 = vor.u32 %v2746_v54, %v2503_v53  ;;  %v2624_v52 = vld [vmem:[%s2947_s18 + $0x34] sm:$0x1]  ;;  %v1755_v53 = vrot.slane %v1753_v33, 4  ;;  %v1758_v54 = vrot.slane %v1756_v34, 5 }
  0x7d   : > { %v1240_v34 = vshll.u32 %v1148_v24, 16 }
  0x7e   : > { %1628 = vmatmul.bf16.gmra.mxu3 %v2572_v17  ;;  %v1722_v11 = vrot.slane %v1720_v62, 5  ;;  %v1193_v17 = vsel %vm2985_vm2, %v1188_v4, %v1192_v5  ;;  %v1229_v62 = vor.u32 %v1228_v45, %v1225_v44  ;;  %v1745_v4 = vor.u32 %v1744_v50, %v1741_v49  ;;  %v1151_v50 = vld [vmem:[%s3024_s17 + $0x3c] sm:$0x1] }
  0x7f   : > { %1493 = vmatmul.bf16.gmra.mxu2 %v2500_v2  ;;  %v2575_v2 = vld [vmem:[%s2993_s27 + $0x28] sm:$0xf]  ;;  %v1283_v31 = vunpack.c.l.b16 %v1193_v17  ;;  %v1748_v5 = vshll.u32 %v2624_v52, 16  ;;  %v1759_v9 = vor.u32 %v1758_v54, %v1755_v53  ;;  %v1256_v49 = vrot.slane %v1254_v36, 5 }
  0x80   : > { %v2576_v13 = vor.u32 %v2758_v3, %v2575_v2  ;;  %v1723_v23 = vsel %vm2985_vm2, %v1718_v10, %v1722_v11  ;;  %v1731_v3 = vor.u32 %v1730_v48, %v1727_v47  ;;  %v1762_v10 = vshll.u32 %v2626_v58, 16 }
  0x81   : > { %v1800_v41 = vunpack.c.l.b16 %v1723_v23  ;;  %v1290_v55 = vpack.c.b16 %v1284_v32, %v1283_v31  ;;  %v1216_v11 = vrot.slane %v1215_v57, 4  ;;  %v1230_v15 = vrot.slane %v1229_v62, 4 }
  0x82   : > { %v1732_v19 = vrot.slane %v1731_v3, 4  ;;  %v1746_v20 = vrot.slane %v1745_v4, 4  ;;  %v1750_v21 = vrot.slane %v1748_v5, 5  ;;  %v1760_v22 = vrot.slane %v1759_v9, 4 }
  0x83   : > { %v1806_v2 = vpack.c.b16 %v1800_v41, %v1799_v40  ;;  %v1764_v23 = vrot.slane %v1762_v10, 5  ;;  %v1221_v28 = vsel %vm2985_vm2, %v1216_v11, %v1220_v14  ;;  %v1237_v32 = vshrl.u32 %v1148_v24, 16 }
  0x84   : > { %v1751_v31 = vsel %vm2985_vm2, %v1746_v20, %v1750_v21  ;;  %v1285_v38 = vunpack.c.l.b16 %v1221_v28  ;;  %v1242_v47 = vrot.slane %v1240_v34, 5  ;;  %v1253_v48 = vrot.slane %v1251_v35, 4 }
  0x85   : > { %v1765_v33 = vsel %vm2985_vm2, %v1760_v22, %v1764_v23  ;;  %v1802_v42 = vunpack.c.l.b16 %v1751_v31  ;;  %v1239_v44 = vrot.slane %v1237_v32, 4  ;;  %v1260_v59 = vshll.u32 %v1151_v50, 16 }
  0x86   : > { %v1257_v58 = vor.u32 %v1256_v49, %v1253_v48 }
  0x87   : > { %v1243_v57 = vor.u32 %v1242_v47, %v1239_v44 }
  0x88   : > { %v1258_v62 = vrot.slane %v1257_v58, 4 }
  0x89   : > { %v1244_v60 = vrot.slane %v1243_v57, 4 }
  0x8c   : > { %1353 = vmatmul.bf16.vlgmr.msra.gmra.mxu1 %v1289_v63  ;;  %1869 = vmatmul.bf16.vlgmr.msra.gmra.mxu0 %v1805_v0  ;;  %v1232_v63 = vshll.u32 %v1147_v43, 16  ;;  %v1734_v0 = vshll.u32 %v2622_v46, 16  ;;  %v1803_v43 = vunpack.c.l.b16 %v1765_v33  ;;  %v1149_v46 = vld [vmem:[%s3024_s17 + $0x34] sm:$0x1] }
  0x8d   : > { %v1246_v53 = vshll.u32 %v1149_v46, 16 }
  0x8e   : > { %1633 = vmatmul.bf16.gmra.mxu3 %v2576_v13  ;;  %v1234_v16 = vrot.slane %v1232_v63, 5  ;;  %v1736_v17 = vrot.slane %v1734_v0, 5  ;;  %v1262_v63 = vrot.slane %v1260_v59, 5 }
  0x8f   : > { %1498 = vmatmul.bf16.gmra.mxu2 %v2504_v1  ;;  %v2628_v1 = vld [vmem:[%s2947_s18 + $0x44] sm:$0x1]  ;;  %v1248_v61 = vrot.slane %v1246_v53, 5  ;;  %s2679_s18 = sshll.u32 %s3383_s21, 5 }
  0x90   : > { %v1776_v13 = vshll.u32 %v2628_v1, 16  ;;  %v1235_v29 = vsel %vm2985_vm2, %v1230_v15, %v1234_v16  ;;  %v1737_v30 = vsel %vm2985_vm2, %v1732_v19, %v1736_v17  ;;  %v1263_v4 = vsel %vm2985_vm2, %v1258_v62, %v1262_v63  ;;  %s3339_s10 = scalar_lea.vmem %s3374_s5, %s2679_s18 }
  0x91   : > { %v1286_v40 = vunpack.c.l.b16 %v1235_v29  ;;  %v1801_v41 = vunpack.c.l.b16 %v1737_v30  ;;  %v1249_v3 = vsel %vm2985_vm2, %v1244_v60, %v1248_v61  ;;  %v1288_v7 = vunpack.c.l.b16 %v1263_v4 }
  0x92   : > { %v1778_v26 = vrot.slane %v1776_v13, 5 }
  0x93   : > { %v1291_v51 = vpack.c.b16 %v1286_v40, %v1285_v38  ;;  %v1807_v52 = vpack.c.b16 %v1802_v42, %v1801_v41 }
  0x94   : > { %v1779_v37 = vsel %vm2985_vm2, %v1774_v25, %v1778_v26 }
  0x95   : > { %v1804_v45 = vunpack.c.l.b16 %v1779_v37 }
  0x97   : > { %v1808_v56 = vpack.c.b16 %v1804_v45, %v1803_v43 }
  0x9c   : > { %1358 = vmatmul.bf16.gmra.mxu1 %v1290_v55  ;;  %1874 = vmatmul.bf16.gmra.mxu0 %v1806_v2 }
  0x9e   : > { %1638 = vmatmul.bf16.gmra.mxu3 %v2580_v18 }
  0x9f   : > { %1503 = vmatmul.bf16.gmra.mxu2 %v2508_v6  ;;  %v1287_v6 = vunpack.c.l.b16 %v1249_v3 }
  0xa1   : > { %v1292_v8 = vpack.c.b16 %v1288_v7, %v1287_v6 }
  0xa9   : > { %v508_v54 = vpop.f32.mrf.mxu1  ;;  %v498_v55 = vpop.f32.mrf.mxu0 }
  0xac   : > { %1363 = vmatmul.bf16.gmra.mxu1 %v1291_v51  ;;  %1879 = vmatmul.bf16.gmra.mxu0 %v1807_v52 }
  0xaf   : > { %1884 = vmatmul.bf16.vlgmr.msra.gmra.mxu2 %v1808_v56 }
  0xb1   : > { %v510_v1 = vpop.f32.mrf.mxu1  ;;  %v500_v2 = vpop.f32.mrf.mxu0 }
  0xb2   : > { %v840_v0 = vpop.f32.mrf.mxu2  ;;  %v974_v5 = vpop.f32.mrf.mxu3 }
  0xb9   : > { %v513_v10 = vpop.f32.mrf.mxu1  ;;  %v503_v11 = vpop.f32.mrf.mxu0 }
  0xba   : > { %v842_v9 = vpop.f32.mrf.mxu2  ;;  %v3310_v12 = vpop.f32.mrf.mxu3 }
  0xbc   : > { %1368 = vmatmul.bf16.gmra.mxu1 %v1292_v8 }
  0xc1   : > { %v515_v14 = vpop.f32.mrf.mxu1  ;;  %v505_v15 = vpop.f32.mrf.mxu0 }
  0xc2   : > { %v845_v13 = vpop.f32.mrf.mxu2  ;;  %v979_v16 = vpop.f32.mrf.mxu3 }
  0xc9   : > { %v599_v18 = vpop.f32.mrf.mxu1  ;;  %v1108_v19 = vpop.f32.mrf.mxu0 }
  0xca   : > { %v847_v17 = vpop.f32.mrf.mxu2  ;;  %v600_v20 = vadd.f32 %v599_v18, %v498_v55  ;;  %v3312_v21 = vpop.f32.mrf.mxu3 }
  0xcc   : > { %v860_v39 = vadd.f32 %v840_v0, %v600_v20 }
  0xce   : > { %v994_v22 = vadd.f32 %v974_v5, %v860_v39 }
  0xd0   : > { %v1128_v23 = vadd.f32 %v1108_v19, %v994_v22 }
  0xd1   : > { %v601_v25 = vpop.f32.mrf.mxu1  ;;  %v1110_v26 = vpop.f32.mrf.mxu0 }
  0xd2   : > { %v850_v24 = vpop.f32.mrf.mxu2  ;;  %v602_v27 = vadd.f32 %v601_v25, %v500_v2  ;;  %v984_v29 = vpop.f32.mrf.mxu3 }
  0xd4   : > { %v861_v28 = vadd.f32 %v842_v9, %v602_v27 }
  0xd9   : > { %v604_v31 = vpop.f32.mrf.mxu1  ;;  %v1113_v32 = vpop.f32.mrf.mxu0 }
  0xda   : > { %v852_v30 = vpop.f32.mrf.mxu2  ;;  %v605_v33 = vadd.f32 %v604_v31, %v503_v11  ;;  %v3314_v38 = vpop.f32.mrf.mxu3  ;;  %v995_v11 = vadd.f32 %v3310_v12, %v861_v28 }
  0xdc   : > { %v862_v34 = vadd.f32 %v845_v13, %v605_v33 }
  0xde   : > { %v996_v35 = vadd.f32 %v979_v16, %v862_v34 }
  0xe0   : > { %v1130_v36 = vadd.f32 %v1113_v32, %v996_v35 }
  0xe1   : > { %v606_v40 = vpop.f32.mrf.mxu1  ;;  %v1115_v41 = vpop.f32.mrf.mxu0 }
  0xe2   : > { %v855_v37 = vpop.f32.mrf.mxu2  ;;  %v607_v42 = vadd.f32 %v606_v40, %v505_v15  ;;  %v3316_v48 = vpop.f32.mrf.mxu3 }
  0xe4   : > { %v863_v43 = vadd.f32 %v847_v17, %v607_v42 }
  0xe9   : > { %v609_v45 = vpop.f32.mrf.mxu1  ;;  %v1118_v46 = vpop.f32.mrf.mxu0 }
  0xea   : > { %v857_v44 = vpop.f32.mrf.mxu2  ;;  %v610_v47 = vadd.f32 %v609_v45, %v508_v54  ;;  %v3324_v58 = vpop.f32.mrf.mxu3 }
  0xec   : > { %v864_v49 = vadd.f32 %v850_v24, %v610_v47 }
  0xee   : > { %v998_v50 = vadd.f32 %v984_v29, %v864_v49 }
  0xf0   : > { %v3318_v51 = vadd.f32 %v1118_v46, %v998_v50 }
  0xf1   : > { %v611_v53 = vpop.f32.mrf.mxu1  ;;  %v3320_v55 = vpop.f32.mrf.mxu0 }
  0xf2   : > { %v1489_v52 = vpop.f32.mrf.mxu2  ;;  %v612_v56 = vadd.f32 %v611_v53, %v510_v1  ;;  %v1624_v63 = vpop.f32.mrf.mxu3 }
  0xf4   : > { %v3322_v57 = vadd.f32 %v852_v30, %v612_v56  ;;  %v997_v30 = vadd.f32 %v3312_v21, %v863_v43 }
  0xf9   : > { %v614_v60 = vpop.f32.mrf.mxu1  ;;  %v3326_v61 = vpop.f32.mrf.mxu0 }
  0xfa   : > { %v1491_v59 = vpop.f32.mrf.mxu2  ;;  %v615_v54 = vadd.f32 %v614_v60, %v513_v10  ;;  %v1626_v1 = vpop.f32.mrf.mxu3  ;;  %v1129_v10 = vadd.f32 %v1110_v26, %v995_v11 }
  0xfc   : > { %v3328_v62 = vadd.f32 %v855_v37, %v615_v54  ;;  %v1131_v37 = vadd.f32 %v1115_v41, %v997_v30 }
 0x101   : > { %v616_v2 = vpop.f32.mrf.mxu1  ;;  %v3330_v3 = vpop.f32.mrf.mxu0 }
 0x102   : > { %v1494_v0 = vpop.f32.mrf.mxu2  ;;  %v617_v4 = vadd.f32 %v616_v2, %v515_v14  ;;  %v1629_v19 = vpop.f32.mrf.mxu3 }
 0x104   : > { %v3332_v5 = vadd.f32 %v857_v44, %v617_v4 }
 0x109   : > { %v1354_v6 = vpop.f32.mrf.mxu1  ;;  %v1870_v7 = vpop.f32.mrf.mxu0 }
 0x10a   : > { %v1374_v8 = vadd.f32 %v1354_v6, %v1128_v23  ;;  %v1496_v9 = vpop.f32.mrf.mxu2  ;;  %v1631_v33 = vpop.f32.mrf.mxu3 }
 0x10c   : > { %v1509_v13 = vadd.f32 %v1489_v52, %v1374_v8 }
 0x10e   : > { %v1644_v15 = vadd.f32 %v1624_v63, %v1509_v13  ;;  %v999_v63 = vadd.f32 %v3314_v38, %v3322_v57 }
 0x110   : > { %v1890_v39 = vadd.f32 %v1870_v7, %v1644_v15 }
 0x111   : > { %v1356_v16 = vpop.f32.mrf.mxu1  ;;  %v1872_v17 = vpop.f32.mrf.mxu0 }
 0x112   : > { %v1375_v18 = vadd.f32 %v1356_v16, %v1129_v10  ;;  %v1499_v14 = vpop.f32.mrf.mxu2  ;;  %v1928_v25 = vmul.f32 %v1890_v39, %v1890_v39 }
 0x114   : > { %v1510_v20 = vadd.f32 %v1491_v59, %v1375_v18 }
 0x116   : > { %v1645_v22 = vadd.f32 %v1626_v1, %v1510_v20  ;;  %v1133_v1 = vadd.f32 %v3320_v55, %v999_v63 }
 0x118   : > { %v1891_v24 = vadd.f32 %v1872_v17, %v1645_v22 }
 0x119   : > { %v1359_v12 = vpop.f32.mrf.mxu1  ;;  %v1875_v23 = vpop.f32.mrf.mxu0 }
 0x11a   : > { %v2779_v26 = vpack.c.bf16 %v1891_v24, %v1890_v39  ;;  %v1914_v27 = vadd.f32 %v1891_v24, %v1890_v39  ;;  %v1929_v28 = vmul.f32 %v1891_v24, %v1891_v24  ;;  %v1376_v29 = vadd.f32 %v1359_v12, %v1130_v36  ;;  %v1501_v35 = vpop.f32.mrf.mxu2  ;;  %v1634_v36 = vpop.f32.mrf.mxu3 }
 0x11b   : > { %v1001_v24 = vadd.f32 %v3324_v58, %v3332_v5 }
 0x11c   : > { %2780 = vst [vmem:[%s3339_s10] sm:$0xff] %v2779_v26   ;;  %v1936_v31 = vadd.f32 %v1929_v28, %v1928_v25  ;;  %v1511_v32 = vadd.f32 %v1494_v0, %v1376_v29 }
 0x11e   : > { %v1646_v34 = vadd.f32 %v1629_v19, %v1511_v32 }
 0x120   : > { %v1892_v40 = vadd.f32 %v1875_v23, %v1646_v34  ;;  %v1135_v23 = vadd.f32 %v3330_v3, %v1001_v24 }
 0x121   : > { %v1361_v42 = vpop.f32.mrf.mxu1  ;;  %v1877_v44 = vpop.f32.mrf.mxu0 }
 0x122   : > { %v1915_v45 = vadd.f32 %v1914_v27, %v1892_v40  ;;  %v1930_v46 = vmul.f32 %v1892_v40, %v1892_v40  ;;  %v1377_v47 = vadd.f32 %v1361_v42, %v1131_v37  ;;  %v1504_v21 = vpop.f32.mrf.mxu2  ;;  %v1636_v7 = vpop.f32.mrf.mxu3 }
 0x124   : > { %v1937_v49 = vadd.f32 %v1936_v31, %v1930_v46  ;;  %v1512_v50 = vadd.f32 %v1496_v9, %v1377_v47 }
 0x126   : > { %v1647_v52 = vadd.f32 %v1631_v33, %v1512_v50 }
 0x128   : > { %v1893_v53 = vadd.f32 %v1877_v44, %v1647_v52 }
 0x129   : > { %v1364_v43 = vpop.f32.mrf.mxu1  ;;  %v1880_v41 = vpop.f32.mrf.mxu0 }
 0x12a   : > { %v2784_v56 = vpack.c.bf16 %v1893_v53, %v1892_v40  ;;  %v1916_v59 = vadd.f32 %v1915_v45, %v1893_v53  ;;  %v1931_v60 = vmul.f32 %v1893_v53, %v1893_v53  ;;  %v1378_v54 = vadd.f32 %v1364_v43, %v3318_v51  ;;  %v1506_v10 = vpop.f32.mrf.mxu2  ;;  %v1639_v22 = vpop.f32.mrf.mxu3 }
 0x12b   : > { %v1000_v51 = vadd.f32 %v3316_v48, %v3328_v62 }
 0x12c   : > { %2796 = vst [vmem:[%s3339_s10 + $0x8] sm:$0xff] %v2784_v56   ;;  %v1938_v0 = vadd.f32 %v1937_v49, %v1931_v60  ;;  %v1513_v2 = vadd.f32 %v1499_v14, %v1378_v54 }
 0x12d   : > { %v1134_v17 = vadd.f32 %v3326_v61, %v1000_v51 }
 0x12e   : > { %v1648_v4 = vadd.f32 %v1634_v36, %v1513_v2 }
 0x130   : > { %v1894_v6 = vadd.f32 %v1880_v41, %v1648_v4 }
 0x131   : > { %v1366_v8 = vpop.f32.mrf.mxu1  ;;  %v1882_v38 = vpop.f32.mrf.mxu0 }
 0x132   : > { %v1917_v9 = vadd.f32 %v1916_v59, %v1894_v6  ;;  %v1932_v11 = vmul.f32 %v1894_v6, %v1894_v6  ;;  %v1379_v13 = vadd.f32 %v1366_v8, %v1133_v1  ;;  %v1885_v48 = vpop.f32.mrf.mxu2  ;;  %v1641_v32 = vpop.f32.mrf.mxu3 }
 0x134   : > { %v1939_v15 = vadd.f32 %v1938_v0, %v1932_v11  ;;  %v1514_v16 = vadd.f32 %v1501_v35, %v1379_v13 }
 0x136   : > { %v1649_v57 = vadd.f32 %v1636_v7, %v1514_v16 }
 0x138   : > { %v1895_v18 = vadd.f32 %v1882_v38, %v1649_v57 }
 0x139   : > { %v1369_v19 = vpop.f32.mrf.mxu1 }
 0x13a   : > { %v2789_v55 = vpack.c.bf16 %v1895_v18, %v1894_v6  ;;  %v1918_v20 = vadd.f32 %v1917_v9, %v1895_v18  ;;  %v1933_v39 = vmul.f32 %v1895_v18, %v1895_v18  ;;  %v1380_v14 = vadd.f32 %v1369_v19, %v1134_v17  ;;  %v1887_v34 = vpop.f32.mrf.mxu2 }
 0x13c   : > { %2797 = vst [vmem:[%s3339_s10 + $0x10] sm:$0xff] %v2789_v55   ;;  %v1940_v25 = vadd.f32 %v1939_v15, %v1933_v39  ;;  %v1515_v12 = vadd.f32 %v1504_v21, %v1380_v14 }
 0x13e   : > { %v1650_v62 = vadd.f32 %v1639_v22, %v1515_v12 }
 0x140   : > { %v1896_v26 = vadd.f32 %v1885_v48, %v1650_v62 }
 0x141   : > { %v1371_v61 = vpop.f32.mrf.mxu1 }
 0x142   : > { %v1919_v27 = vadd.f32 %v1918_v20, %v1896_v26  ;;  %v1934_v28 = vmul.f32 %v1896_v26, %v1896_v26  ;;  %v1381_v29 = vadd.f32 %v1371_v61, %v1135_v23 }
 0x144   : > { %v1941_v30 = vadd.f32 %v1940_v25, %v1934_v28  ;;  %v1516_v31 = vadd.f32 %v1506_v10, %v1381_v29 }
 0x146   : > { %v1651_v33 = vadd.f32 %v1641_v32, %v1516_v31 }
 0x148   : > { %v1897_v58 = vadd.f32 %v1887_v34, %v1651_v33 }
 0x14a   : > { %v2794_v5 = vpack.c.bf16 %v1897_v58, %v1896_v26  ;;  %v1920_v35 = vadd.f32 %v1919_v27, %v1897_v58  ;;  %v1935_v37 = vmul.f32 %v1897_v58, %v1897_v58 }
 0x14c   : > { %2798 = vst [vmem:[%s3339_s10 + $0x18] sm:$0xff] %v2794_v5   ;;  %v1921_v40 = vrot.slane %v1920_v35, 4  ;;  %v1942_v42 = vadd.f32 %v1941_v30, %v1935_v37 }
 0x14e   : > { %v1922_v44 = vadd.f32 %v1921_v40, %v1920_v35  ;;  %v1943_v3 = vrot.slane %v1942_v42, 4 }
 0x150   : > { %v1923_v45 = vrot.slane %v1922_v44, 2  ;;  %v1944_v46 = vadd.f32 %v1943_v3, %v1942_v42 }
 0x152   : > { %v1924_v47 = vadd.f32 %v1923_v45, %v1922_v44  ;;  %v1945_v49 = vrot.slane %v1944_v46, 2 }
 0x154   : > { %v1925_v50 = vrot.slane %v1924_v47, 1  ;;  %v1946_v52 = vadd.f32 %v1945_v49, %v1944_v46 }
 0x156   : > { %v1926_v36 = vadd.f32 %v1925_v50, %v1924_v47  ;;  %v1947_v53 = vrot.slane %v1946_v52, 1 }
 0x158   : > { %1927 = vst [vmem:[%s367_s9] sm:$0x1] %v1926_v36  ;;  %v1948_v21 = vadd.f32 %v1947_v53, %v1946_v52 }
 0x15a   : > { %1949 = vst [vmem:[%s367_s9 + $0x1] sm:$0x1] %v1948_v21 }
 0x15b PF: > { %s17_s23 = sadd.s32 1, %s2862_s23   ;;  %s3378_s21 = smov %s2858_s22 }
 0x15c   : > { %p14_p5 = scmp.ge.s32.totalorder %s17_s23, 4   ;;  %s3379_s22 = smov %s3381_s24 }
 0x15e   :  { %16 = sbr.rel (!%p14_p5) target bundleno = 2 (0x2), region = 104 }

// kernel: _lambda_.4
= control target key start
LH: loop header
LB: loop body
LE: loop exit
PB: predicated region body
PF: predicated region fallthrough
CT: control target
= control target key end

     0   :  { %s3338_s18 = smov 0   ;;  %s3340_s19 = smov 0   ;;  %s4145_s0 = inlined_call_operand.vmem [shape: bf16[2,8,8,128], index: 0, kind: input, shape index: {}]   ;;  %s4146_s1 = inlined_call_operand.vmem [shape: f32[1,128], index: 1, kind: input, shape index: {}]   ;;  %s4147_s2 = inlined_call_operand.vmem [shape: f32[1,128], index: 2, kind: input, shape index: {}]   ;;  %s4148_s3 = inlined_call_operand.vmem [shape: bf16[9,128,128], index: 3, kind: input, shape index: {}]   ;;  %s4149_s4 = inlined_call_operand.vmem [shape: bf16[2,8,8,128], index: 4, kind: output, shape index: {0}]   ;;  %s4150_s5 = inlined_call_operand.vmem [shape: f32[2,2,128], index: 5, kind: output, shape index: {1}]  }
   0x1   :  { %s3342_s20 = smov 0  }
   0x2 LB: > { %s28_s21 = sadd.s32 1, %s3301_s19  ;;  %p2674_p0 = scmp.ge.s32.totalorder %s3305_s20, 1  ;;  %s3305_s20 = sphi %s3342_s20, %s16_s20   ;;  %s3301_s19 = sphi %s3340_s19, %s4158_s19   ;;  %s3297_s18 = sphi %s3338_s18, %s4157_s18  }
   0x3   : > { %p30_p1 = scmp.ge.s32.totalorder %s28_s21, 2  ;;  %p215_p2 = scmp.lt.s32.totalorder %s3305_s20, 3 }
   0x5   : > { %s4160_s21 = smov (%p30_p1, %s28_s21), 0  ;;  %p216_p3 = pnand %p2674_p0, %p215_p2 }
   0x6   : > { %p257_p4 = scmp.lt.s32.totalorder (!%p216_p3), %s3297_s18, 1 }
   0x7   : > { %219 = sbr.rel (%p216_p3) target bundleno = 379 (0x17b), region = 36 }
   0xc   : > { %v3139_v0 = vld [vmem:[%s4148_s3 + $0x78] sm:$0xff]  ;;  %v3138_v2 = vld [vmem:[%s4148_s3 + $0x70] sm:$0xff]  ;;  %s4162_s18 = smov (!%p257_p4, %s3297_s18), 1  ;;  %v3307_v3 = vmov 0   ;;  %v3137_v6 = vld [vmem:[%s4148_s3 + $0x68] sm:$0xff]  ;;  %vm591_vm0 = vcmask 1042432  }
   0xd   : > { %v3147_v1 = vld [vmem:[%s4148_s3 + $0xb8] sm:$0xff]  ;;  %3238 = vmatpush.bf16.msra.mxu1 %v3139_v0  ;;  %707 = vmatpush.bf16.msra.mxu0 %v3139_v0  ;;  %338 = vst [vmem:[#allocation2] sm:$0xf] %v3307_v3  ;;  %v3146_v4 = vld [vmem:[%s4148_s3 + $0xb0] sm:$0xff]  ;;  %s3122_s9 = sshll.u32 %s4162_s18, 5  ;;  %v3145_v7 = vld [vmem:[%s4148_s3 + $0xa8] sm:$0xff] }
   0xe   : > { %1065 = vmatpush.bf16.msra.mxu2 %v3147_v1  ;;  %v3155_v5 = vld [vmem:[%s4148_s3 + $0xf8] sm:$0xff]  ;;  %339 = vst [vmem:[#allocation2 + $0x4] sm:$0x3] %v3307_v3  ;;  %v3154_v8 = vld [vmem:[%s4148_s3 + $0xf0] sm:$0xff]  ;;  %s3391_s16 = scalar_lea.vmem %s4145_s0, %s3122_s9  ;;  %v3400_v13 = vld [vmem:[%s4146_s1] ss:$0 sm:$0xff]  ;;  %s4121_s15 = scalar_lea.vmem %s4149_s4, %s3122_s9 }
   0xf   : > { %343 = vst [vmem:[#allocation2] sm:$0x1] %v3307_v3  ;;  %1311 = vmatpush.bf16.msra.mxu3 %v3155_v5  ;;  %v3232_v9 = vld [vmem:[%s3391_s16 + $0x8] sm:$0xff]   ;;  %v3233_v10 = vld [vmem:[%s3391_s16 + $0x10] sm:$0xff]   ;;  %v3405_v14 = vld [vmem:[%s4147_s2] ss:$0 sm:$0xff] }
  0x10   : > { %353 = vst [vmem:[#allocation2 + $0x4] sm:$0x2] %v3307_v3  ;;  %v3203_v11 = vunpack.c.h.bf16 %v3232_v9  ;;  %v3206_v12 = vunpack.c.l.bf16 %v3233_v10  ;;  %v3207_v15 = vunpack.c.h.bf16 %v3233_v10  ;;  %v3153_v16 = vld [vmem:[%s4148_s3 + $0xe8] sm:$0xff]  ;;  %v3197_v19 = vld [vmem:[%s3391_s16] sm:$0xff]   ;;  %v3202_v23 = vunpack.c.l.bf16 %v3232_v9  ;;  %v3135_v34 = vld [vmem:[%s4148_s3 + $0x58] sm:$0xff]  ;;  %s2679_s9 = sshll.u32 %s4162_s18, 1 }
  0x11   : > { %3239 = vmatpush.bf16.msra.mxu1 %v3138_v2  ;;  %708 = vmatpush.bf16.msra.mxu0 %v3138_v2  ;;  %341 = vst [vmem:[#allocation2 + $0x48] sm:$0xf] %v3307_v3  ;;  %v3136_v20 = vld [vmem:[%s4148_s3 + $0x60] sm:$0xff]  ;;  %v3198_v21 = vunpack.c.l.bf16 %v3197_v19  ;;  %v3199_v22 = vunpack.c.h.bf16 %v3197_v19  ;;  %v3143_v38 = vld [vmem:[%s4148_s3 + $0x98] sm:$0xff]  ;;  %v3134_v42 = vld [vmem:[%s4148_s3 + $0x50] sm:$0xff]  ;;  %vm592_vm1 = vcmask 1046532   ;;  %s280_s23 = scalar_lea.vmem %s4150_s5, %s2679_s9 }
  0x12   : > { %1066 = vmatpush.bf16.msra.mxu2 %v3146_v4  ;;  %342 = vst [vmem:[#allocation2 + $0x4c] sm:$0x3] %v3307_v3  ;;  %v306_v17 = vmul.f32 %v3400_v13, %v3203_v11  ;;  %v307_v18 = vmul.f32 %v3400_v13, %v3206_v12  ;;  %v3144_v24 = vld [vmem:[%s4148_s3 + $0xa0] sm:$0xff]  ;;  %v308_v29 = vmul.f32 %v3400_v13, %v3207_v15  ;;  %v3151_v48 = vld [vmem:[%s4148_s3 + $0xd8] sm:$0xff]  ;;  %v3142_v51 = vld [vmem:[%s4148_s3 + $0x90] sm:$0xff] }
  0x13   : > { %344 = vst [vmem:[#allocation2 + $0x8] sm:$0x1] %v3307_v3  ;;  %1312 = vmatpush.bf16.msra.mxu3 %v3154_v8  ;;  %v303_v28 = vmul.f32 %v3400_v13, %v3198_v21  ;;  %v3152_v32 = vld [vmem:[%s4148_s3 + $0xe0] sm:$0xff]  ;;  %v304_v33 = vmul.f32 %v3400_v13, %v3199_v22  ;;  %v305_v37 = vmul.f32 %v3400_v13, %v3202_v23  ;;  %v3463_v54 = vld [vmem:[%s3391_s16 + $0x18] sm:$0xff]   ;;  %v3150_v4 = vld [vmem:[%s4148_s3 + $0xd0] sm:$0xff] }
  0x14   : > { %345 = vst [vmem:[#allocation2 + $0x10] sm:$0x1] %v3307_v3  ;;  %v317_v25 = vadd.f32 %v3405_v14, %v306_v17  ;;  %v318_v26 = vadd.f32 %v3405_v14, %v307_v18  ;;  %v3425_v27 = vld [vmem:[#allocation2] sm:$0xe]  ;;  %v319_v45 = vadd.f32 %v3405_v14, %v308_v29  ;;  %v3210_v59 = vunpack.c.l.bf16 %v3463_v54  ;;  %v3149_v17 = vld [vmem:[%s4148_s3 + $0xc8] sm:$0xff]  ;;  %vm3523_vm4 = vmor %vm591_vm0, %vm592_vm1 }
  0x15   : > { %3240 = vmatpush.bf16.msra.mxu1 %v3137_v6  ;;  %709 = vmatpush.bf16.msra.mxu0 %v3137_v6  ;;  %346 = vst [vmem:[#allocation2 + $0x18] sm:$0x1] %v3307_v3  ;;  %v314_v35 = vadd.f32 %v3405_v14, %v303_v28  ;;  %v841_v36 = vshrl.u32 %v3425_v27, 16  ;;  %v844_v41 = vshll.u32 %v3425_v27, 16  ;;  %v315_v50 = vadd.f32 %v3405_v14, %v304_v33  ;;  %v3466_v58 = vld [vmem:[#allocation2 + $0x4] sm:$0x1] }
  0x16   : > { %1067 = vmatpush.bf16.msra.mxu2 %v3145_v7  ;;  %347 = vst [vmem:[#allocation2 + $0x20] sm:$0x1] %v3307_v3  ;;  %v325_v30 = vmax.f32 %v317_v25, 0.0  ;;  %v326_v31 = vmax.f32 %v318_v26, 0.0  ;;  %v316_v55 = vadd.f32 %v3405_v14, %v305_v37  ;;  %v449_v61 = vshll.u32 %v3466_v58, 16  ;;  %v3133_v6 = vld [vmem:[%s4148_s3 + $0x48] sm:$0xff] }
  0x17   : > { %348 = vst [vmem:[#allocation2 + $0x28] sm:$0x1] %v3307_v3  ;;  %1313 = vmatpush.bf16.msra.mxu3 %v3153_v16  ;;  %v322_v43 = vmax.f32 %v314_v35, 0.0  ;;  %v843_v44 = vrot.slane %v841_v36, 5  ;;  %v846_v49 = vrot.slane %v844_v41, 6  ;;  %v327_v62 = vmax.f32 %v319_v45, 0.0 }
  0x18   : > { %349 = vst [vmem:[#allocation2 + $0x30] sm:$0x1] %v3307_v3  ;;  %v333_v39 = vpack.c.bf16 %v325_v30, %v325_v30  ;;  %v334_v40 = vpack.c.bf16 %v326_v31, %v326_v31  ;;  %v829_v53 = vld [vmem:[#allocation2 + $0x4] sm:$0x3]  ;;  %v323_v63 = vmax.f32 %v315_v50, 0.0  ;;  %v309_v5 = vmul.f32 %v3400_v13, %v3210_v59  ;;  %v3141_v7 = vld [vmem:[%s4148_s3 + $0x88] sm:$0xff] }
  0x19   : > { %3241 = vmatpush.bf16.msra.mxu1 %v3136_v20  ;;  %710 = vmatpush.bf16.msra.mxu0 %v3136_v20  ;;  %350 = vst [vmem:[#allocation2 + $0x38] sm:$0x1] %v3307_v3  ;;  %v330_v52 = vpack.c.bf16 %v322_v43, %v322_v43  ;;  %v847_v0 = vor.u32 %v846_v49, %v843_v44  ;;  %v850_v1 = vshrl.u32 %v829_v53, 16  ;;  %v853_v2 = vshll.u32 %v829_v53, 16  ;;  %v3132_v16 = vld [vmem:[%s4148_s3 + $0x40] sm:$0xff]  ;;  %v3131_v20 = vld [vmem:[%s4148_s3 + $0x38] sm:$0xff] }
  0x1a   : > { %1068 = vmatpush.bf16.msra.mxu2 %v3144_v24  ;;  %351 = vst [vmem:[#allocation2 + $0x40] sm:$0x1] %v3307_v3  ;;  %v377_v46 = vrot.slane %v333_v39, 7  ;;  %v379_v47 = vrot.slane %v334_v40, 7  ;;  %v3480_v9 = vpack.c.bf16 %v327_v62, %v327_v62  ;;  %v324_v10 = vmax.f32 %v316_v55, 0.0  ;;  %v3163_v26 = vld [vmem:[%s4148_s3 + $0x138] sm:$0xff] }
  0x1b   : > { %354 = vst [vmem:[#allocation2 + $0xc] sm:$0x2] %v3307_v3  ;;  %1314 = vmatpush.bf16.msra.mxu3 %v3152_v32  ;;  %v371_v60 = vrot.slane %v330_v52, 7  ;;  %v3482_v11 = vpack.c.bf16 %v323_v63, %v323_v63  ;;  %v2680_v12 = vrot.slane %v3425_v27, 9  ;;  %v596_v13 = vrot.slane %v3466_v58, 5  ;;  %v3179_v27 = vld [vmem:[%s4148_s3 + $0x1b8] sm:$0xff] }
  0x1c   : > { %355 = vst [vmem:[#allocation2 + $0x14] sm:$0x2] %v3307_v3  ;;  %v378_v56 = vrot.slane %v377_v46, 4  ;;  %v380_v57 = vrot.slane %v379_v47, 4  ;;  %vm837_vm2 = vsmask.f32 2304  ;;  %v320_v15 = vadd.f32 %v3405_v14, %v309_v5 }
  0x1d   : > { %3242 = vmatpush.bf16.msra.mxu1 %v3135_v34  ;;  %711 = vmatpush.bf16.msra.mxu0 %v3135_v34  ;;  %356 = vst [vmem:[#allocation2 + $0x1c] sm:$0x2] %v3307_v3  ;;  %v372_v8 = vrot.slane %v371_v60, 4  ;;  %vm838_vm3 = vsmask.f32 6416  ;;  %v381_v18 = vrot.slane %v3480_v9, 7  ;;  %v3494_v19 = vpack.c.bf16 %v324_v10, %v324_v10 }
  0x1e   : > { %1069 = vmatpush.bf16.msra.mxu2 %v3143_v38  ;;  %410 = vst [vmem:[#allocation2 + $0x20] sm:$0xe] %v377_v46  ;;  %v3140_v14 = vld [vmem:[%s4148_s3 + $0x80] sm:$0xff]  ;;  %v3503_v21 = vrot.slane %v847_v0, 4  ;;  %v3505_v22 = vrot.slane %v850_v1, 5  ;;  %v3507_v23 = vrot.slane %v853_v2, 6  ;;  %v3537_v37 = vsel %vm3523_vm4, %v2680_v12, %v596_v13  ;;  %vm3565_vm5 = vmor %vm837_vm2, %vm838_vm3 }
  0x1f   : > { %412 = vst [vmem:[#allocation2 + $0x28] sm:$0xe] %v379_v47  ;;  %1315 = vmatpush.bf16.msra.mxu3 %v3151_v48  ;;  %v328_v24 = vmax.f32 %v320_v15, 0.0  ;;  %v373_v28 = vrot.slane %v3482_v11, 7  ;;  %v382_v33 = vrot.slane %v381_v18, 4  ;;  %v3148_v34 = vld [vmem:[%s4148_s3 + $0xc0] sm:$0xff] }
  0x20   : > { %411 = vst [vmem:[#allocation2 + $0x24] sm:$0x1] %v378_v56  ;;  %v375_v38 = vrot.slane %v3494_v19, 7  ;;  %v3130_v41 = vld [vmem:[%s4148_s3 + $0x30] sm:$0xff]  ;;  %v856_v45 = vor.u32 %v3507_v23, %v3505_v22  ;;  %v3129_v62 = vld [vmem:[%s4148_s3 + $0x28] sm:$0xff]  ;;  %v3128_v11 = vld [vmem:[%s4148_s3 + $0x20] sm:$0xff] }
  0x21   : > { %3243 = vmatpush.bf16.msra.mxu1 %v3134_v42  ;;  %712 = vmatpush.bf16.msra.mxu0 %v3134_v42  ;;  %413 = vst [vmem:[#allocation2 + $0x2c] sm:$0x1] %v380_v57  ;;  %v336_v32 = vpack.c.bf16 %v328_v24, %v328_v24  ;;  %v374_v42 = vrot.slane %v373_v28, 4  ;;  %v3162_v46 = vld [vmem:[%s4148_s3 + $0x130] sm:$0xff]  ;;  %vm436_vm6 = vsmask.f32 3328 }
  0x22   : > { %1070 = vmatpush.bf16.msra.mxu2 %v3142_v51  ;;  %404 = vst [vmem:[#allocation2 + $0x8] sm:$0xe] %v371_v60  ;;  %v643_v51 = vunpack.c.l.b16 %v3537_v37  ;;  %v3178_v2 = vld [vmem:[%s4148_s3 + $0x1b0] sm:$0xff]  ;;  %v3585_v5 = vsel %vm3565_vm5, %v3503_v21, %v856_v45  ;;  %v3187_v24 = vld [vmem:[%s4148_s3 + $0x1f8] sm:$0xff]  ;;  %vm437_vm7 = vsmask.f32 7440 }
  0x23   : > { %405 = vst [vmem:[#allocation2 + $0xc] sm:$0x1] %v372_v8  ;;  %1316 = vmatpush.bf16.msra.mxu3 %v3150_v4  ;;  %v383_v47 = vrot.slane %v336_v32, 7  ;;  %vm3629_vm8 = vmor %vm436_vm6, %vm437_vm7 }
  0x24   : > { %357 = vst [vmem:[#allocation2 + $0x24] sm:$0x2] %v3307_v3 }
  0x25   : > { %3244 = vmatpush.bf16.msra.mxu1 %v3133_v6  ;;  %713 = vmatpush.bf16.msra.mxu0 %v3133_v6  ;;  %v3509_v25 = vld [vmem:[#allocation2 + $0x20] sm:$0xe]  ;;  %358 = vst [vmem:[#allocation2 + $0x2c] sm:$0x2] %v3307_v3  ;;  %v384_v8 = vrot.slane %v383_v47, 4 }
  0x26   : > { %v3519_v29 = vld [vmem:[#allocation2 + $0x28] sm:$0xe]  ;;  %v2684_v31 = vrot.slane %v3509_v25, 9  ;;  %1071 = vmatpush.bf16.msra.mxu2 %v3141_v7  ;;  %359 = vst [vmem:[#allocation2 + $0x34] sm:$0x2] %v3307_v3 }
  0x27   : > { %v3532_v35 = vld [vmem:[#allocation2 + $0x24] sm:$0x1]  ;;  %v2685_v36 = vrot.slane %v3519_v29, 9  ;;  %360 = vst [vmem:[#allocation2 + $0x3c] sm:$0x2] %v3307_v3  ;;  %1317 = vmatpush.bf16.msra.mxu3 %v3149_v17  ;;  %v3161_v7 = vld [vmem:[%s4148_s3 + $0x128] sm:$0xff] }
  0x28   : > { %v3541_v39 = vld [vmem:[#allocation2 + $0x2c] sm:$0x1]  ;;  %v612_v40 = vrot.slane %v3532_v35, 5  ;;  %361 = vst [vmem:[#allocation2 + $0x44] sm:$0x2] %v3307_v3 }
  0x29   : > { %3245 = vmatpush.bf16.msra.mxu1 %v3132_v16  ;;  %v616_v43 = vrot.slane %v3541_v39, 5  ;;  %714 = vmatpush.bf16.msra.mxu0 %v3132_v16  ;;  %v568_v44 = vld [vmem:[#allocation2 + $0x8] sm:$0xe]  ;;  %352 = vst [vmem:[#allocation2 + $0x48] sm:$0x1] %v3307_v3 }
  0x2a   : > { %v613_v48 = vsel %vm3523_vm4, %v2684_v31, %v612_v40  ;;  %1072 = vmatpush.bf16.msra.mxu2 %v3140_v14  ;;  %v3559_v49 = vld [vmem:[#allocation2 + $0xc] sm:$0x1]  ;;  %v2681_v50 = vrot.slane %v568_v44, 9  ;;  %362 = vst [vmem:[#allocation2 + $0x4c] sm:$0x2] %v3307_v3  ;;  %v859_v53 = vshrl.u32 %v568_v44, 16 }
  0x2b   : > { %v617_v55 = vsel %vm3523_vm4, %v2685_v36, %v616_v43  ;;  %v647_v56 = vunpack.c.l.b16 %v613_v48  ;;  %v600_v57 = vrot.slane %v3559_v49, 5  ;;  %v830_v59 = vld [vmem:[#allocation2 + $0xc] sm:$0x3]  ;;  %414 = vst [vmem:[#allocation2 + $0x30] sm:$0xe] %v381_v18  ;;  %v376_v3 = vrot.slane %v375_v38, 4  ;;  %1318 = vmatpush.bf16.msra.mxu3 %v3148_v34 }
  0x2c   : > { %v648_v60 = vunpack.c.l.b16 %v617_v55  ;;  %v861_v63 = vrot.slane %v859_v53, 5  ;;  %v862_v0 = vshll.u32 %v568_v44, 16  ;;  %v868_v1 = vshrl.u32 %v830_v59, 16  ;;  %415 = vst [vmem:[#allocation2 + $0x34] sm:$0x1] %v382_v33 }
  0x2d   : > { %800 = vmatpush.bf16.msrb.mxu1 %v3131_v20  ;;  %1485 = vmatpush.bf16.msrb.mxu0 %v3163_v26  ;;  %v601_v4 = vsel %vm3523_vm4, %v2681_v50, %v600_v57  ;;  %v871_v6 = vshll.u32 %v830_v59, 16  ;;  %416 = vst [vmem:[#allocation2 + $0x38] sm:$0xe] %v383_v47  ;;  %v1102_v9 = vld [vmem:[#allocation2 + $0x8] sm:$0xf]  ;;  %v463_v21 = vshll.u32 %v3559_v49, 16  ;;  %v1001_v36 = vunpack.c.l.b16 %v3585_v5 }
  0x2e   : > { %2002 = vmatpush.bf16.msrb.mxu2 %v3179_v27  ;;  %v653_v10 = vpack.c.b16 %v648_v60, %v647_v56  ;;  %v644_v12 = vunpack.c.l.b16 %v601_v4  ;;  %v864_v13 = vrot.slane %v862_v0, 6  ;;  %v870_v15 = vrot.slane %v868_v1, 5  ;;  %406 = vst [vmem:[#allocation2 + $0x10] sm:$0xe] %v373_v28  ;;  %v3592_v16 = vld [vmem:[#allocation2 + $0xc] sm:$0x1] }
  0x2f   : > { %v873_v17 = vrot.slane %v871_v6, 6  ;;  %417 = vst [vmem:[#allocation2 + $0x3c] sm:$0x1] %v384_v8  ;;  %v1119_v18 = vshrl.u32 %v1102_v9, 16  ;;  %v1122_v20 = vshll.u32 %v1102_v9, 16  ;;  %v1128_v14 = vshll.u32 %v3592_v16, 16  ;;  %2176 = vmatpush.bf16.msrb.mxu3 %v3187_v24 }
  0x30   : > { %725 = vmatmul.bf16.vlgmr.msra.gmra.mxu1 %v653_v10  ;;  %v651_v22 = vpack.c.b16 %v644_v12, %v643_v51  ;;  %v865_v23 = vor.u32 %v864_v13, %v861_v63  ;;  %407 = vst [vmem:[#allocation2 + $0x14] sm:$0x1] %v374_v42  ;;  %v3160_v27 = vld [vmem:[%s4148_s3 + $0x120] sm:$0xff]  ;;  %v3611_v34 = vrot.slane %v449_v61, 5  ;;  %v3127_v61 = vld [vmem:[%s4148_s3 + $0x18] sm:$0xff] }
  0x31   : > { %801 = vmatpush.bf16.msrb.mxu1 %v3130_v41  ;;  %1486 = vmatpush.bf16.msrb.mxu0 %v3162_v46  ;;  %v874_v26 = vor.u32 %v873_v17, %v870_v15  ;;  %408 = vst [vmem:[#allocation2 + $0x18] sm:$0xe] %v375_v38  ;;  %v1121_v28 = vrot.slane %v1119_v18, 4  ;;  %v1124_v31 = vrot.slane %v1122_v20, 5  ;;  %v1130_v40 = vrot.slane %v1128_v14, 5  ;;  %v3159_v4 = vld [vmem:[%s4148_s3 + $0x118] sm:$0xff] }
  0x32   : > { %2003 = vmatpush.bf16.msrb.mxu2 %v3178_v2  ;;  %715 = vmatmul.bf16.vlgmr.msra.gmra.mxu0 %v651_v22  ;;  %v866_v32 = vrot.slane %v865_v23, 4  ;;  %v3607_v33 = vld [vmem:[#allocation2 + $0x30] sm:$0xe]  ;;  %409 = vst [vmem:[#allocation2 + $0x1c] sm:$0x1] %v376_v3  ;;  %v3634_v46 = vrot.slane %v463_v21, 5 }
  0x33   : > { %v3614_v37 = vld [vmem:[#allocation2 + $0x34] sm:$0x1]  ;;  %v2686_v19 = vrot.slane %v3607_v33, 9  ;;  %v1125_v38 = vor.u32 %v1124_v31, %v1121_v28  ;;  %v3617_v41 = vld [vmem:[#allocation2] sm:$0xf]  ;;  %v3177_v3 = vld [vmem:[%s4148_s3 + $0x1a8] sm:$0xff] }
  0x34   : > { %v875_v42 = vsel %vm3565_vm5, %v866_v32, %v874_v26  ;;  %v3621_v43 = vld [vmem:[#allocation2 + $0x38] sm:$0xe]  ;;  %v620_v58 = vrot.slane %v3614_v37, 5  ;;  %v440_v45 = vshrl.u32 %v3617_v41, 16  ;;  %v3126_v14 = vld [vmem:[%s4148_s3 + $0x10] sm:$0xff] }
  0x35   : > { %802 = vmatpush.bf16.msrb.mxu1 %v3129_v62  ;;  %1487 = vmatpush.bf16.msrb.mxu0 %v3161_v7  ;;  %v1002_v47 = vunpack.c.l.b16 %v875_v42  ;;  %v2687_v48 = vrot.slane %v3621_v43, 9  ;;  %v569_v49 = vld [vmem:[#allocation2 + $0x10] sm:$0xe]  ;;  %v1126_v51 = vrot.slane %v1125_v38, 4 }
  0x36   : > { %v1104_v50 = vld [vmem:[#allocation2 + $0x10] sm:$0xf]  ;;  %v3637_v53 = vld [vmem:[#allocation2 + $0x3c] sm:$0x1]  ;;  %v621_v55 = vsel %vm3523_vm4, %v2686_v19, %v620_v58  ;;  %v2682_v56 = vrot.slane %v569_v49, 9  ;;  %2004 = vmatpush.bf16.msrb.mxu2 %v3177_v3  ;;  %v877_v18 = vshrl.u32 %v569_v49, 16 }
  0x37   : > { %v1133_v57 = vshrl.u32 %v1104_v50, 16  ;;  %v1136_v59 = vshll.u32 %v1104_v50, 16  ;;  %v1009_v60 = vpack.c.b16 %v1002_v47, %v1001_v36  ;;  %v624_v62 = vrot.slane %v3637_v53, 5  ;;  %v3645_v0 = vld [vmem:[#allocation2 + $0x14] sm:$0x1] }
  0x38   : > { %v649_v63 = vunpack.c.l.b16 %v621_v55  ;;  %v3647_v1 = vld [vmem:[#allocation2 + $0x14] sm:$0x1]  ;;  %v1131_v2 = vsel %vm3629_vm8, %v1126_v51, %v1130_v40  ;;  %v570_v5 = vld [vmem:[#allocation2 + $0x18] sm:$0xe]  ;;  %v604_v6 = vrot.slane %v3645_v0, 5  ;;  %v879_v28 = vrot.slane %v877_v18, 5 }
  0x39   : > { %803 = vmatpush.bf16.msrb.mxu1 %v3128_v11  ;;  %1488 = vmatpush.bf16.msrb.mxu0 %v3160_v27  ;;  %v1135_v7 = vrot.slane %v1133_v57, 4  ;;  %v1138_v8 = vrot.slane %v1136_v59, 5  ;;  %v1142_v9 = vshll.u32 %v3647_v1, 16  ;;  %v625_v10 = vsel %vm3523_vm4, %v2687_v48, %v624_v62  ;;  %v3658_v12 = vld [vmem:[#allocation2 + $0x1c] sm:$0x1]  ;;  %v3186_v11 = vld [vmem:[%s4148_s3 + $0x1f0] sm:$0xff] }
  0x3a   : > { %1073 = vmatmul.bf16.vlgmr.msra.gmra.mxu2 %v1009_v60  ;;  %v2683_v13 = vrot.slane %v570_v5, 9  ;;  %v1247_v15 = vunpack.c.l.b16 %v1131_v2  ;;  %v831_v17 = vld [vmem:[#allocation2 + $0x14] sm:$0x3]  ;;  %v650_v20 = vunpack.c.l.b16 %v625_v10  ;;  %v605_v21 = vsel %vm3523_vm4, %v2682_v56, %v604_v6  ;;  %v832_v27 = vld [vmem:[#allocation2 + $0x1c] sm:$0x3]  ;;  %2177 = vmatpush.bf16.msrb.mxu3 %v3186_v11  ;;  %v3157_v60 = vld [vmem:[%s4148_s3 + $0x108] sm:$0xff] }
  0x3b   : > { %v608_v22 = vrot.slane %v3658_v12, 5  ;;  %v1139_v23 = vor.u32 %v1138_v8, %v1135_v7  ;;  %v645_v24 = vunpack.c.l.b16 %v605_v21  ;;  %v1144_v26 = vrot.slane %v1142_v9, 5  ;;  %v3158_v32 = vld [vmem:[%s4148_s3 + $0x110] sm:$0xff]  ;;  %v422_v62 = vld [vmem:[#allocation2 + $0x8] sm:$0xf] }
  0x3c   : > { %v880_v31 = vshll.u32 %v569_v49, 16  ;;  %v654_v36 = vpack.c.b16 %v650_v20, %v649_v63  ;;  %v886_v40 = vshrl.u32 %v831_v17, 16  ;;  %v895_v47 = vshrl.u32 %v570_v5, 16  ;;  %v3125_v49 = vld [vmem:[%s4148_s3 + $0x8] sm:$0xff]  ;;  %v1106_v63 = vld [vmem:[#allocation2 + $0x18] sm:$0xf] }
  0x3d   : > { %804 = vmatpush.bf16.msrb.mxu1 %v3127_v61  ;;  %1489 = vmatpush.bf16.msrb.mxu0 %v3159_v4  ;;  %v609_v19 = vsel %vm3523_vm4, %v2683_v13, %v608_v22  ;;  %v1140_v38 = vrot.slane %v1139_v23, 4  ;;  %v889_v61 = vshll.u32 %v831_v17, 16  ;;  %v898_v51 = vshll.u32 %v570_v5, 16  ;;  %v3176_v5 = vld [vmem:[%s4148_s3 + $0x1a0] sm:$0xff]  ;;  %v3185_v18 = vld [vmem:[%s4148_s3 + $0x1e8] sm:$0xff]  ;;  %v3171_v22 = vld [vmem:[%s4148_s3 + $0x178] sm:$0xff] }
  0x3e   : > { %v646_v42 = vunpack.c.l.b16 %v609_v19  ;;  %v882_v58 = vrot.slane %v880_v31, 6  ;;  %v888_v50 = vrot.slane %v886_v40, 5  ;;  %v904_v55 = vshrl.u32 %v832_v27, 16  ;;  %v3124_v13 = vld [vmem:[%s4148_s3] sm:$0xff]  ;;  %v3697_v23 = vld [vmem:[#allocation2 + $0x1c] sm:$0x1]  ;;  %2005 = vmatpush.bf16.msrb.mxu2 %v3176_v5  ;;  %2178 = vmatpush.bf16.msrb.mxu3 %v3185_v18 }
  0x3f   : > { %v1145_v48 = vsel %vm3629_vm8, %v1140_v38, %v1144_v26  ;;  %v891_v3 = vrot.slane %v889_v61, 6  ;;  %v897_v2 = vrot.slane %v895_v47, 5  ;;  %v900_v4 = vrot.slane %v898_v51, 6  ;;  %v1108_v26 = vld [vmem:[#allocation2 + $0x20] sm:$0xf]  ;;  %v3175_v61 = vld [vmem:[%s4148_s3 + $0x198] sm:$0xff] }
  0x40   : > { %v652_v56 = vpack.c.b16 %v646_v42, %v645_v24  ;;  %v1248_v57 = vunpack.c.l.b16 %v1145_v48  ;;  %v883_v59 = vor.u32 %v882_v58, %v879_v28  ;;  %730 = vmatmul.bf16.gmra.mxu1 %v654_v36  ;;  %v906_v6 = vrot.slane %v904_v55, 5  ;;  %v3156_v24 = vld [vmem:[%s4148_s3 + $0x100] sm:$0xff]  ;;  %v3715_v51 = vld [vmem:[%s4148_s3 + $0x238] sm:$0xff] }
  0x41   : > { %805 = vmatpush.bf16.msrb.mxu1 %v3126_v14  ;;  %1490 = vmatpush.bf16.msrb.mxu0 %v3158_v32  ;;  %v907_v7 = vshll.u32 %v832_v27, 16  ;;  %v892_v10 = vor.u32 %v891_v3, %v888_v50  ;;  %v442_v17 = vrot.slane %v440_v45, 4  ;;  %v901_v20 = vor.u32 %v900_v4, %v897_v2  ;;  %v3704_v19 = vld [vmem:[#allocation2 + $0x24] sm:$0x1]  ;;  %v1348_v3 = vld [vmem:[#allocation2 + $0x8] sm:$0xe] }
  0x42   : > { %v1255_v8 = vpack.c.b16 %v1248_v57, %v1247_v15  ;;  %v884_v9 = vrot.slane %v883_v59, 4  ;;  %720 = vmatmul.bf16.gmra.mxu0 %v652_v56  ;;  %v443_v21 = vshll.u32 %v3617_v41, 16  ;;  %v454_v15 = vshrl.u32 %v422_v62, 16  ;;  %2006 = vmatpush.bf16.msrb.mxu2 %v3175_v61 }
  0x43   : > { %v909_v14 = vrot.slane %v907_v7, 6  ;;  %v457_v11 = vshll.u32 %v422_v62, 16  ;;  %v1147_v27 = vshrl.u32 %v1106_v63, 16  ;;  %v1150_v41 = vshll.u32 %v1106_v63, 16 }
  0x44   : > { %1319 = vmatmul.bf16.vlgmr.msra.gmra.mxu3 %v1255_v8  ;;  %v893_v45 = vsel %vm3565_vm5, %v884_v9, %v892_v10  ;;  %v902_v28 = vrot.slane %v901_v20, 4  ;;  %v445_v36 = vrot.slane %v443_v21, 5  ;;  %v456_v38 = vrot.slane %v454_v15, 4  ;;  %v1349_v9 = vld [vmem:[#allocation2 + $0x10] sm:$0xe]  ;;  %v3184_v20 = vld [vmem:[%s4148_s3 + $0x1e0] sm:$0xff] }
  0x45   : > { %806 = vmatpush.bf16.msrb.mxu1 %v3125_v49  ;;  %1491 = vmatpush.bf16.msrb.mxu0 %v3157_v60  ;;  %v910_v31 = vor.u32 %v909_v14, %v906_v6  ;;  %v1003_v32 = vunpack.c.l.b16 %v893_v45  ;;  %v459_v40 = vrot.slane %v457_v11, 5  ;;  %v1149_v42 = vrot.slane %v1147_v27, 4  ;;  %v3170_v60 = vld [vmem:[%s4148_s3 + $0x170] sm:$0xff] }
  0x46   : > { %v1152_v58 = vrot.slane %v1150_v41, 5  ;;  %v446_v48 = vor.u32 %v445_v36, %v442_v17  ;;  %v1156_v49 = vshll.u32 %v3697_v23, 16  ;;  %v1161_v50 = vshrl.u32 %v1108_v26, 16  ;;  %2179 = vmatpush.bf16.msrb.mxu3 %v3184_v20  ;;  %v3765_v20 = vld [vmem:[%s4148_s3 + $0x230] sm:$0xff] }
  0x47   : > { %v911_v47 = vsel %vm3565_vm5, %v902_v28, %v910_v31  ;;  %v460_v56 = vor.u32 %v459_v40, %v456_v38  ;;  %v1164_v59 = vshll.u32 %v1108_v26, 16  ;;  %v1170_v4 = vshll.u32 %v3704_v19, 16  ;;  %v833_v38 = vld [vmem:[#allocation2 + $0x24] sm:$0x3] }
  0x48   : > { %v1004_v55 = vunpack.c.l.b16 %v911_v47  ;;  %v1153_v57 = vor.u32 %v1152_v58, %v1149_v42  ;;  %v447_v62 = vrot.slane %v446_v48, 4  ;;  %v1158_v63 = vrot.slane %v1156_v49, 5 }
  0x49   : > { %807 = vmatpush.bf16.msrb.mxu1 %v3124_v13  ;;  %1492 = vmatpush.bf16.msrb.mxu0 %v3156_v24  ;;  %v1163_v2 = vrot.slane %v1161_v50, 4  ;;  %v461_v7 = vrot.slane %v460_v56, 4  ;;  %v1166_v8 = vrot.slane %v1164_v59, 5  ;;  %v1172_v13 = vrot.slane %v1170_v4, 5  ;;  %v834_v50 = vld [vmem:[#allocation2 + $0x2c] sm:$0x3] }
  0x4a   : > { %v1010_v6 = vpack.c.b16 %v1004_v55, %v1003_v32  ;;  %v1154_v5 = vrot.slane %v1153_v57, 4  ;;  %v452_v10 = vsel %vm3629_vm8, %v447_v62, %v3611_v34  ;;  %v2864_v17 = vrot.slane %v1348_v3, 9  ;;  %v3169_v34 = vld [vmem:[%s4148_s3 + $0x168] sm:$0xff]  ;;  %v426_v4 = vld [vmem:[#allocation2 + $0x18] sm:$0xf] }
  0x4b   : > { %v1374_v18 = vrot.slane %v3592_v16, 5  ;;  %v466_v14 = vsel %vm3629_vm8, %v461_v7, %v3634_v46  ;;  %v736_v21 = vunpack.c.l.b16 %v452_v10  ;;  %v2865_v24 = vrot.slane %v1349_v9, 9 }
  0x4c   : > { %1078 = vmatmul.bf16.gmra.mxu2 %v1010_v6  ;;  %v1159_v15 = vsel %vm3629_vm8, %v1154_v5, %v1158_v63  ;;  %v737_v16 = vunpack.c.l.b16 %v466_v14  ;;  %v1378_v46 = vrot.slane %v3647_v1, 5  ;;  %v1531_v41 = vshrl.u32 %v1348_v3, 16 }
  0x4d   : > { %1755 = vmatpush.bf16.msra.mxu1 %v3171_v22  ;;  %2446 = vmatpush.bf16.msra.mxu0 %v3715_v51  ;;  %v1167_v22 = vor.u32 %v1166_v8, %v1163_v2  ;;  %v1249_v45 = vunpack.c.l.b16 %v1159_v15  ;;  %v1375_v11 = vsel %vm3523_vm4, %v2864_v17, %v1374_v18  ;;  %v1534_v31 = vshll.u32 %v1348_v3, 16  ;;  %v424_v3 = vld [vmem:[#allocation2 + $0x10] sm:$0xf] }
  0x4e   : > { %v1421_v27 = vunpack.c.l.b16 %v1375_v11  ;;  %v744_v28 = vpack.c.b16 %v737_v16, %v736_v21  ;;  %v1549_v32 = vshrl.u32 %v1349_v9, 16  ;;  %v1552_v36 = vshll.u32 %v1349_v9, 16  ;;  %v3168_v9 = vld [vmem:[%s4148_s3 + $0x160] sm:$0xff] }
  0x4f   : > { %v1168_v26 = vrot.slane %v1167_v22, 4  ;;  %v1379_v42 = vsel %vm3523_vm4, %v2865_v24, %v1378_v46  ;;  %v3744_v58 = vrot.slane %v1531_v41, 5  ;;  %v913_v61 = vshrl.u32 %v3509_v25, 16  ;;  %v1110_v24 = vld [vmem:[#allocation2 + $0x28] sm:$0xf] }
  0x50   : > { %808 = vmatmul.bf16.vlgmr.msrb.gmra.mxu1 %v744_v28  ;;  %v1422_v47 = vunpack.c.l.b16 %v1379_v42  ;;  %v3747_v48 = vrot.slane %v1534_v31, 6  ;;  %v3749_v49 = vrot.slane %v1549_v32, 5  ;;  %v3751_v55 = vrot.slane %v1552_v36, 6  ;;  %v3772_v28 = vld [vmem:[#allocation2 + $0x2c] sm:$0x1] }
  0x51   : > { %1756 = vmatpush.bf16.msra.mxu1 %v3170_v60  ;;  %v1173_v40 = vsel %vm3629_vm8, %v1168_v26, %v1172_v13  ;;  %v915_v56 = vrot.slane %v913_v61, 5  ;;  %v916_v57 = vshll.u32 %v3509_v25, 16  ;;  %v922_v59 = vshrl.u32 %v833_v38, 16  ;;  %v3174_v25 = vld [vmem:[%s4148_s3 + $0x190] sm:$0xff]  ;;  %2447 = vmatpush.bf16.msra.mxu0 %v3765_v20  ;;  %v3784_v42 = vld [vmem:[%s4148_s3 + $0x228] sm:$0xff] }
  0x52   : > { %v1250_v1 = vunpack.c.l.b16 %v1173_v40  ;;  %v1429_v62 = vpack.c.b16 %v1422_v47, %v1421_v27  ;;  %v925_v63 = vshll.u32 %v833_v38, 16  ;;  %v931_v2 = vshrl.u32 %v3519_v29, 16  ;;  %2007 = vmatpush.bf16.msrb.mxu2 %v3174_v25  ;;  %v3167_v40 = vld [vmem:[%s4148_s3 + $0x158] sm:$0xff] }
  0x53   : > { %v918_v6 = vrot.slane %v916_v57, 6  ;;  %v924_v7 = vrot.slane %v922_v59, 5  ;;  %v934_v5 = vshll.u32 %v3519_v29, 16  ;;  %v940_v8 = vshrl.u32 %v834_v50, 16  ;;  %v3183_v29 = vld [vmem:[%s4148_s3 + $0x1d8] sm:$0xff] }
  0x54   : > { %v1256_v60 = vpack.c.b16 %v1250_v1, %v1249_v45  ;;  %1493 = vmatmul.bf16.vlgmr.msrb.gmra.mxu0 %v1429_v62  ;;  %v927_v10 = vrot.slane %v925_v63, 6  ;;  %v933_v13 = vrot.slane %v931_v2, 5  ;;  %v943_v17 = vshll.u32 %v834_v50, 16  ;;  %2180 = vmatpush.bf16.msrb.mxu3 %v3183_v29  ;;  %v3797_v25 = vld [vmem:[#allocation2 + $0x18] sm:$0xe] }
  0x55   : > { %1757 = vmatpush.bf16.msra.mxu1 %v3169_v34  ;;  %v468_v18 = vshrl.u32 %v424_v3, 16  ;;  %v919_v14 = vor.u32 %v918_v6, %v915_v56  ;;  %v936_v21 = vrot.slane %v934_v5, 6  ;;  %v942_v15 = vrot.slane %v940_v8, 5  ;;  %2448 = vmatpush.bf16.msra.mxu0 %v3784_v42  ;;  %v3795_v5 = vld [vmem:[#allocation2 + $0x34] sm:$0x1] }
  0x56   : > { %1324 = vmatmul.bf16.gmra.mxu3 %v1256_v60  ;;  %v471_v22 = vshll.u32 %v424_v3, 16  ;;  %v928_v34 = vor.u32 %v927_v10, %v924_v7  ;;  %v945_v16 = vrot.slane %v943_v17, 6  ;;  %v477_v11 = vshll.u32 %v3645_v0, 16  ;;  %v3173_v0 = vld [vmem:[%s4148_s3 + $0x188] sm:$0xff]  ;;  %v3172_v60 = vld [vmem:[%s4148_s3 + $0x180] sm:$0xff] }
  0x57   : > { %v470_v45 = vrot.slane %v468_v18, 4  ;;  %v920_v26 = vrot.slane %v919_v14, 4  ;;  %v937_v46 = vor.u32 %v936_v21, %v933_v13  ;;  %v482_v41 = vshrl.u32 %v426_v4, 16  ;;  %2008 = vmatpush.bf16.msrb.mxu2 %v3173_v0  ;;  %v3801_v29 = vld [vmem:[#allocation2 + $0x20] sm:$0xe] }
  0x58   : > { %v473_v27 = vrot.slane %v471_v22, 5  ;;  %v946_v31 = vor.u32 %v945_v16, %v942_v15  ;;  %v479_v32 = vrot.slane %v477_v11, 5  ;;  %v485_v36 = vshll.u32 %v426_v4, 16 }
  0x59   : > { %1758 = vmatpush.bf16.msra.mxu1 %v3168_v9  ;;  %v491_v38 = vshll.u32 %v3658_v12, 16  ;;  %v929_v61 = vsel %vm3565_vm5, %v920_v26, %v928_v34  ;;  %v938_v1 = vrot.slane %v937_v46, 4  ;;  %v484_v50 = vrot.slane %v482_v41, 4  ;;  %v1112_v12 = vld [vmem:[#allocation2 + $0x30] sm:$0xf] }
  0x5a   : > { %v474_v47 = vor.u32 %v473_v27, %v470_v45  ;;  %v1005_v56 = vunpack.c.l.b16 %v929_v61  ;;  %v487_v57 = vrot.slane %v485_v36, 5  ;;  %v1175_v3 = vshrl.u32 %v1110_v24, 16 }
  0x5b   : > { %v493_v59 = vrot.slane %v491_v38, 5  ;;  %v947_v62 = vsel %vm3565_vm5, %v938_v1, %v946_v31  ;;  %v1178_v2 = vshll.u32 %v1110_v24, 16  ;;  %v1184_v4 = vshll.u32 %v3772_v28, 16  ;;  %2009 = vmatpush.bf16.msrb.mxu2 %v3172_v60 }
  0x5c   : > { %v475_v63 = vrot.slane %v474_v47, 4  ;;  %v1006_v6 = vunpack.c.l.b16 %v947_v62  ;;  %v488_v7 = vor.u32 %v487_v57, %v484_v50  ;;  %v1177_v8 = vrot.slane %v1175_v3, 4 }
  0x5d   : > { %1759 = vmatpush.bf16.msra.mxu1 %v3167_v40  ;;  %v1189_v9 = vshrl.u32 %v1112_v12, 16  ;;  %v1180_v13 = vrot.slane %v1178_v2, 5  ;;  %v1186_v17 = vrot.slane %v1184_v4, 5  ;;  %v1192_v18 = vshll.u32 %v1112_v12, 16  ;;  %v835_v40 = vld [vmem:[#allocation2 + $0x34] sm:$0x3] }
  0x5e   : > { %v480_v10 = vsel %vm3629_vm8, %v475_v63, %v479_v32  ;;  %v1011_v14 = vpack.c.b16 %v1006_v6, %v1005_v56  ;;  %v489_v21 = vrot.slane %v488_v7, 4  ;;  %v1198_v45 = vshll.u32 %v3795_v5, 16  ;;  %v836_v56 = vld [vmem:[#allocation2 + $0x3c] sm:$0x3]  ;;  %v428_v7 = vld [vmem:[#allocation2 + $0x20] sm:$0xf] }
  0x5f   : > { %v738_v15 = vunpack.c.l.b16 %v480_v10  ;;  %v1191_v22 = vrot.slane %v1189_v9, 4  ;;  %v1181_v34 = vor.u32 %v1180_v13, %v1177_v8  ;;  %v1194_v16 = vrot.slane %v1192_v18, 5  ;;  %3246 = vmatpush.bf16.msra.mxu2 %v3715_v51  ;;  %v430_v13 = vld [vmem:[#allocation2 + $0x28] sm:$0xf] }
  0x60   : > { %v2866_v11 = vrot.slane %v3797_v25, 9  ;;  %1083 = vmatmul.bf16.gmra.mxu2 %v1011_v14  ;;  %v494_v24 = vsel %vm3629_vm8, %v489_v21, %v493_v59  ;;  %v1382_v26 = vrot.slane %v3697_v23, 5  ;;  %v2867_v46 = vrot.slane %v3801_v29, 9 }
  0x61   : > { %v1386_v27 = vrot.slane %v3704_v19, 5  ;;  %v739_v41 = vunpack.c.l.b16 %v494_v24  ;;  %v1182_v31 = vrot.slane %v1181_v34, 4  ;;  %v1195_v32 = vor.u32 %v1194_v16, %v1191_v22 }
  0x62   : > { %v1200_v36 = vrot.slane %v1198_v45, 5  ;;  %v1383_v38 = vsel %vm3523_vm4, %v2866_v11, %v1382_v26  ;;  %v949_v0 = vshrl.u32 %v3607_v33, 16  ;;  %v952_v61 = vshll.u32 %v3607_v33, 16 }
  0x63   : > { %v1387_v51 = vsel %vm3523_vm4, %v2867_v46, %v1386_v27  ;;  %v745_v23 = vpack.c.b16 %v739_v41, %v738_v15  ;;  %v1187_v1 = vsel %vm3629_vm8, %v1182_v31, %v1186_v17  ;;  %v1196_v19 = vrot.slane %v1195_v32, 4  ;;  %3247 = vmatpush.bf16.msra.mxu2 %v3765_v20  ;;  %v1114_v41 = vld [vmem:[#allocation2 + $0x38] sm:$0xf] }
  0x64   : > { %v1423_v47 = vunpack.c.l.b16 %v1383_v38  ;;  %v1251_v50 = vunpack.c.l.b16 %v1187_v1  ;;  %v1424_v12 = vunpack.c.l.b16 %v1387_v51  ;;  %v951_v57 = vrot.slane %v949_v0, 5 }
  0x65   : > { %v954_v59 = vrot.slane %v952_v61, 6  ;;  %813 = vmatmul.bf16.gmra.mxu1 %v745_v23  ;;  %v1201_v3 = vsel %vm3629_vm8, %v1196_v19, %v1200_v36  ;;  %v958_v60 = vshrl.u32 %v835_v40, 16  ;;  %v961_v62 = vshll.u32 %v835_v40, 16  ;;  %v3829_v23 = vld [vmem:[#allocation2 + $0x3c] sm:$0x1] }
  0x66   : > { %v967_v33 = vshrl.u32 %v3621_v43, 16  ;;  %v1252_v63 = vunpack.c.l.b16 %v1201_v3  ;;  %v1430_v2 = vpack.c.b16 %v1424_v12, %v1423_v47  ;;  %v970_v6 = vshll.u32 %v3621_v43, 16  ;;  %v3182_v3 = vld [vmem:[%s4148_s3 + $0x1d0] sm:$0xff] }
  0x67   : > { %v955_v4 = vor.u32 %v954_v59, %v951_v57  ;;  %v960_v20 = vrot.slane %v958_v60, 5  ;;  %v963_v8 = vrot.slane %v961_v62, 6  ;;  %v976_v10 = vshrl.u32 %v836_v56, 16  ;;  %3248 = vmatpush.bf16.msra.mxu2 %v3784_v42  ;;  %v3281_v60 = vld [vmem:[%s4146_s1] ss:$0 sm:$0xff]  ;;  %2181 = vmatpush.bf16.msrb.mxu3 %v3182_v3 }
  0x68   : > { %v969_v9 = vrot.slane %v967_v33, 5  ;;  %v1257_v17 = vpack.c.b16 %v1252_v63, %v1251_v50  ;;  %1498 = vmatmul.bf16.gmra.mxu0 %v1430_v2  ;;  %v972_v14 = vrot.slane %v970_v6, 6  ;;  %v979_v21 = vshll.u32 %v836_v56, 16  ;;  %v3834_v50 = vld [vmem:[#allocation2 + $0x28] sm:$0xe] }
  0x69   : > { %v956_v18 = vrot.slane %v955_v4, 4  ;;  %v964_v15 = vor.u32 %v963_v8, %v960_v20  ;;  %v978_v22 = vrot.slane %v976_v10, 5  ;;  %v496_v34 = vshrl.u32 %v428_v7, 16  ;;  %v3849_v4 = vld [vmem:[#allocation2 + $0x30] sm:$0xe]  ;;  %v3181_v10 = vld [vmem:[%s4148_s3 + $0x1c8] sm:$0xff] }
  0x6a   : > { %v499_v16 = vshll.u32 %v428_v7, 16  ;;  %1329 = vmatmul.bf16.gmra.mxu3 %v1257_v17  ;;  %v973_v45 = vor.u32 %v972_v14, %v969_v9  ;;  %v981_v43 = vrot.slane %v979_v21, 6  ;;  %v505_v11 = vshll.u32 %v3532_v35, 16  ;;  %v1793_v9 = vld [vmem:[#allocation2 + $0x10] sm:$0xf] }
  0x6b   : > { %v510_v24 = vshrl.u32 %v430_v13, 16  ;;  %v965_v26 = vsel %vm3565_vm5, %v956_v18, %v964_v15  ;;  %v498_v46 = vrot.slane %v496_v34, 4  ;;  %v513_v27 = vshll.u32 %v430_v13, 16  ;;  %v3165_v13 = vld [vmem:[%s4148_s3 + $0x148] sm:$0xff]  ;;  %v3282_v18 = vld [vmem:[%s4147_s2] ss:$0 sm:$0xff]  ;;  %2182 = vmatpush.bf16.msrb.mxu3 %v3181_v10 }
  0x6c   : > { %v501_v42 = vrot.slane %v499_v16, 5  ;;  %v974_v31 = vrot.slane %v973_v45, 4  ;;  %v982_v32 = vor.u32 %v981_v43, %v978_v22  ;;  %v1007_v36 = vunpack.c.l.b16 %v965_v26  ;;  %v3863_v22 = vld [vmem:[#allocation2 + $0x14] sm:$0x1]  ;;  %v3191_v34 = vld [vmem:[%s4148_s3 + $0x218] sm:$0xff] }
  0x6d   : > { %v507_v38 = vrot.slane %v505_v11, 5  ;;  %v512_v40 = vrot.slane %v510_v24, 4  ;;  %v515_v0 = vrot.slane %v513_v27, 5  ;;  %v519_v61 = vshll.u32 %v3541_v39, 16  ;;  %v3166_v39 = vld [vmem:[%s4148_s3 + $0x150] sm:$0xff] }
  0x6e   : > { %v502_v51 = vor.u32 %v501_v42, %v498_v46  ;;  %v983_v35 = vsel %vm3565_vm5, %v974_v31, %v982_v32  ;;  %v3211_v1 = vunpack.c.h.bf16 %v3463_v54  ;;  %v1203_v19 = vshrl.u32 %v1114_v41, 16  ;;  %v3192_v54 = vld [vmem:[%s4148_s3 + $0x220] sm:$0xff]  ;;  %1760 = vmatpush.bf16.msra.mxu1 %v3166_v39  ;;  %v1795_v31 = vld [vmem:[#allocation2 + $0x18] sm:$0xf] }
  0x6f   : > { %v1206_v47 = vshll.u32 %v1114_v41, 16  ;;  %v1008_v12 = vunpack.c.l.b16 %v983_v35  ;;  %v516_v57 = vor.u32 %v515_v0, %v512_v40  ;;  %v521_v59 = vrot.slane %v519_v61, 5  ;;  %2449 = vmatpush.bf16.msra.mxu0 %v3192_v54  ;;  %3249 = vmatpush.bf16.msra.mxu2 %v3192_v54  ;;  %v3883_v0 = vld [vmem:[#allocation2 + $0x1c] sm:$0x1]  ;;  %v432_v61 = vld [vmem:[#allocation2 + $0x30] sm:$0xf] }
  0x70   : > { %v503_v56 = vrot.slane %v502_v51, 4  ;;  %v310_v62 = vmul.f32 %v3281_v60, %v3211_v1  ;;  %v1205_v33 = vrot.slane %v1203_v19, 4  ;;  %v1212_v2 = vshll.u32 %v3829_v23, 16  ;;  %v434_v60 = vld [vmem:[#allocation2 + $0x38] sm:$0xf] }
  0x71   : > { %v1208_v63 = vrot.slane %v1206_v47, 5  ;;  %v1012_v6 = vpack.c.b16 %v1008_v12, %v1007_v36  ;;  %v517_v20 = vrot.slane %v516_v57, 4  ;;  %v2868_v8 = vrot.slane %v3834_v50, 9 }
  0x72   : > { %v508_v7 = vsel %vm3629_vm8, %v503_v56, %v507_v38  ;;  %v321_v14 = vadd.f32 %v3282_v18, %v310_v62  ;;  %v1214_v15 = vrot.slane %v1212_v2, 5  ;;  %v1390_v45 = vrot.slane %v3772_v28, 5  ;;  %1761 = vmatpush.bf16.msra.mxu1 %v3165_v13  ;;  %v3180_v28 = vld [vmem:[%s4148_s3 + $0x1c0] sm:$0xff]  ;;  %v3891_v13 = vld [vmem:[#allocation2 + $0x10] sm:$0xe] }
  0x73   : > { %v740_v17 = vunpack.c.l.b16 %v508_v7  ;;  %v1209_v21 = vor.u32 %v1208_v63, %v1205_v33  ;;  %1088 = vmatmul.bf16.gmra.mxu2 %v1012_v6  ;;  %v522_v16 = vsel %vm3629_vm8, %v517_v20, %v521_v59  ;;  %v2869_v43 = vrot.slane %v3849_v4, 9  ;;  %2450 = vmatpush.bf16.msra.mxu0 %v3191_v34  ;;  %v3888_v33 = vld [vmem:[#allocation2 + $0x38] sm:$0xe] }
  0x74   : > { %v1394_v11 = vrot.slane %v3795_v5, 5  ;;  %v741_v24 = vunpack.c.l.b16 %v522_v16  ;;  %v329_v26 = vmax.f32 %v321_v14, 0.0  ;;  %v1810_v42 = vshrl.u32 %v1793_v9, 16  ;;  %3250 = vmatpush.bf16.msra.mxu2 %v3191_v34  ;;  %2183 = vmatpush.bf16.msrb.mxu3 %v3180_v28 }
  0x75   : > { %v1210_v46 = vrot.slane %v1209_v21, 4  ;;  %v1391_v27 = vsel %vm3523_vm4, %v2868_v8, %v1390_v45  ;;  %v1813_v32 = vshll.u32 %v1793_v9, 16  ;;  %v1819_v36 = vshll.u32 %v3863_v22, 16 }
  0x76   : > { %v1395_v41 = vsel %vm3523_vm4, %v2869_v43, %v1394_v11  ;;  %v746_v5 = vpack.c.b16 %v741_v24, %v740_v17  ;;  %v337_v38 = vpack.c.bf16 %v329_v26, %v329_v26  ;;  %v1425_v40 = vunpack.c.l.b16 %v1391_v27  ;;  %v3897_v43 = vld [vmem:[#allocation2 + $0x18] sm:$0xe] }
  0x77   : > { %v1215_v51 = vsel %vm3629_vm8, %v1210_v46, %v1214_v15  ;;  %v1426_v1 = vunpack.c.l.b16 %v1395_v41  ;;  %v1812_v19 = vrot.slane %v1810_v42, 4  ;;  %v1815_v47 = vrot.slane %v1813_v32, 5 }
  0x78   : > { %v3885_v35 = vunpack.c.l.b16 %v1215_v51  ;;  %818 = vmatmul.bf16.gmra.mxu1 %v746_v5  ;;  %v385_v12 = vrot.slane %v337_v38, 7  ;;  %v1821_v56 = vrot.slane %v1819_v36, 5  ;;  %v1824_v57 = vshrl.u32 %v1795_v31, 16 }
  0x79   : > { %v1827_v59 = vshll.u32 %v1795_v31, 16  ;;  %v1431_v3 = vpack.c.b16 %v1426_v1, %v1425_v40  ;;  %v1816_v39 = vor.u32 %v1815_v47, %v1812_v19  ;;  %v1833_v54 = vshll.u32 %v3883_v0, 16  ;;  %v3164_v31 = vld [vmem:[%s4148_s3 + $0x140] sm:$0xff]  ;;  %v3189_v19 = vld [vmem:[%s4148_s3 + $0x208] sm:$0xff] }
  0x7a   : > { %v524_v62 = vshrl.u32 %v432_v61, 16  ;;  %v386_v63 = vrot.slane %v385_v12, 4  ;;  %418 = vst [vmem:[#allocation2 + $0x40] sm:$0xe] %v385_v12  ;;  %v1826_v2 = vrot.slane %v1824_v57, 4  ;;  %v527_v7 = vshll.u32 %v432_v61, 16  ;;  %1762 = vmatpush.bf16.msra.mxu1 %v3164_v31 }
  0x7b   : > { %v1829_v6 = vrot.slane %v1827_v59, 5  ;;  %1503 = vmatmul.bf16.gmra.mxu0 %v1431_v3  ;;  %v1817_v20 = vrot.slane %v1816_v39, 4  ;;  %v1835_v8 = vrot.slane %v1833_v54, 5  ;;  %v533_v10 = vshll.u32 %v3614_v37, 16  ;;  %v3941_v31 = vld [vmem:[#allocation2 + $0x2c] sm:$0x1] }
  0x7c   : > { %v526_v9 = vrot.slane %v524_v62, 4  ;;  %419 = vst [vmem:[#allocation2 + $0x44] sm:$0x1] %v386_v63  ;;  %v529_v18 = vrot.slane %v527_v7, 5  ;;  %v538_v14 = vshrl.u32 %v434_v60, 16  ;;  %v541_v21 = vshll.u32 %v434_v60, 16 }
  0x7d   : > { %v1830_v17 = vor.u32 %v1829_v6, %v1826_v2  ;;  %v1822_v15 = vsel %vm3629_vm8, %v1817_v20, %v1821_v56  ;;  %v535_v34 = vrot.slane %v533_v10, 5  ;;  %v547_v16 = vshll.u32 %v3637_v53, 16  ;;  %v3190_v53 = vld [vmem:[%s4148_s3 + $0x210] sm:$0xff] }
  0x7e   : > { %v2870_v45 = vrot.slane %v3888_v33, 9  ;;  %v1938_v24 = vunpack.c.l.b16 %v1822_v15  ;;  %v530_v37 = vor.u32 %v529_v18, %v526_v9  ;;  %v540_v26 = vrot.slane %v538_v14, 4  ;;  %2451 = vmatpush.bf16.msra.mxu0 %v3190_v53  ;;  %3251 = vmatpush.bf16.msra.mxu2 %v3190_v53  ;;  %v1797_v14 = vld [vmem:[#allocation2 + $0x20] sm:$0xf] }
  0x7f   : > { %v1831_v11 = vrot.slane %v1830_v17, 4  ;;  %v543_v46 = vrot.slane %v541_v21, 5  ;;  %v549_v42 = vrot.slane %v547_v16, 5  ;;  %v1398_v27 = vrot.slane %v3829_v23, 5 }
  0x80   : > { %v3016_v41 = vrot.slane %v3891_v13, 9  ;;  %v531_v36 = vrot.slane %v530_v37, 4  ;;  %v2065_v28 = vrot.slane %v3863_v22, 5  ;;  %v3017_v5 = vrot.slane %v3897_v43, 9 }
  0x81   : > { %v1836_v32 = vsel %vm3629_vm8, %v1831_v11, %v1835_v8  ;;  %v1116_v38 = vld [vmem:[#allocation2 + $0x40] sm:$0xf]  ;;  %v544_v51 = vor.u32 %v543_v46, %v540_v26  ;;  %v1399_v61 = vsel %vm3523_vm4, %v2870_v45, %v1398_v27  ;;  %v2069_v1 = vrot.slane %v3883_v0, 5  ;;  %v1798_v26 = vld [vmem:[#allocation2 + $0x24] sm:$0x1] }
  0x82   : > { %v1939_v23 = vunpack.c.l.b16 %v1836_v32  ;;  %v3911_v40 = vld [vmem:[#allocation2 + $0x40] sm:$0xe]  ;;  %v1217_v47 = vshrl.u32 %v1116_v38, 16  ;;  %v1220_v22 = vshll.u32 %v1116_v38, 16  ;;  %v536_v12 = vsel %vm3629_vm8, %v531_v36, %v535_v34  ;;  %2452 = vmatpush.bf16.msra.mxu0 %v3189_v19  ;;  %3252 = vmatpush.bf16.msra.mxu2 %v3189_v19 }
  0x83   : > { %v2871_v56 = vrot.slane %v3911_v40, 9  ;;  %v1117_v57 = vld [vmem:[#allocation2 + $0x44] sm:$0x1]  ;;  %v545_v3 = vrot.slane %v544_v51, 4  ;;  %v742_v39 = vunpack.c.l.b16 %v536_v12  ;;  %v1427_v54 = vunpack.c.l.b16 %v1399_v61 }
  0x84   : > { %v1946_v59 = vpack.c.b16 %v1939_v23, %v1938_v24  ;;  %v1219_v0 = vrot.slane %v1217_v47, 4  ;;  %v1222_v60 = vrot.slane %v1220_v22, 5  ;;  %v1226_v62 = vshll.u32 %v1117_v57, 16  ;;  %v3188_v8 = vld [vmem:[%s4148_s3 + $0x200] sm:$0xff] }
  0x85   : > { %v1402_v63 = vrot.slane %v1117_v57, 5  ;;  %v550_v2 = vsel %vm3629_vm8, %v545_v3, %v549_v42  ;;  %v2066_v6 = vsel %vm3523_vm4, %v3016_v41, %v2065_v28  ;;  %v2070_v7 = vsel %vm3523_vm4, %v3017_v5, %v2069_v1  ;;  %v1799_v41 = vld [vmem:[#allocation2 + $0x28] sm:$0xf]  ;;  %v1522_v5 = vld [vmem:[#allocation2 + $0xc] sm:$0x3] }
  0x86   : > { %2010 = vmatmul.bf16.vlgmr.msrb.gmra.mxu2 %v1946_v59  ;;  %v2222_v20 = vshrl.u32 %v3891_v13, 16  ;;  %v1223_v9 = vor.u32 %v1222_v60, %v1219_v0  ;;  %v1228_v10 = vrot.slane %v1226_v62, 5  ;;  %v743_v17 = vunpack.c.l.b16 %v550_v2  ;;  %2453 = vmatpush.bf16.msra.mxu0 %v3188_v8  ;;  %v3955_v60 = vld [vmem:[#allocation2 + $0x20] sm:$0xe] }
  0x87   : > { %v1403_v18 = vsel %vm3523_vm4, %v2871_v56, %v1402_v63  ;;  %v2112_v15 = vunpack.c.l.b16 %v2066_v6  ;;  %v2113_v34 = vunpack.c.l.b16 %v2070_v7  ;;  %v2225_v24 = vshll.u32 %v3891_v13, 16  ;;  %3253 = vmatpush.bf16.msra.mxu2 %v3188_v8  ;;  %v1523_v56 = vld [vmem:[#allocation2 + $0x14] sm:$0x3] }
  0x88   : > { %v1428_v21 = vunpack.c.l.b16 %v1403_v18  ;;  %v3934_v16 = vrot.slane %v2222_v20, 5  ;;  %v1224_v45 = vrot.slane %v1223_v9, 4  ;;  %v747_v11 = vpack.c.b16 %v743_v17, %v742_v39  ;;  %v3959_v9 = vld [vmem:[#allocation2 + $0x28] sm:$0xe] }
  0x89   : > { %v2240_v37 = vshrl.u32 %v3897_v43, 16  ;;  %v3938_v42 = vpack.c.b16 %v2113_v34, %v2112_v15  ;;  %v2243_v27 = vshll.u32 %v3897_v43, 16  ;;  %v1838_v53 = vshrl.u32 %v1797_v14, 16  ;;  %v2213_v34 = vld [vmem:[#allocation2 + $0x14] sm:$0x3] }
  0x8a   : > { %v1432_v46 = vpack.c.b16 %v1428_v21, %v1427_v54  ;;  %v1229_v32 = vsel %vm3629_vm8, %v1224_v45, %v1228_v10  ;;  %823 = vmatmul.bf16.gmra.mxu1 %v747_v11  ;;  %v3945_v36 = vrot.slane %v2225_v24, 6  ;;  %v1841_v28 = vshll.u32 %v1797_v14, 16 }
  0x8b   : > { %v3947_v13 = vrot.slane %v2240_v37, 5  ;;  %v1254_v38 = vunpack.c.l.b16 %v1229_v32  ;;  %v3949_v23 = vrot.slane %v2243_v27, 6  ;;  %v1840_v43 = vrot.slane %v1838_v53, 4  ;;  %v2214_v53 = vld [vmem:[#allocation2 + $0x1c] sm:$0x3] }
  0x8c   : > { %1508 = vmatmul.bf16.gmra.mxu0 %v1432_v46  ;;  %v1847_v51 = vshll.u32 %v1798_v26, 16  ;;  %v1843_v61 = vrot.slane %v1841_v28, 5  ;;  %v1852_v1 = vshrl.u32 %v1799_v41, 16  ;;  %v1855_v19 = vshll.u32 %v1799_v41, 16 }
  0x8d   : > { %v1861_v47 = vshll.u32 %v3941_v31, 16  ;;  %v1258_v22 = vpack.c.b16 %v1254_v38, %v3885_v35  ;;  %v1537_v57 = vor.u32 %v3747_v48, %v3744_v58  ;;  %v1540_v59 = vshrl.u32 %v1522_v5, 16 }
  0x8e   : > { %v1849_v12 = vrot.slane %v1847_v51, 5  ;;  %v1844_v3 = vor.u32 %v1843_v61, %v1840_v43  ;;  %v1854_v39 = vrot.slane %v1852_v1, 4  ;;  %v1857_v54 = vrot.slane %v1855_v19, 5  ;;  %v1801_v61 = vld [vmem:[#allocation2 + $0x30] sm:$0xf] }
  0x8f   : > { %v1863_v0 = vrot.slane %v1861_v47, 5  ;;  %1334 = vmatmul.bf16.gmra.mxu3 %v1258_v22  ;;  %v1538_v62 = vrot.slane %v1537_v57, 4  ;;  %v1542_v63 = vrot.slane %v1540_v59, 5  ;;  %v1543_v2 = vshll.u32 %v1522_v5, 16  ;;  %v1803_v22 = vld [vmem:[#allocation2 + $0x38] sm:$0xf] }
  0x90   : > { %v1555_v6 = vor.u32 %v3751_v55, %v3749_v49  ;;  %v1845_v35 = vrot.slane %v1844_v3, 4  ;;  %v1858_v7 = vor.u32 %v1857_v54, %v1854_v39  ;;  %v1558_v20 = vshrl.u32 %v1523_v56, 16  ;;  %v3980_v57 = vld [vmem:[#allocation2 + $0x34] sm:$0x1]  ;;  %v3984_v54 = vld [vmem:[#allocation2 + $0x3c] sm:$0x1] }
  0x91   : > { %v1561_v8 = vshll.u32 %v1523_v56, 16  ;;  %v1545_v58 = vrot.slane %v1543_v2, 6  ;;  %v3018_v10 = vrot.slane %v3955_v60, 9  ;;  %v2073_v17 = vrot.slane %v1798_v26, 5 }
  0x92   : > { %v1556_v48 = vrot.slane %v1555_v6, 4  ;;  %v1850_v18 = vsel %vm3629_vm8, %v1845_v35, %v1849_v12  ;;  %v1859_v14 = vrot.slane %v1858_v7, 4  ;;  %v1560_v21 = vrot.slane %v1558_v20, 5 }
  0x93   : > { %v1563_v15 = vrot.slane %v1561_v8, 6  ;;  %v1940_v45 = vunpack.c.l.b16 %v1850_v18  ;;  %v1546_v49 = vor.u32 %v1545_v58, %v1542_v63  ;;  %v2074_v55 = vsel %vm3523_vm4, %v3018_v10, %v2073_v17  ;;  %v1524_v10 = vld [vmem:[#allocation2 + $0x1c] sm:$0x3] }
  0x94   : > { %v3019_v11 = vrot.slane %v3959_v9, 9  ;;  %v1864_v24 = vsel %vm3629_vm8, %v1859_v14, %v1863_v0  ;;  %v2077_v26 = vrot.slane %v3941_v31, 5  ;;  %v2114_v46 = vunpack.c.l.b16 %v2074_v55 }
  0x95   : > { %v1564_v37 = vor.u32 %v1563_v15, %v1560_v21  ;;  %v1941_v27 = vunpack.c.l.b16 %v1864_v24  ;;  %v1547_v41 = vsel %vm3565_vm5, %v1538_v62, %v1546_v49  ;;  %v2228_v32 = vor.u32 %v3945_v36, %v3934_v16 }
  0x96   : > { %v2231_v28 = vshrl.u32 %v2213_v34, 16  ;;  %v1691_v38 = vunpack.c.l.b16 %v1547_v41  ;;  %v2078_v43 = vsel %vm3523_vm4, %v3019_v11, %v2077_v26  ;;  %v2234_v51 = vshll.u32 %v2213_v34, 16 }
  0x97   : > { %v1565_v5 = vsel %vm3565_vm5, %v1556_v48, %v1564_v37  ;;  %v1947_v31 = vpack.c.b16 %v1941_v27, %v1940_v45  ;;  %v2115_v19 = vunpack.c.l.b16 %v2078_v43  ;;  %v2229_v47 = vrot.slane %v2228_v32, 4 }
  0x98   : > { %v1692_v1 = vunpack.c.l.b16 %v1565_v5  ;;  %v2233_v12 = vrot.slane %v2231_v28, 5  ;;  %v2236_v56 = vrot.slane %v2234_v51, 6  ;;  %v2246_v16 = vor.u32 %v3949_v23, %v3947_v13 }
  0x99   : > { %v2249_v36 = vshrl.u32 %v2214_v53, 16  ;;  %2015 = vmatmul.bf16.gmra.mxu2 %v1947_v31  ;;  %v3982_v3 = vpack.c.b16 %v2115_v19, %v2114_v46  ;;  %v2252_v39 = vshll.u32 %v2214_v53, 16  ;;  %v1866_v0 = vshrl.u32 %v1801_v61, 16  ;;  %v1525_v53 = vld [vmem:[#allocation2 + $0x24] sm:$0x3] }
  0x9a   : > { %v1699_v59 = vpack.c.b16 %v1692_v1, %v1691_v38  ;;  %v2237_v62 = vor.u32 %v2236_v56, %v2233_v12  ;;  %v2247_v63 = vrot.slane %v2246_v16, 4  ;;  %v1869_v6 = vshll.u32 %v1801_v61, 16 }
  0x9b   : > { %v2251_v2 = vrot.slane %v2249_v36, 5  ;;  %v2254_v35 = vrot.slane %v2252_v39, 6  ;;  %v1868_v7 = vrot.slane %v1866_v0, 4  ;;  %v1875_v13 = vshll.u32 %v3980_v57, 16 }
  0x9c   : > { %1763 = vmatmul.bf16.vlgmr.msra.gmra.mxu1 %v1699_v59  ;;  %v1880_v23 = vshrl.u32 %v1803_v22, 16  ;;  %v2238_v20 = vsel %vm3565_vm5, %v2229_v47, %v2237_v62  ;;  %v1871_v8 = vrot.slane %v1869_v6, 5  ;;  %v1883_v58 = vshll.u32 %v1803_v22, 16  ;;  %v4001_v22 = vld [vmem:[#allocation2 + $0x38] sm:$0xe] }
  0x9d   : > { %v1889_v48 = vshll.u32 %v3984_v54, 16  ;;  %v2255_v17 = vor.u32 %v2254_v35, %v2251_v2  ;;  %v2382_v18 = vunpack.c.l.b16 %v2238_v20  ;;  %v1877_v14 = vrot.slane %v1875_v13, 5  ;;  %v2215_v35 = vld [vmem:[#allocation2 + $0x24] sm:$0x3] }
  0x9e   : > { %v1882_v21 = vrot.slane %v1880_v23, 4  ;;  %v1872_v15 = vor.u32 %v1871_v8, %v1868_v7  ;;  %v1885_v34 = vrot.slane %v1883_v58, 5  ;;  %v1567_v49 = vshrl.u32 %v3797_v25, 16 }
  0x9f   : > { %v1891_v45 = vrot.slane %v1889_v48, 5  ;;  %2184 = vmatmul.bf16.vlgmr.msrb.gmra.mxu3 %v3938_v42  ;;  %v2256_v55 = vsel %vm3565_vm5, %v2247_v63, %v2255_v17  ;;  %v1570_v11 = vshll.u32 %v3797_v25, 16  ;;  %v1576_v24 = vshrl.u32 %v1524_v10, 16  ;;  %v3999_v25 = vld [vmem:[#allocation2 + $0x30] sm:$0xe] }
  0xa0   : > { %v1579_v37 = vshll.u32 %v1524_v10, 16  ;;  %v2383_v26 = vunpack.c.l.b16 %v2256_v55  ;;  %v1873_v46 = vrot.slane %v1872_v15, 4  ;;  %v1886_v27 = vor.u32 %v1885_v34, %v1882_v21  ;;  %v2216_v34 = vld [vmem:[#allocation2 + $0x2c] sm:$0x3] }
  0xa1   : > { %v1569_v41 = vrot.slane %v1567_v49, 5  ;;  %v1572_v32 = vrot.slane %v1570_v11, 6  ;;  %v1578_v28 = vrot.slane %v1576_v24, 5  ;;  %v1585_v38 = vshrl.u32 %v3801_v29, 16 }
  0xa2   : > { %v1581_v5 = vrot.slane %v1579_v37, 6  ;;  %v2390_v43 = vpack.c.b16 %v2383_v26, %v2382_v18  ;;  %v1878_v42 = vsel %vm3629_vm8, %v1873_v46, %v1877_v14  ;;  %v1887_v51 = vrot.slane %v1886_v27, 4  ;;  %v1805_v37 = vld [vmem:[#allocation2 + $0x40] sm:$0xf] }
  0xa3   : > { %v1588_v61 = vshll.u32 %v3801_v29, 16  ;;  %v1942_v31 = vunpack.c.l.b16 %v1878_v42  ;;  %v1573_v1 = vor.u32 %v1572_v32, %v1569_v41  ;;  %v1587_v47 = vrot.slane %v1585_v38, 5  ;;  %v4023_v41 = vld [vmem:[#allocation2 + $0x44] sm:$0x1]  ;;  %v1807_v38 = vld [vmem:[#allocation2 + $0x48] sm:$0xf] }
  0xa4   : > { %v1582_v19 = vor.u32 %v1581_v5, %v1578_v28  ;;  %2454 = vmatmul.bf16.vlgmr.msra.gmra.mxu0 %v2390_v43  ;;  %v1892_v12 = vsel %vm3629_vm8, %v1887_v51, %v1891_v45  ;;  %v1594_v16 = vshrl.u32 %v1525_v53, 16  ;;  %v1597_v36 = vshll.u32 %v1525_v53, 16 }
  0xa5   : > { %v1590_v56 = vrot.slane %v1588_v61, 6  ;;  %v1943_v59 = vunpack.c.l.b16 %v1892_v12  ;;  %v1574_v39 = vrot.slane %v1573_v1, 4  ;;  %v3020_v0 = vrot.slane %v3999_v25, 9 }
  0xa6   : > { %v2081_v29 = vrot.slane %v3980_v57, 5  ;;  %v1596_v63 = vrot.slane %v1594_v16, 5  ;;  %v1599_v2 = vrot.slane %v1597_v36, 6  ;;  %v3021_v6 = vrot.slane %v4001_v22, 9  ;;  %v4031_v16 = vld [vmem:[#allocation2 + $0x4c] sm:$0x1] }
  0xa7   : > { %v1591_v62 = vor.u32 %v1590_v56, %v1587_v47  ;;  %v1948_v7 = vpack.c.b16 %v1943_v59, %v1942_v31  ;;  %v1583_v13 = vsel %vm3565_vm5, %v1574_v39, %v1582_v19  ;;  %v2085_v20 = vrot.slane %v3984_v54, 5 }
  0xa8   : > { %v2082_v23 = vsel %vm3523_vm4, %v3020_v0, %v2081_v29  ;;  %v1600_v58 = vor.u32 %v1599_v2, %v1596_v63  ;;  %v1693_v48 = vunpack.c.l.b16 %v1583_v13  ;;  %v2258_v17 = vshrl.u32 %v3955_v60, 16  ;;  %v1526_v63 = vld [vmem:[#allocation2 + $0x2c] sm:$0x3] }
  0xa9   : > { %v1592_v8 = vrot.slane %v1591_v62, 4  ;;  %v2116_v10 = vunpack.c.l.b16 %v2082_v23  ;;  %2020 = vmatmul.bf16.gmra.mxu2 %v1948_v7  ;;  %v2086_v57 = vsel %vm3523_vm4, %v3021_v6, %v2085_v20  ;;  %v2261_v18 = vshll.u32 %v3955_v60, 16 }
  0xaa   : > { %v2267_v14 = vshrl.u32 %v2215_v35, 16  ;;  %v2117_v15 = vunpack.c.l.b16 %v2086_v57  ;;  %v2270_v45 = vshll.u32 %v2215_v35, 16  ;;  %v2276_v54 = vshrl.u32 %v3959_v9, 16 }
  0xab   : > { %v1601_v21 = vsel %vm3565_vm5, %v1592_v8, %v1600_v58  ;;  %v2260_v55 = vrot.slane %v2258_v17, 5  ;;  %v2263_v11 = vrot.slane %v2261_v18, 6  ;;  %v2279_v60 = vshll.u32 %v3959_v9, 16 }
  0xac   : > { %v1694_v49 = vunpack.c.l.b16 %v1601_v21  ;;  %v2269_v24 = vrot.slane %v2267_v14, 5  ;;  %v4020_v26 = vpack.c.b16 %v2117_v15, %v2116_v10  ;;  %v2272_v46 = vrot.slane %v2270_v45, 6  ;;  %v1527_v21 = vld [vmem:[#allocation2 + $0x34] sm:$0x3] }
  0xad   : > { %v2278_v27 = vrot.slane %v2276_v54, 5  ;;  %v2264_v32 = vor.u32 %v2263_v11, %v2260_v55  ;;  %v2285_v28 = vshrl.u32 %v2216_v34, 16  ;;  %v2288_v5 = vshll.u32 %v2216_v34, 16  ;;  %v4025_v43 = vpop.f32.mrf.mxu1 }
  0xae   : > { %v1700_v53 = vpack.c.b16 %v1694_v49, %v1693_v48  ;;  %v2273_v42 = vor.u32 %v2272_v46, %v2269_v24  ;;  %v2281_v51 = vrot.slane %v2279_v60, 6  ;;  %v1894_v61 = vshrl.u32 %v1805_v37, 16 }
  0xaf   : > { %v1897_v31 = vshll.u32 %v1805_v37, 16  ;;  %2189 = vmatmul.bf16.gmra.mxu3 %v3982_v3  ;;  %v2265_v1 = vrot.slane %v2264_v32, 4  ;;  %v2287_v19 = vrot.slane %v2285_v28, 5  ;;  %v2290_v47 = vrot.slane %v2288_v5, 6  ;;  %v4029_v12 = vpop.f32.mrf.mxu0  ;;  %v2045_v28 = vld [vmem:[#allocation2 + $0x40] sm:$0xe] }
  0xb0   : > { %1768 = vmatmul.bf16.gmra.mxu1 %v1700_v53  ;;  %v1903_v9 = vshll.u32 %v4023_v41, 16  ;;  %v2282_v56 = vor.u32 %v2281_v51, %v2278_v27  ;;  %v1896_v36 = vrot.slane %v1894_v61, 4  ;;  %v1908_v39 = vshrl.u32 %v1807_v38, 16 }
  0xb1   : > { %v1899_v59 = vrot.slane %v1897_v31, 5  ;;  %v2274_v0 = vsel %vm3565_vm5, %v2265_v1, %v2273_v42  ;;  %v2291_v29 = vor.u32 %v2290_v47, %v2287_v19  ;;  %v1911_v3 = vshll.u32 %v1807_v38, 16  ;;  %v2046_v47 = vld [vmem:[#allocation2 + $0x48] sm:$0xe] }
  0xb2   : > { %v1905_v62 = vrot.slane %v1903_v9, 5  ;;  %v2283_v2 = vrot.slane %v2282_v56, 4  ;;  %v2384_v6 = vunpack.c.l.b16 %v2274_v0  ;;  %v1910_v7 = vrot.slane %v1908_v39, 4 }
  0xb3   : > { %v1900_v35 = vor.u32 %v1899_v59, %v1896_v36  ;;  %v1913_v13 = vrot.slane %v1911_v3, 5  ;;  %v1917_v23 = vshll.u32 %v4031_v16, 16  ;;  %v1603_v20 = vshrl.u32 %v3834_v50, 16 }
  0xb4   : > { %v1606_v8 = vshll.u32 %v3834_v50, 16  ;;  %v2292_v58 = vsel %vm3565_vm5, %v2283_v2, %v2291_v29  ;;  %v1612_v10 = vshrl.u32 %v1526_v63, 16  ;;  %v1615_v57 = vshll.u32 %v1526_v63, 16  ;;  %v2217_v2 = vld [vmem:[#allocation2 + $0x34] sm:$0x3] }
  0xb5   : > { %v1901_v48 = vrot.slane %v1900_v35, 4  ;;  %v2385_v17 = vunpack.c.l.b16 %v2292_v58  ;;  %v1914_v18 = vor.u32 %v1913_v13, %v1910_v7  ;;  %v1919_v14 = vrot.slane %v1917_v23, 5  ;;  %v4040_v34 = vpop.f32.mrf.mxu1 }
  0xb6   : > { %v1605_v15 = vrot.slane %v1603_v20, 5  ;;  %v1608_v54 = vrot.slane %v1606_v8, 6  ;;  %v1614_v49 = vrot.slane %v1612_v10, 5  ;;  %v1617_v55 = vrot.slane %v1615_v57, 6  ;;  %v2218_v57 = vld [vmem:[#allocation2 + $0x3c] sm:$0x3] }
  0xb7   : > { %v1906_v45 = vsel %vm3629_vm8, %v1901_v48, %v1905_v62  ;;  %v2391_v50 = vpack.c.b16 %v2385_v17, %v2384_v6  ;;  %v1915_v11 = vrot.slane %v1914_v18, 4  ;;  %v1621_v37 = vshrl.u32 %v3849_v4, 16  ;;  %v4045_v46 = vpop.f32.mrf.mxu0 }
  0xb8   : > { %v1944_v24 = vunpack.c.l.b16 %v1906_v45  ;;  %v1609_v27 = vor.u32 %v1608_v54, %v1605_v15  ;;  %v1618_v60 = vor.u32 %v1617_v55, %v1614_v49  ;;  %v1624_v53 = vshll.u32 %v3849_v4, 16 }
  0xb9   : > { %v1630_v32 = vshrl.u32 %v1527_v21, 16  ;;  %2459 = vmatmul.bf16.gmra.mxu0 %v2391_v50  ;;  %v1920_v5 = vsel %vm3629_vm8, %v1915_v11, %v1919_v14  ;;  %v1623_v38 = vrot.slane %v1621_v37, 5  ;;  %v1633_v42 = vshll.u32 %v1527_v21, 16  ;;  %v2219_v50 = vld [vmem:[#allocation2 + $0x44] sm:$0x3] }
  0xba   : > { %v3022_v51 = vrot.slane %v2045_v28, 9  ;;  %v1945_v61 = vunpack.c.l.b16 %v1920_v5  ;;  %v1610_v31 = vrot.slane %v1609_v27, 4  ;;  %v1626_v1 = vrot.slane %v1624_v53, 6 }
  0xbb   : > { %v1632_v19 = vrot.slane %v1630_v32, 5  ;;  %v1635_v9 = vrot.slane %v1633_v42, 6  ;;  %v2089_v56 = vrot.slane %v4023_v41, 5  ;;  %v3023_v36 = vrot.slane %v2046_v47, 9  ;;  %v2220_v42 = vld [vmem:[#allocation2 + $0x4c] sm:$0x3] }
  0xbc   : > { %v2093_v4 = vrot.slane %v4031_v16, 5  ;;  %v1949_v59 = vpack.c.b16 %v1945_v61, %v1944_v24  ;;  %v1619_v39 = vsel %vm3565_vm5, %v1610_v31, %v1618_v60  ;;  %v1627_v44 = vor.u32 %v1626_v1, %v1623_v38 }
  0xbd   : > { %v2330_v0 = vshrl.u32 %v2045_v28, 16  ;;  %v1636_v29 = vor.u32 %v1635_v9, %v1632_v19  ;;  %v1695_v62 = vunpack.c.l.b16 %v1619_v39  ;;  %v2090_v3 = vsel %vm3523_vm4, %v3022_v51, %v2089_v56  ;;  %v4058_v6 = vpop.f32.mrf.mxu2  ;;  %v4060_v41 = vpop.f32.mrf.mxu1 }
  0xbe   : > { %v2094_v63 = vsel %vm3523_vm4, %v3023_v36, %v2093_v4  ;;  %2025 = vmatmul.bf16.gmra.mxu2 %v1949_v59  ;;  %v1628_v16 = vrot.slane %v1627_v44, 4  ;;  %v2118_v35 = vunpack.c.l.b16 %v2090_v3  ;;  %v2333_v23 = vshll.u32 %v2045_v28, 16 }
  0xbf   : > { %v2119_v7 = vunpack.c.l.b16 %v2094_v63  ;;  %v2332_v13 = vrot.slane %v2330_v0, 5  ;;  %2194 = vmatmul.bf16.gmra.mxu3 %v4020_v26  ;;  %v2348_v20 = vshrl.u32 %v2046_v47, 16  ;;  %v2351_v8 = vshll.u32 %v2046_v47, 16  ;;  %v4064_v48 = vpop.f32.mrf.mxu0 }
  0xc0   : > { %v2294_v58 = vshrl.u32 %v3999_v25, 16  ;;  %v1637_v30 = vsel %vm3565_vm5, %v1628_v16, %v1636_v29  ;;  %v2297_v17 = vshll.u32 %v3999_v25, 16  ;;  %v2303_v18 = vshrl.u32 %v2217_v2, 16 }
  0xc1   : > { %v4068_v10 = vpack.c.b16 %v2119_v7, %v2118_v35  ;;  %v1696_v14 = vunpack.c.l.b16 %v1637_v30  ;;  %v2335_v21 = vrot.slane %v2333_v23, 6  ;;  %v2350_v15 = vrot.slane %v2348_v20, 5 }
  0xc2   : > { %v2353_v26 = vrot.slane %v2351_v8, 6  ;;  %v2296_v45 = vrot.slane %v2294_v58, 5  ;;  %v2299_v54 = vrot.slane %v2297_v17, 6  ;;  %v2305_v49 = vrot.slane %v2303_v18, 5 }
  0xc3   : > { %v2306_v55 = vshll.u32 %v2217_v2, 16  ;;  %v1701_v11 = vpack.c.b16 %v1696_v14, %v1695_v62  ;;  %v2312_v24 = vshrl.u32 %v4001_v22, 16  ;;  %v2315_v37 = vshll.u32 %v4001_v22, 16  ;;  %v1528_v62 = vld [vmem:[#allocation2 + $0x3c] sm:$0x3] }
  0xc4   : > { %v2321_v27 = vshrl.u32 %v2218_v57, 16  ;;  %v2300_v60 = vor.u32 %v2299_v54, %v2296_v45  ;;  %v2324_v32 = vshll.u32 %v2218_v57, 16  ;;  %v2336_v25 = vor.u32 %v2335_v21, %v2332_v13 }
  0xc5   : > { %v2308_v53 = vrot.slane %v2306_v55, 6  ;;  %1773 = vmatmul.bf16.gmra.mxu1 %v1701_v11  ;;  %v2314_v28 = vrot.slane %v2312_v24, 5  ;;  %v2317_v5 = vrot.slane %v2315_v37, 6  ;;  %v2339_v51 = vshrl.u32 %v2219_v50, 16  ;;  %v4073_v61 = vpop.f32.mrf.mxu1  ;;  %v4075_v4 = vpop.f32.mrf.mxu2 }
  0xc6   : > { %v2323_v38 = vrot.slane %v2321_v27, 5  ;;  %v2301_v31 = vrot.slane %v2300_v60, 4  ;;  %v2326_v19 = vrot.slane %v2324_v32, 6  ;;  %v2337_v47 = vrot.slane %v2336_v25, 4 }
  0xc7   : > { %v2309_v1 = vor.u32 %v2308_v53, %v2305_v49  ;;  %v2318_v9 = vor.u32 %v2317_v5, %v2314_v28  ;;  %v2341_v56 = vrot.slane %v2339_v51, 5  ;;  %v2342_v22 = vshll.u32 %v2219_v50, 16  ;;  %v4077_v59 = vpop.f32.mrf.mxu0  ;;  %v1320_v53 = vpop.f32.mrf.mxu3 }
  0xc8   : > { %v2354_v36 = vor.u32 %v2353_v26, %v2350_v15  ;;  %v2327_v44 = vor.u32 %v2326_v19, %v2323_v38  ;;  %v2357_v0 = vshrl.u32 %v2220_v42, 16  ;;  %v2360_v29 = vshll.u32 %v2220_v42, 16  ;;  %v1529_v15 = vld [vmem:[#allocation2 + $0x44] sm:$0x3] }
  0xc9   : > { %v2310_v39 = vsel %vm3565_vm5, %v2301_v31, %v2309_v1  ;;  %v2319_v3 = vrot.slane %v2318_v9, 4  ;;  %v2344_v2 = vrot.slane %v2342_v22, 6  ;;  %v1639_v13 = vshrl.u32 %v3888_v33, 16 }
  0xca   : > { %v2386_v63 = vunpack.c.l.b16 %v2310_v39  ;;  %v2355_v16 = vrot.slane %v2354_v36, 4  ;;  %v2359_v35 = vrot.slane %v2357_v0, 5  ;;  %v2362_v7 = vrot.slane %v2360_v29, 6 }
  0xcb   : > { %v1642_v23 = vshll.u32 %v3888_v33, 16  ;;  %v2328_v20 = vsel %vm3565_vm5, %v2319_v3, %v2327_v44  ;;  %v2345_v8 = vor.u32 %v2344_v2, %v2341_v56  ;;  %v1648_v58 = vshrl.u32 %v1528_v62, 16 }
  0xcc   : > { %v1651_v30 = vshll.u32 %v1528_v62, 16  ;;  %v2387_v57 = vunpack.c.l.b16 %v2328_v20  ;;  %v2363_v17 = vor.u32 %v2362_v7, %v2359_v35  ;;  %v1641_v18 = vrot.slane %v1639_v13, 5 }
  0xcd   : > { %v1644_v14 = vrot.slane %v1642_v23, 6  ;;  %v2346_v21 = vsel %vm3565_vm5, %v2337_v47, %v2345_v8  ;;  %v1650_v26 = vrot.slane %v1648_v58, 5  ;;  %v1657_v54 = vshrl.u32 %v3911_v40, 16  ;;  %v809_v49 = vpop.f32.mrf.mxu1 }
  0xce   : > { %v1653_v45 = vrot.slane %v1651_v30, 6  ;;  %v2392_v33 = vpack.c.b16 %v2387_v57, %v2386_v63  ;;  %v2364_v55 = vsel %vm3565_vm5, %v2355_v16, %v2363_v17  ;;  %v2388_v50 = vunpack.c.l.b16 %v2346_v21 }
  0xcf   : > { %v1645_v11 = vor.u32 %v1644_v14, %v1641_v18  ;;  %2199 = vmatmul.bf16.gmra.mxu3 %v4068_v10  ;;  %v2389_v24 = vunpack.c.l.b16 %v2364_v55  ;;  %v1659_v27 = vrot.slane %v1657_v54, 5  ;;  %v1660_v60 = vshll.u32 %v3911_v40, 16  ;;  %v1079_v51 = vpop.f32.mrf.mxu2  ;;  %v1322_v29 = vpop.f32.mrf.mxu3 }
  0xd0   : > { %v1654_v37 = vor.u32 %v1653_v45, %v1650_v26  ;;  %2464 = vmatmul.bf16.gmra.mxu0 %v2392_v33  ;;  %v1666_v25 = vshrl.u32 %v1529_v15, 16  ;;  %v1669_v28 = vshll.u32 %v1529_v15, 16  ;;  %v810_v5 = vadd.f32 %v809_v49, %v4029_v12 }
  0xd1   : > { %v1646_v32 = vrot.slane %v1645_v11, 4  ;;  %v2393_v38 = vpack.c.b16 %v2389_v24, %v2388_v50  ;;  %v1662_v42 = vrot.slane %v1660_v60, 6  ;;  %v1494_v31 = vpop.f32.mrf.mxu0 }
  0xd2   : > { %v1668_v1 = vrot.slane %v1666_v25, 5  ;;  %v1671_v19 = vrot.slane %v1669_v28, 6  ;;  %v1094_v10 = vadd.f32 %v4058_v6, %v810_v5 }
  0xd3   : > { %2469 = vmatmul.bf16.vlgmr.msra.gmra.mxu2 %v2393_v38  ;;  %v1655_v47 = vsel %vm3565_vm5, %v1646_v32, %v1654_v37  ;;  %v1663_v40 = vor.u32 %v1662_v42, %v1659_v27 }
  0xd4   : > { %v1672_v9 = vor.u32 %v1671_v19, %v1668_v1  ;;  %v1340_v56 = vadd.f32 %v1320_v53, %v1094_v10  ;;  %v1697_v36 = vunpack.c.l.b16 %v1655_v47 }
  0xd5   : > { %v1664_v22 = vrot.slane %v1663_v40, 4  ;;  %v811_v0 = vpop.f32.mrf.mxu1 }
  0xd6   : > { %v1514_v39 = vadd.f32 %v1494_v31, %v1340_v56 }
  0xd7   : > { %v1673_v12 = vsel %vm3565_vm5, %v1664_v22, %v1672_v9  ;;  %v1081_v3 = vpop.f32.mrf.mxu2 }
  0xd8   : > { %v1698_v44 = vunpack.c.l.b16 %v1673_v12 }
  0xd9   : > { %v1496_v63 = vpop.f32.mrf.mxu0  ;;  %v1325_v2 = vpop.f32.mrf.mxu3 }
  0xda   : > { %v1702_v62 = vpack.c.b16 %v1698_v44, %v1697_v36 }
  0xdc   : > { %1778 = vmatmul.bf16.gmra.mxu1 %v1702_v62 }
  0xe1   : > { %v1327_v58 = vpop.f32.mrf.mxu3 }
  0xe2   : > { %v814_v6 = vpop.f32.mrf.mxu1 }
  0xe3   : > { %v815_v16 = vadd.f32 %v814_v6, %v4064_v48  ;;  %v1084_v35 = vpop.f32.mrf.mxu2 }
  0xe5   : > { %v1096_v7 = vadd.f32 %v1079_v51, %v815_v16  ;;  %v1499_v13 = vpop.f32.mrf.mxu0 }
  0xe7   : > { %v1342_v23 = vadd.f32 %v1325_v2, %v1096_v7 }
  0xe9   : > { %v1516_v20 = vadd.f32 %v1499_v13, %v1342_v23 }
  0xea   : > { %v816_v8 = vpop.f32.mrf.mxu1 }
  0xeb   : > { %v1086_v30 = vpop.f32.mrf.mxu2 }
  0xed   : > { %v4099_v52 = vpop.f32.mrf.mxu0  ;;  %v1330_v18 = vpop.f32.mrf.mxu3 }
  0xf5   : > { %v819_v57 = vpop.f32.mrf.mxu1  ;;  %v1332_v33 = vpop.f32.mrf.mxu3 }
  0xf6   : > { %v820_v17 = vadd.f32 %v819_v57, %v4025_v43  ;;  %v1089_v15 = vpop.f32.mrf.mxu2 }
  0xf8   : > { %v1098_v14 = vadd.f32 %v1084_v35, %v820_v17  ;;  %v1504_v21 = vpop.f32.mrf.mxu0 }
  0xfa   : > { %v1344_v26 = vadd.f32 %v1330_v18, %v1098_v14 }
  0xfc   : > { %v4102_v45 = vadd.f32 %v1504_v21, %v1344_v26 }
  0xfd   : > { %v821_v48 = vpop.f32.mrf.mxu1 }
  0xfe   : > { %v822_v54 = vadd.f32 %v821_v48, %v4040_v34  ;;  %v1091_v11 = vpop.f32.mrf.mxu2  ;;  %v812_v34 = vadd.f32 %v811_v0, %v4045_v46  ;;  %v817_v0 = vadd.f32 %v816_v8, %v4077_v59 }
 0x100   : > { %v1099_v49 = vadd.f32 %v1086_v30, %v822_v54  ;;  %v1506_v55 = vpop.f32.mrf.mxu0  ;;  %v1095_v19 = vadd.f32 %v4075_v4, %v812_v34  ;;  %v1097_v2 = vadd.f32 %v1081_v3, %v817_v0 }
 0x102   : > { %v1345_v50 = vadd.f32 %v1332_v33, %v1099_v49  ;;  %v1341_v47 = vadd.f32 %v1322_v29, %v1095_v19 }
 0x104   : > { %v4105_v24 = vadd.f32 %v1506_v55, %v1345_v50 }
 0x107   : > { %v824_v37 = vpop.f32.mrf.mxu1 }
 0x108   : > { %v825_v43 = vadd.f32 %v824_v37, %v4060_v41 }
 0x109   : > { %v2011_v60 = vpop.f32.mrf.mxu2  ;;  %v1509_v53 = vpop.f32.mrf.mxu0 }
 0x10a   : > { %v1100_v27 = vadd.f32 %v1089_v15, %v825_v43 }
 0x10f   : > { %v826_v32 = vpop.f32.mrf.mxu1 }
 0x110   : > { %v827_v25 = vadd.f32 %v826_v32, %v4073_v61  ;;  %v1515_v61 = vadd.f32 %v1496_v63, %v1341_v47  ;;  %v1343_v63 = vadd.f32 %v1327_v58, %v1097_v2 }
 0x111   : > { %v2013_v51 = vpop.f32.mrf.mxu2  ;;  %v1511_v31 = vpop.f32.mrf.mxu0 }
 0x112   : > { %v1335_v28 = vpop.f32.mrf.mxu3  ;;  %v1101_v5 = vadd.f32 %v1091_v11, %v827_v25  ;;  %v1517_v14 = vadd.f32 %v4099_v52, %v1343_v63 }
 0x113   : > { %v1346_v38 = vadd.f32 %v1335_v28, %v1100_v27 }
 0x115   : > { %v4110_v42 = vadd.f32 %v1509_v53, %v1346_v38 }
 0x119   : > { %v1764_v1 = vpop.f32.mrf.mxu1 }
 0x11a   : > { %v1337_v10 = vpop.f32.mrf.mxu3  ;;  %v1784_v9 = vadd.f32 %v1764_v1, %v1514_v39 }
 0x11b   : > { %v1347_v41 = vadd.f32 %v1337_v10, %v1101_v5 }
 0x11c   : > { %v2016_v22 = vpop.f32.mrf.mxu2  ;;  %v2031_v44 = vadd.f32 %v2011_v60, %v1784_v9 }
 0x11d   : > { %v4113_v40 = vadd.f32 %v1511_v31, %v1347_v41 }
 0x121   : > { %v1766_v56 = vpop.f32.mrf.mxu1  ;;  %v2455_v36 = vpop.f32.mrf.mxu0 }
 0x122   : > { %v2185_v12 = vpop.f32.mrf.mxu3  ;;  %v1785_v46 = vadd.f32 %v1766_v56, %v1515_v61 }
 0x123   : > { %v2205_v62 = vadd.f32 %v2185_v12, %v2031_v44 }
 0x124   : > { %v2032_v6 = vadd.f32 %v2013_v51, %v1785_v46  ;;  %v2018_v29 = vpop.f32.mrf.mxu2 }
 0x125   : > { %v2475_v16 = vadd.f32 %v2455_v36, %v2205_v62 }
 0x127   : > { %v2513_v30 = vmul.f32 %v2475_v16, %v2475_v16 }
 0x129   : > { %v2457_v35 = vpop.f32.mrf.mxu0 }
 0x12a   : > { %v2187_v4 = vpop.f32.mrf.mxu3 }
 0x12b   : > { %v2206_v7 = vadd.f32 %v2187_v4, %v2032_v6 }
 0x12c   : > { %v2021_v58 = vpop.f32.mrf.mxu2 }
 0x12d   : > { %v1769_v13 = vpop.f32.mrf.mxu1  ;;  %v2476_v39 = vadd.f32 %v2457_v35, %v2206_v7 }
 0x12e   : > { %v1786_v23 = vadd.f32 %v1769_v13, %v1516_v20 }
 0x12f   : > { %v3215_v59 = vpack.c.bf16 %v2476_v39, %v2475_v16  ;;  %v2499_v8 = vadd.f32 %v2476_v39, %v2475_v16  ;;  %v2514_v3 = vmul.f32 %v2476_v39, %v2476_v39 }
 0x130   : > { %v2033_v57 = vadd.f32 %v2016_v22, %v1786_v23 }
 0x131   : > { %3216 = vst [vmem:[%s4121_s15] sm:$0xff] %v3215_v59   ;;  %v2521_v17 = vadd.f32 %v2514_v3, %v2513_v30 }
 0x132   : > { %v2190_v18 = vpop.f32.mrf.mxu3 }
 0x133   : > { %v2207_v21 = vadd.f32 %v2190_v18, %v2033_v57 }
 0x134   : > { %v2023_v43 = vpop.f32.mrf.mxu2 }
 0x135   : > { %v1771_v20 = vpop.f32.mrf.mxu1 }
 0x136   : > { %v1787_v15 = vadd.f32 %v1771_v20, %v1517_v14  ;;  %v2460_v26 = vpop.f32.mrf.mxu0 }
 0x137   : > { %v2477_v48 = vadd.f32 %v2460_v26, %v2207_v21 }
 0x138   : > { %v2034_v54 = vadd.f32 %v2018_v29, %v1787_v15 }
 0x139   : > { %v2500_v49 = vadd.f32 %v2499_v8, %v2477_v48  ;;  %v2515_v33 = vmul.f32 %v2477_v48, %v2477_v48 }
 0x13a   : > { %v2192_v55 = vpop.f32.mrf.mxu3 }
 0x13b   : > { %v2522_v50 = vadd.f32 %v2521_v17, %v2515_v33  ;;  %v2208_v11 = vadd.f32 %v2192_v55, %v2034_v54 }
 0x13e   : > { %v2462_v37 = vpop.f32.mrf.mxu0 }
 0x13f   : > { %v2478_v27 = vadd.f32 %v2462_v37, %v2208_v11 }
 0x141   : > { %v3220_v60 = vpack.c.bf16 %v2478_v27, %v2477_v48  ;;  %v2501_v53 = vadd.f32 %v2500_v49, %v2478_v27  ;;  %v2516_v32 = vmul.f32 %v2478_v27, %v2478_v27  ;;  %v2026_v34 = vpop.f32.mrf.mxu2 }
 0x142   : > { %v1774_v52 = vpop.f32.mrf.mxu1  ;;  %v2195_v38 = vpop.f32.mrf.mxu3 }
 0x143   : > { %3235 = vst [vmem:[%s4121_s15 + $0x8] sm:$0xff] %v3220_v60   ;;  %v2523_v25 = vadd.f32 %v2522_v50, %v2516_v32  ;;  %v1788_v28 = vadd.f32 %v1774_v52, %v4102_v45 }
 0x145   : > { %v2035_v5 = vadd.f32 %v2021_v58, %v1788_v28 }
 0x147   : > { %v2209_v51 = vadd.f32 %v2195_v38, %v2035_v5 }
 0x149   : > { %v2028_v36 = vpop.f32.mrf.mxu2 }
 0x14a   : > { %v1776_v31 = vpop.f32.mrf.mxu1  ;;  %v2197_v56 = vpop.f32.mrf.mxu3 }
 0x14b   : > { %v1789_v1 = vadd.f32 %v1776_v31, %v4105_v24 }
 0x14d   : > { %v2465_v19 = vpop.f32.mrf.mxu0  ;;  %v2036_v41 = vadd.f32 %v2023_v43, %v1789_v1 }
 0x14e   : > { %v2479_v10 = vadd.f32 %v2465_v19, %v2209_v51 }
 0x14f   : > { %v2210_v22 = vadd.f32 %v2197_v56, %v2036_v41 }
 0x150   : > { %v2502_v47 = vadd.f32 %v2501_v53, %v2479_v10  ;;  %v2517_v9 = vmul.f32 %v2479_v10, %v2479_v10 }
 0x152   : > { %v2524_v61 = vadd.f32 %v2523_v25, %v2517_v9  ;;  %v2200_v2 = vpop.f32.mrf.mxu3 }
 0x155   : > { %v2467_v12 = vpop.f32.mrf.mxu0 }
 0x156   : > { %v2480_v44 = vadd.f32 %v2467_v12, %v2210_v22  ;;  %v2470_v16 = vpop.f32.mrf.mxu2 }
 0x158   : > { %v3225_v45 = vpack.c.bf16 %v2480_v44, %v2479_v10  ;;  %v2503_v46 = vadd.f32 %v2502_v47, %v2480_v44  ;;  %v2518_v0 = vmul.f32 %v2480_v44, %v2480_v44 }
 0x159   : > { %v1779_v62 = vpop.f32.mrf.mxu1 }
 0x15a   : > { %3236 = vst [vmem:[%s4121_s15 + $0x10] sm:$0xff] %v3225_v45   ;;  %v2525_v6 = vadd.f32 %v2524_v61, %v2518_v0  ;;  %v1790_v24 = vadd.f32 %v1779_v62, %v4110_v42  ;;  %v2202_v59 = vpop.f32.mrf.mxu3 }
 0x15c   : > { %v2037_v4 = vadd.f32 %v2026_v34, %v1790_v24 }
 0x15e   : > { %v2211_v35 = vadd.f32 %v2200_v2, %v2037_v4  ;;  %v2472_v3 = vpop.f32.mrf.mxu2 }
 0x160   : > { %v2481_v29 = vadd.f32 %v2470_v16, %v2211_v35 }
 0x161   : > { %v1781_v7 = vpop.f32.mrf.mxu1 }
 0x162   : > { %v2504_v13 = vadd.f32 %v2503_v46, %v2481_v29  ;;  %v2519_v39 = vmul.f32 %v2481_v29, %v2481_v29  ;;  %v1791_v23 = vadd.f32 %v1781_v7, %v4113_v40 }
 0x164   : > { %v2526_v63 = vadd.f32 %v2525_v6, %v2519_v39  ;;  %v2038_v30 = vadd.f32 %v2028_v36, %v1791_v23 }
 0x166   : > { %v2212_v8 = vadd.f32 %v2202_v59, %v2038_v30 }
 0x168   : > { %v2482_v57 = vadd.f32 %v2472_v3, %v2212_v8 }
 0x16a   : > { %v3230_v17 = vpack.c.bf16 %v2482_v57, %v2481_v29  ;;  %v2505_v42 = vadd.f32 %v2504_v13, %v2482_v57  ;;  %v2520_v18 = vmul.f32 %v2482_v57, %v2482_v57 }
 0x16c   : > { %3237 = vst [vmem:[%s4121_s15 + $0x18] sm:$0xff] %v3230_v17   ;;  %v2506_v14 = vrot.slane %v2505_v42, 4  ;;  %v2527_v21 = vadd.f32 %v2526_v63, %v2520_v18 }
 0x16e   : > { %v2507_v20 = vadd.f32 %v2506_v14, %v2505_v42  ;;  %v2528_v58 = vrot.slane %v2527_v21, 4 }
 0x170   : > { %v2508_v15 = vrot.slane %v2507_v20, 2  ;;  %v2529_v26 = vadd.f32 %v2528_v58, %v2527_v21 }
 0x172   : > { %v2509_v48 = vadd.f32 %v2508_v15, %v2507_v20  ;;  %v2530_v40 = vrot.slane %v2529_v26, 2 }
 0x174   : > { %v2510_v54 = vrot.slane %v2509_v48, 1  ;;  %v2531_v49 = vadd.f32 %v2530_v40, %v2529_v26 }
 0x176   : > { %v2511_v33 = vadd.f32 %v2510_v54, %v2509_v48  ;;  %v2532_v55 = vrot.slane %v2531_v49, 1 }
 0x178   : > { %2512 = vst [vmem:[%s280_s23] sm:$0x1] %v2511_v33  ;;  %v2533_v50 = vadd.f32 %v2532_v55, %v2531_v49 }
 0x17a   : > { %2534 = vst [vmem:[%s280_s23 + $0x1] sm:$0x1] %v2533_v50 }
 0x17b PF: > { %s16_s20 = sadd.s32 1, %s3305_s20   ;;  %s4157_s18 = smov %s3301_s19 }
 0x17c   : > { %p13_p5 = scmp.ge.s32.totalorder %s16_s20, 4   ;;  %s4158_s19 = smov %s4160_s21 }
 0x17e   :  { %15 = sbr.rel (!%p13_p5) target bundleno = 2 (0x2), region = 92 }

</bundles_post_ra>
